<compile_context>
chip_gen: v6e
topology: v6e:2x2x1
jax: 0.10.0
libtpu: 0.0.40
codegen_flags: <defaults>
</compile_context>

<pallas_src>
import functools

import jax
import jax.numpy as jnp
from jax import lax
from jax.experimental import pallas as pl
from jax.experimental.pallas import tpu as pltpu

EPS = 1e-5           # nn.LayerNorm default eps
FORGET_BIAS = 1.0


def _round_up(x, m):
    return ((x + m - 1) // m) * m


# ----------------------------- Pallas kernel ------------------------------ #

def stlstm_kernel(xpad_ref, hpad_ref, mpad_ref, cm_ref, masks_ref,
                  wx_ref, whm_ref, wo_ref, ln_ref,
                  h_out_ref, c_out_ref, m_out_ref, *, H, W, Ch):
    HW = H * W
    P0 = W + 1                       # left halo of the flattened spatial axis
    inv_n = 1.0 / (Ch * HW)

    mask_l = masks_ref[0:1, :]       # (1, HW) bf16: source column c-1 valid
    mask_r = masks_ref[1:2, :]       # (1, HW) bf16: source column c+1 valid
    ones_bf = jnp.ones((1, HW), dtype=jnp.bfloat16)   # bias row (hoisted)

    def conv3x3(xp, w):
        # xp: (Cp, L) halo-padded bf16 slab.  Build the (9*Cp+1, HW) shifted
        # tap stack (constant-1 bias row last) in VMEM and run ONE gate-fused
        # bf16 MXU matmul -> f32 accumulate.
        pieces = []
        for dy in (-1, 0, 1):
            for dx in (-1, 0, 1):
                s = P0 + dy * W + dx
                src = xp[:, s:s + HW]              # static lane-offset slice
                if dx == -1:
                    src = src * mask_l
                elif dx == 1:
                    src = src * mask_r
                pieces.append(src)
        pieces.append(ones_bf)                     # folds the conv bias
        xcol = jnp.concatenate(pieces, axis=0)     # (9*Cp+1, HW) bf16
        return jnp.dot(w, xcol, preferred_element_type=jnp.float32)  # (4Ch,HW)

    def branch(xp, w, goff):
        # conv (+bias) then full-slab LayerNorm per gate.  One-pass stats:
        # a single lane-reduce of the whole branch output, then per-gate
        # sublane sums of the (4*Ch, 1) column.  var = E[y^2] - mu^2.
        y = conv3x3(xp, w)                                   # (4*Ch, HW) f32
        s1 = jnp.sum(y, axis=1, keepdims=True)               # (4*Ch, 1)
        s2 = jnp.sum(y * y, axis=1, keepdims=True)           # (4*Ch, 1)
        outs = []
        for g in range(4):                                   # order [i, g, f, o]
            lo, hi = g * Ch, (g + 1) * Ch
            mu = jnp.sum(s1[lo:hi], keepdims=True) * inv_n         # (1, 1)
            ex2 = jnp.sum(s2[lo:hi], keepdims=True) * inv_n
            scale = lax.rsqrt(ex2 - mu * mu + EPS)
            gamma = ln_ref[goff + lo:goff + hi, :]
            beta = ln_ref[goff + 4 * Ch + lo:goff + 4 * Ch + hi, :]
            outs.append((y[lo:hi, :] - mu) * scale * gamma + beta)
        return outs

    i_x, g_x, f_x, o_x = branch(xpad_ref[0], wx_ref[...], 0)
    i_t, g_t, f_t, o_t = branch(hpad_ref[0], whm_ref[0], 8 * Ch)
    i_s, g_s, f_s, o_s = branch(mpad_ref[0], whm_ref[1], 16 * Ch)

    cm = cm_ref[0]                                 # (2*Ch, HW) f32
    c_t = cm[:Ch, :]
    m_t = cm[Ch:, :]

    # all gate tensors are (Ch, HW): fully lane-dense f32 VPU/EUP work
    i = jax.nn.sigmoid(i_x + i_t)
    i_ = jax.nn.sigmoid(i_x + i_s)
    g = jnp.tanh(g_x + g_t)
    g_ = jnp.tanh(g_x + g_s)
    f = jax.nn.sigmoid(f_x + f_t + FORGET_BIAS)
    f_ = jax.nn.sigmoid(f_x + f_s + FORGET_BIAS)
    o = jax.nn.sigmoid(o_x + o_t + o_s)

    new_m = f_ * m_t + i_ * g_
    new_c = f * c_t + i * g

    # 1x1 conv_o on concat([new_c, new_m]) with the bias folded via a ones row
    cell_in = jnp.concatenate(
        [new_c, new_m, jnp.ones((1, HW), dtype=jnp.float32)], axis=0)
    cell = jnp.dot(wo_ref[...], cell_in, preferred_element_type=jnp.float32)
    mu = jnp.sum(cell, keepdims=True) * inv_n
    ex2 = jnp.sum(cell * cell, keepdims=True) * inv_n
    scale = lax.rsqrt(ex2 - mu * mu + EPS)
    gwo = ln_ref[24 * Ch:25 * Ch, :]
    gbo = ln_ref[25 * Ch:26 * Ch, :]
    cell = (cell - mu) * scale * gwo + gbo

    h_out_ref[0] = o * jnp.tanh(cell)
    c_out_ref[0] = new_c
    m_out_ref[0] = new_m


# ------------------- One-time parameter packing (per model) ---------------- #

def prepare_params(params, H, W):
    """Pack/cast module parameters into kernel operands.  Call ONCE per model
    (not per timestep): removes all per-step pad/transpose/reshape traffic."""
    HW = H * W
    Ch = params['wo'].shape[0]
    Cin = params['wx'].shape[2]
    Cin_p = _round_up(Cin, 16)       # full bf16 sublane tiles per im2col piece
    Ch_p = _round_up(Ch, 16)

    def conv_taps(w, b, c_to):
        # (4, Ch, Cin, 3, 3) + (4, Ch) bias -> gate-fused, tap-stacked
        # (4*Ch, 9*c_to + 1) bf16 with the bias as the last column.
        g4, co, ci, kh, kw = w.shape
        w = jnp.pad(w, ((0, 0), (0, 0), (0, c_to - ci), (0, 0), (0, 0)))
        wt = jnp.transpose(w, (0, 1, 3, 4, 2)).reshape(g4 * co, kh * kw * c_to)
        return jnp.concatenate([wt, b.reshape(g4 * co, 1)],
                               axis=1).astype(jnp.bfloat16)

    wx = conv_taps(params['wx'], params['bx'], Cin_p)      # (4Ch, 9*Cin_p+1)
    wh = conv_taps(params['wh'], params['bh'], Ch_p)       # (4Ch, 9*Ch_p+1)
    wm = conv_taps(params['wm'], params['bm'], Ch_p)
    whm = jnp.stack([wh, wm], axis=0)                      # (2, 4Ch, 9*Ch_p+1)

    # 1x1 conv_o: columns [0:Ch)=new_c, [Ch:2Ch)=new_m, last = bias (f32)
    wo = jnp.concatenate([params['wo'][:, :, 0, 0],
                          params['bo'].reshape(Ch, 1)], axis=1)

    # all LayerNorm affine params in one lane-dense f32 slab (26*Ch, HW)
    ln = jnp.concatenate([
        params['lnwx'].reshape(4 * Ch, HW), params['lnbx'].reshape(4 * Ch, HW),
        params['lnwh'].reshape(4 * Ch, HW), params['lnbh'].reshape(4 * Ch, HW),
        params['lnwm'].reshape(4 * Ch, HW), params['lnbm'].reshape(4 * Ch, HW),
        params['lnwo'].reshape(Ch, HW), params['lnbo'].reshape(Ch, HW),
    ], axis=0).astype(jnp.float32)

    # column-validity masks for the +-1 lane shifts of the flattened spatial axis
    col = jnp.arange(HW, dtype=jnp.int32) % W
    masks = jnp.stack([(col > 0), (col < W - 1)]).astype(jnp.bfloat16)

    return {'wx': wx, 'whm': whm, 'wo': wo, 'ln': ln, 'masks': masks}


# --------------------------- Per-timestep wrapper --------------------------- #

def stlstm_cell_pallas(x_t, h_t, c_t, m_t, prep):
    """x_t/h_t/c_t/m_t are NCHW float32; `prep` is prepare_params(...) output."""
    B, Cin, H, W = x_t.shape
    Ch = prep['wo'].shape[0]
    Cin_p = (prep['wx'].shape[1] - 1) // 9
    Ch_p = (prep['whm'].shape[2] - 1) // 9
    HW = H * W
    P0 = W + 1
    L = _round_up(HW + 2 * P0, 128)      # halo-padded, lane-aligned length

    def halo_pad(a, c_to):
        b, c = a.shape[0], a.shape[1]
        flat = a.reshape(b, c, HW).astype(jnp.bfloat16)
        return jnp.pad(flat, ((0, 0), (0, c_to - c), (P0, L - P0 - HW)))

    xpad = halo_pad(x_t, Cin_p)          # (B, Cin_p, L) bf16
    hpad = halo_pad(h_t, Ch_p)           # (B, Ch_p,  L) bf16
    mpad = halo_pad(m_t, Ch_p)           # (B, Ch_p,  L) bf16
    cm = jnp.concatenate([c_t.reshape(B, Ch, HW),
                          m_t.reshape(B, Ch, HW)], axis=1)   # (B, 2Ch, HW) f32

    batch_blk = lambda c, l: pl.BlockSpec((1, c, l), lambda b: (b, 0, 0))

    def rep(shape):
        nd = len(shape)
        return pl.BlockSpec(tuple(shape), lambda b, _nd=nd: (0,) * _nd)

    kernel = functools.partial(stlstm_kernel, H=H, W=W, Ch=Ch)

    fn = pl.pallas_call(
        kernel,
        out_shape=[jax.ShapeDtypeStruct((B, Ch, HW), jnp.float32)
                   for _ in range(3)],
        grid_spec=pltpu.PrefetchScalarGridSpec(
            num_scalar_prefetch=0,
            grid=(B,),
            in_specs=[
                batch_blk(Cin_p, L), batch_blk(Ch_p, L), batch_blk(Ch_p, L),
                batch_blk(2 * Ch, HW),
                rep(prep['masks'].shape),
                rep(prep['wx'].shape), rep(prep['whm'].shape),
                rep(prep['wo'].shape), rep(prep['ln'].shape),
            ],
            out_specs=[batch_blk(Ch, HW) for _ in range(3)],
        ),
        compiler_params=pltpu.CompilerParams(
            dimension_semantics=("parallel",),
            vmem_limit_bytes=32 * 1024 * 1024),
    )

    h_f, c_f, m_f = fn(xpad, hpad, mpad, cm,
                       prep['masks'], prep['wx'], prep['whm'],
                       prep['wo'], prep['ln'])

    unflat = lambda a: a.reshape(B, Ch, H, W)    # free: already channel-major
    return unflat(h_f), unflat(c_f), unflat(m_f)


# --------------------------- Pure-JAX reference ----------------------------- #

def _ref_conv(x, w, b, pad):
    y = lax.conv_general_dilated(
        x, w, (1, 1), [(pad, pad), (pad, pad)],
        dimension_numbers=('NCHW', 'OIHW', 'NCHW'),
        precision=lax.Precision.HIGHEST)
    return y + b[None, :, None, None]


def _ref_ln(x, gw, gb):
    mu = jnp.mean(x, axis=(1, 2, 3), keepdims=True)
    var = jnp.mean((x - mu) ** 2, axis=(1, 2, 3), keepdims=True)
    return (x - mu) / jnp.sqrt(var + EPS) * gw[None] + gb[None]


def stlstm_cell_reference(x_t, h_t, c_t, m_t, params):
    def branch(inp, w, b, gw, gb, g, pad):
        return _ref_ln(_ref_conv(inp, w[g], b[g], pad), gw[g], gb[g])

    p = params
    i_x, g_x, f_x, o_x = [branch(x_t, p['wx'], p['bx'], p['lnwx'], p['lnbx'], g, 1)
                          for g in range(4)]
    i_t, g_t, f_t, o_t = [branch(h_t, p['wh'], p['bh'], p['lnwh'], p['lnbh'], g, 1)
                          for g in range(4)]
    i_s, g_s, f_s, o_s = [branch(m_t, p['wm'], p['bm'], p['lnwm'], p['lnbm'], g, 1)
                          for g in range(4)]

    i = jax.nn.sigmoid(i_x + i_t)
    i_ = jax.nn.sigmoid(i_x + i_s)
    g = jnp.tanh(g_x + g_t)
    g_ = jnp.tanh(g_x + g_s)
    f = jax.nn.sigmoid(f_x + f_t + FORGET_BIAS)
    f_ = jax.nn.sigmoid(f_x + f_s + FORGET_BIAS)
    o = jax.nn.sigmoid(o_x + o_t + o_s)

    new_m = f_ * m_t + i_ * g_
    new_c = f * c_t + i * g
    cell = jnp.concatenate([new_c, new_m], axis=1)
    cell = _ref_ln(_ref_conv(cell, p['wo'], p['bo'], 0), p['lnwo'], p['lnbo'])
    new_h = o * jnp.tanh(cell)
    return new_h, new_c, new_m


# ------------------------------ Param init ---------------------------------- #

def init_params(key, in_ch, num_hidden, H, W, k):
    ks = jax.random.split(key, 16)
    n = lambda kk, shape, s: s * jax.random.normal(kk, shape, dtype=jnp.float32)
    return {
        'wx':   n(ks[0], (4, num_hidden, in_ch, k, k), 0.1),
        'bx':   n(ks[1], (4, num_hidden), 0.05),
        'lnwx': 1.0 + n(ks[2], (4, num_hidden, H, W), 0.1),
        'lnbx': n(ks[3], (4, num_hidden, H, W), 0.05),
        'wh':   n(ks[4], (4, num_hidden, num_hidden, k, k), 0.1),
        'bh':   n(ks[5], (4, num_hidden), 0.05),
        'lnwh': 1.0 + n(ks[6], (4, num_hidden, H, W), 0.1),
        'lnbh': n(ks[7], (4, num_hidden, H, W), 0.05),
        'wm':   n(ks[8], (4, num_hidden, num_hidden, k, k), 0.1),
        'bm':   n(ks[9], (4, num_hidden), 0.05),
        'lnwm': 1.0 + n(ks[10], (4, num_hidden, H, W), 0.1),
        'lnbm': n(ks[11], (4, num_hidden, H, W), 0.05),
        'wo':   n(ks[12], (num_hidden, 2 * num_hidden, 1, 1), 0.1),
        'bo':   n(ks[13], (num_hidden,), 0.05),
        'lnwo': 1.0 + n(ks[14], (num_hidden, H, W), 0.1),
        'lnbo': n(ks[15], (num_hidden, H, W), 0.05),
    }


# --------------------------------- main ------------------------------------- #

if __name__ == "__main__":
    B, Cin, Ch, H, W, K = 2, 4, 32, 16, 16, 3

    key = jax.random.PRNGKey(0)
    kp, kx, kh, kc, km = jax.random.split(key, 5)
    params = init_params(kp, Cin, Ch, H, W, K)

    x_t = jax.random.normal(kx, (B, Cin, H, W), dtype=jnp.float32)
    h_t = jax.random.normal(kh, (B, Ch, H, W), dtype=jnp.float32)
    c_t = jax.random.normal(kc, (B, Ch, H, W), dtype=jnp.float32)
    m_t = jax.random.normal(km, (B, Ch, H, W), dtype=jnp.float32)

    # parameter packing happens ONCE per model, outside the per-step path
    prep = prepare_params(params, H, W)

    fwd = jax.jit(stlstm_cell_pallas)
    new_h, new_c, new_m = jax.block_until_ready(fwd(x_t, h_t, c_t, m_t, prep))

    ref_h, ref_c, ref_m = jax.block_until_ready(
        stlstm_cell_reference(x_t, h_t, c_t, m_t, params))

    import numpy as np
    # Kernel matmul operands (im2col slabs + conv weights) are bf16 per the
    # perf review; the reference runs HIGHEST-precision f32 convs, hence the
    # bf16-class tolerance below.
    tol = dict(rtol=3e-2, atol=3e-2)
    np.testing.assert_allclose(np.asarray(new_h), np.asarray(ref_h), **tol)
    np.testing.assert_allclose(np.asarray(new_c), np.asarray(ref_c), **tol)
    np.testing.assert_allclose(np.asarray(new_m), np.asarray(ref_m), **tol)

    print("KERNEL_OK")
</pallas_src>

<mosaic_0001>
module attributes {stable_mosaic.version = 11 : i64} {
  func.func @stlstm_kernel(%arg0: i32, %arg1: memref<1x16x384xbf16, #tpu.memory_space<vmem>>, %arg2: memref<1x32x384xbf16, #tpu.memory_space<vmem>>, %arg3: memref<1x32x384xbf16, #tpu.memory_space<vmem>>, %arg4: memref<1x64x256xf32, #tpu.memory_space<vmem>>, %arg5: memref<2x256xbf16, #tpu.memory_space<vmem>>, %arg6: memref<128x145xbf16, #tpu.memory_space<vmem>>, %arg7: memref<2x128x289xbf16, #tpu.memory_space<vmem>>, %arg8: memref<32x65xf32, #tpu.memory_space<vmem>>, %arg9: memref<832x256xf32, #tpu.memory_space<vmem>>, %arg10: memref<1x32x256xf32, #tpu.memory_space<vmem>>, %arg11: memref<1x32x256xf32, #tpu.memory_space<vmem>>, %arg12: memref<1x32x256xf32, #tpu.memory_space<vmem>>) attributes {dimension_semantics = [#tpu.dimension_semantics<parallel>], iteration_bounds = array<i64: 2>, scalar_prefetch = 0 : i64, scratch_operands = 0 : i64, tpu.core_type = #tpu.core_type<tc>, window_params = [{transform_indices = @transform_0, window_bounds = array<i64: 1, 16, 384>}, {transform_indices = @transform_1, window_bounds = array<i64: 1, 32, 384>}, {transform_indices = @transform_2, window_bounds = array<i64: 1, 32, 384>}, {transform_indices = @transform_3, window_bounds = array<i64: 1, 64, 256>}, {pipeline_mode = #tpu.pipeline_mode<synchronous>, transform_indices = @transform_4, window_bounds = array<i64: 2, 256>}, {pipeline_mode = #tpu.pipeline_mode<synchronous>, transform_indices = @transform_5, window_bounds = array<i64: 128, 145>}, {pipeline_mode = #tpu.pipeline_mode<synchronous>, transform_indices = @transform_6, window_bounds = array<i64: 2, 128, 289>}, {pipeline_mode = #tpu.pipeline_mode<synchronous>, transform_indices = @transform_7, window_bounds = array<i64: 32, 65>}, {pipeline_mode = #tpu.pipeline_mode<synchronous>, transform_indices = @transform_8, window_bounds = array<i64: 832, 256>}, {transform_indices = @transform_9, window_bounds = array<i64: 1, 32, 256>}, {transform_indices = @transform_10, window_bounds = array<i64: 1, 32, 256>}, {transform_indices = @transform_11, window_bounds = array<i64: 1, 32, 256>}]} {
    %c0 = arith.constant 0 : index
    %c0_0 = arith.constant 0 : index
    %0 = vector.load %arg5[%c0, %c0_0] : memref<2x256xbf16, #tpu.memory_space<vmem>>, vector<1x256xbf16>
    %c1 = arith.constant 1 : index
    %c0_1 = arith.constant 0 : index
    %1 = vector.load %arg5[%c1, %c0_1] : memref<2x256xbf16, #tpu.memory_space<vmem>>, vector<1x256xbf16>
    %cst = arith.constant 1.000000e+00 : bf16
    %2 = vector.broadcast %cst : bf16 to vector<1x256xbf16>
    %c0_2 = arith.constant 0 : index
    %c0_3 = arith.constant 0 : index
    %c0_4 = arith.constant 0 : index
    %3 = vector.load %arg1[%c0_2, %c0_3, %c0_4] : memref<1x16x384xbf16, #tpu.memory_space<vmem>>, vector<1x16x384xbf16>
    %4 = vector.shape_cast %3 : vector<1x16x384xbf16> to vector<16x384xbf16>
    %c0_5 = arith.constant 0 : index
    %c0_6 = arith.constant 0 : index
    %5 = vector.load %arg6[%c0_5, %c0_6] : memref<128x145xbf16, #tpu.memory_space<vmem>>, vector<128x145xbf16>
    %6 = vector.extract_strided_slice %4 {offsets = [0, 0], sizes = [16, 256], strides = [1, 1]} : vector<16x384xbf16> to vector<16x256xbf16>
    %7 = vector.broadcast %0 : vector<1x256xbf16> to vector<16x256xbf16>
    %8 = arith.mulf %6, %7 : vector<16x256xbf16>
    %9 = vector.extract_strided_slice %4 {offsets = [0, 1], sizes = [16, 256], strides = [1, 1]} : vector<16x384xbf16> to vector<16x256xbf16>
    %10 = vector.extract_strided_slice %4 {offsets = [0, 2], sizes = [16, 256], strides = [1, 1]} : vector<16x384xbf16> to vector<16x256xbf16>
    %11 = vector.broadcast %1 : vector<1x256xbf16> to vector<16x256xbf16>
    %12 = arith.mulf %10, %11 : vector<16x256xbf16>
    %13 = vector.extract_strided_slice %4 {offsets = [0, 16], sizes = [16, 256], strides = [1, 1]} : vector<16x384xbf16> to vector<16x256xbf16>
    %14 = vector.broadcast %0 : vector<1x256xbf16> to vector<16x256xbf16>
    %15 = arith.mulf %13, %14 : vector<16x256xbf16>
    %16 = vector.extract_strided_slice %4 {offsets = [0, 17], sizes = [16, 256], strides = [1, 1]} : vector<16x384xbf16> to vector<16x256xbf16>
    %17 = vector.extract_strided_slice %4 {offsets = [0, 18], sizes = [16, 256], strides = [1, 1]} : vector<16x384xbf16> to vector<16x256xbf16>
    %18 = vector.broadcast %1 : vector<1x256xbf16> to vector<16x256xbf16>
    %19 = arith.mulf %17, %18 : vector<16x256xbf16>
    %20 = vector.extract_strided_slice %4 {offsets = [0, 32], sizes = [16, 256], strides = [1, 1]} : vector<16x384xbf16> to vector<16x256xbf16>
    %21 = vector.broadcast %0 : vector<1x256xbf16> to vector<16x256xbf16>
    %22 = arith.mulf %20, %21 : vector<16x256xbf16>
    %23 = vector.extract_strided_slice %4 {offsets = [0, 33], sizes = [16, 256], strides = [1, 1]} : vector<16x384xbf16> to vector<16x256xbf16>
    %24 = vector.extract_strided_slice %4 {offsets = [0, 34], sizes = [16, 256], strides = [1, 1]} : vector<16x384xbf16> to vector<16x256xbf16>
    %25 = vector.broadcast %1 : vector<1x256xbf16> to vector<16x256xbf16>
    %26 = arith.mulf %24, %25 : vector<16x256xbf16>
    %27 = tpu.concatenate %8, %9, %12, %15, %16, %19, %22, %23, %26, %2 in 0 : vector<16x256xbf16>, vector<16x256xbf16>, vector<16x256xbf16>, vector<16x256xbf16>, vector<16x256xbf16>, vector<16x256xbf16>, vector<16x256xbf16>, vector<16x256xbf16>, vector<16x256xbf16>, vector<1x256xbf16> -> vector<145x256xbf16>
    %cst_7 = arith.constant dense<0.000000e+00> : vector<128x256xf32>
    %28 = tpu.matmul %5, %27, %cst_7 {dimension_numbers = #tpu.dot_dimension_numbers<[1], [0], [0], [1], [0, 0, 1, 1], [], []>} : vector<128x145xbf16>, vector<145x256xbf16>, vector<128x256xf32> -> vector<128x256xf32>
    %cst_8 = arith.constant dense<0.000000e+00> : vector<128xf32>
    %29 = vector.multi_reduction <add>, %28, %cst_8 [1] : vector<128x256xf32> to vector<128xf32>
    %30 = vector.shape_cast %29 : vector<128xf32> to vector<128x1xf32>
    %31 = arith.mulf %28, %28 : vector<128x256xf32>
    %cst_9 = arith.constant dense<0.000000e+00> : vector<128xf32>
    %32 = vector.multi_reduction <add>, %31, %cst_9 [1] : vector<128x256xf32> to vector<128xf32>
    %33 = vector.shape_cast %32 : vector<128xf32> to vector<128x1xf32>
    %34 = vector.extract_strided_slice %30 {offsets = [0, 0], sizes = [32, 1], strides = [1, 1]} : vector<128x1xf32> to vector<32x1xf32>
    %35 = vector.shape_cast %34 : vector<32x1xf32> to vector<1x32x1xf32>
    %cst_10 = arith.constant dense<0.000000e+00> : vector<1xf32>
    %36 = vector.multi_reduction <add>, %35, %cst_10 [1, 2] : vector<1x32x1xf32> to vector<1xf32>
    %37 = vector.shape_cast %36 : vector<1xf32> to vector<1x1x1xf32>
    %38 = vector.extract %37[0, 0, 0] : f32 from vector<1x1x1xf32>
    %39 = vector.broadcast %38 : f32 to vector<1x1xf32>
    %cst_11 = arith.constant 1.22070313E-4 : f32
    %40 = vector.broadcast %cst_11 : f32 to vector<1x1xf32>
    %41 = arith.mulf %39, %40 : vector<1x1xf32>
    %42 = vector.extract_strided_slice %33 {offsets = [0, 0], sizes = [32, 1], strides = [1, 1]} : vector<128x1xf32> to vector<32x1xf32>
    %43 = vector.shape_cast %42 : vector<32x1xf32> to vector<1x32x1xf32>
    %cst_12 = arith.constant dense<0.000000e+00> : vector<1xf32>
    %44 = vector.multi_reduction <add>, %43, %cst_12 [1, 2] : vector<1x32x1xf32> to vector<1xf32>
    %45 = vector.shape_cast %44 : vector<1xf32> to vector<1x1x1xf32>
    %46 = vector.extract %45[0, 0, 0] : f32 from vector<1x1x1xf32>
    %47 = vector.broadcast %46 : f32 to vector<1x1xf32>
    %cst_13 = arith.constant 1.22070313E-4 : f32
    %48 = vector.broadcast %cst_13 : f32 to vector<1x1xf32>
    %49 = arith.mulf %47, %48 : vector<1x1xf32>
    %50 = arith.mulf %41, %41 : vector<1x1xf32>
    %51 = arith.subf %49, %50 : vector<1x1xf32>
    %cst_14 = arith.constant 9.99999974E-6 : f32
    %52 = vector.broadcast %cst_14 : f32 to vector<1x1xf32>
    %53 = arith.addf %51, %52 : vector<1x1xf32>
    %54 = math.rsqrt %53 : vector<1x1xf32>
    %c0_15 = arith.constant 0 : index
    %c0_16 = arith.constant 0 : index
    %55 = vector.load %arg9[%c0_15, %c0_16] : memref<832x256xf32, #tpu.memory_space<vmem>>, vector<32x256xf32>
    %c128 = arith.constant 128 : index
    %c0_17 = arith.constant 0 : index
    %56 = vector.load %arg9[%c128, %c0_17] : memref<832x256xf32, #tpu.memory_space<vmem>>, vector<32x256xf32>
    %57 = vector.extract_strided_slice %28 {offsets = [0, 0], sizes = [32, 256], strides = [1, 1]} : vector<128x256xf32> to vector<32x256xf32>
    %58 = vector.broadcast %41 : vector<1x1xf32> to vector<32x256xf32>
    %59 = arith.subf %57, %58 : vector<32x256xf32>
    %60 = vector.broadcast %54 : vector<1x1xf32> to vector<32x256xf32>
    %61 = arith.mulf %59, %60 : vector<32x256xf32>
    %62 = arith.mulf %61, %55 : vector<32x256xf32>
    %63 = arith.addf %62, %56 : vector<32x256xf32>
    %64 = vector.extract_strided_slice %30 {offsets = [32, 0], sizes = [32, 1], strides = [1, 1]} : vector<128x1xf32> to vector<32x1xf32>
    %65 = vector.shape_cast %64 : vector<32x1xf32> to vector<1x32x1xf32>
    %cst_18 = arith.constant dense<0.000000e+00> : vector<1xf32>
    %66 = vector.multi_reduction <add>, %65, %cst_18 [1, 2] : vector<1x32x1xf32> to vector<1xf32>
    %67 = vector.shape_cast %66 : vector<1xf32> to vector<1x1x1xf32>
    %68 = vector.extract %67[0, 0, 0] : f32 from vector<1x1x1xf32>
    %69 = vector.broadcast %68 : f32 to vector<1x1xf32>
    %cst_19 = arith.constant 1.22070313E-4 : f32
    %70 = vector.broadcast %cst_19 : f32 to vector<1x1xf32>
    %71 = arith.mulf %69, %70 : vector<1x1xf32>
    %72 = vector.extract_strided_slice %33 {offsets = [32, 0], sizes = [32, 1], strides = [1, 1]} : vector<128x1xf32> to vector<32x1xf32>
    %73 = vector.shape_cast %72 : vector<32x1xf32> to vector<1x32x1xf32>
    %cst_20 = arith.constant dense<0.000000e+00> : vector<1xf32>
    %74 = vector.multi_reduction <add>, %73, %cst_20 [1, 2] : vector<1x32x1xf32> to vector<1xf32>
    %75 = vector.shape_cast %74 : vector<1xf32> to vector<1x1x1xf32>
    %76 = vector.extract %75[0, 0, 0] : f32 from vector<1x1x1xf32>
    %77 = vector.broadcast %76 : f32 to vector<1x1xf32>
    %cst_21 = arith.constant 1.22070313E-4 : f32
    %78 = vector.broadcast %cst_21 : f32 to vector<1x1xf32>
    %79 = arith.mulf %77, %78 : vector<1x1xf32>
    %80 = arith.mulf %71, %71 : vector<1x1xf32>
    %81 = arith.subf %79, %80 : vector<1x1xf32>
    %cst_22 = arith.constant 9.99999974E-6 : f32
    %82 = vector.broadcast %cst_22 : f32 to vector<1x1xf32>
    %83 = arith.addf %81, %82 : vector<1x1xf32>
    %84 = math.rsqrt %83 : vector<1x1xf32>
    %c32 = arith.constant 32 : index
    %c0_23 = arith.constant 0 : index
    %85 = vector.load %arg9[%c32, %c0_23] : memref<832x256xf32, #tpu.memory_space<vmem>>, vector<32x256xf32>
    %c160 = arith.constant 160 : index
    %c0_24 = arith.constant 0 : index
    %86 = vector.load %arg9[%c160, %c0_24] : memref<832x256xf32, #tpu.memory_space<vmem>>, vector<32x256xf32>
    %87 = vector.extract_strided_slice %28 {offsets = [32, 0], sizes = [32, 256], strides = [1, 1]} : vector<128x256xf32> to vector<32x256xf32>
    %88 = vector.broadcast %71 : vector<1x1xf32> to vector<32x256xf32>
    %89 = arith.subf %87, %88 : vector<32x256xf32>
    %90 = vector.broadcast %84 : vector<1x1xf32> to vector<32x256xf32>
    %91 = arith.mulf %89, %90 : vector<32x256xf32>
    %92 = arith.mulf %91, %85 : vector<32x256xf32>
    %93 = arith.addf %92, %86 : vector<32x256xf32>
    %94 = vector.extract_strided_slice %30 {offsets = [64, 0], sizes = [32, 1], strides = [1, 1]} : vector<128x1xf32> to vector<32x1xf32>
    %95 = vector.shape_cast %94 : vector<32x1xf32> to vector<1x32x1xf32>
    %cst_25 = arith.constant dense<0.000000e+00> : vector<1xf32>
    %96 = vector.multi_reduction <add>, %95, %cst_25 [1, 2] : vector<1x32x1xf32> to vector<1xf32>
    %97 = vector.shape_cast %96 : vector<1xf32> to vector<1x1x1xf32>
    %98 = vector.extract %97[0, 0, 0] : f32 from vector<1x1x1xf32>
    %99 = vector.broadcast %98 : f32 to vector<1x1xf32>
    %cst_26 = arith.constant 1.22070313E-4 : f32
    %100 = vector.broadcast %cst_26 : f32 to vector<1x1xf32>
    %101 = arith.mulf %99, %100 : vector<1x1xf32>
    %102 = vector.extract_strided_slice %33 {offsets = [64, 0], sizes = [32, 1], strides = [1, 1]} : vector<128x1xf32> to vector<32x1xf32>
    %103 = vector.shape_cast %102 : vector<32x1xf32> to vector<1x32x1xf32>
    %cst_27 = arith.constant dense<0.000000e+00> : vector<1xf32>
    %104 = vector.multi_reduction <add>, %103, %cst_27 [1, 2] : vector<1x32x1xf32> to vector<1xf32>
    %105 = vector.shape_cast %104 : vector<1xf32> to vector<1x1x1xf32>
    %106 = vector.extract %105[0, 0, 0] : f32 from vector<1x1x1xf32>
    %107 = vector.broadcast %106 : f32 to vector<1x1xf32>
    %cst_28 = arith.constant 1.22070313E-4 : f32
    %108 = vector.broadcast %cst_28 : f32 to vector<1x1xf32>
    %109 = arith.mulf %107, %108 : vector<1x1xf32>
    %110 = arith.mulf %101, %101 : vector<1x1xf32>
    %111 = arith.subf %109, %110 : vector<1x1xf32>
    %cst_29 = arith.constant 9.99999974E-6 : f32
    %112 = vector.broadcast %cst_29 : f32 to vector<1x1xf32>
    %113 = arith.addf %111, %112 : vector<1x1xf32>
    %114 = math.rsqrt %113 : vector<1x1xf32>
    %c64 = arith.constant 64 : index
    %c0_30 = arith.constant 0 : index
    %115 = vector.load %arg9[%c64, %c0_30] : memref<832x256xf32, #tpu.memory_space<vmem>>, vector<32x256xf32>
    %c192 = arith.constant 192 : index
    %c0_31 = arith.constant 0 : index
    %116 = vector.load %arg9[%c192, %c0_31] : memref<832x256xf32, #tpu.memory_space<vmem>>, vector<32x256xf32>
    %117 = vector.extract_strided_slice %28 {offsets = [64, 0], sizes = [32, 256], strides = [1, 1]} : vector<128x256xf32> to vector<32x256xf32>
    %118 = vector.broadcast %101 : vector<1x1xf32> to vector<32x256xf32>
    %119 = arith.subf %117, %118 : vector<32x256xf32>
    %120 = vector.broadcast %114 : vector<1x1xf32> to vector<32x256xf32>
    %121 = arith.mulf %119, %120 : vector<32x256xf32>
    %122 = arith.mulf %121, %115 : vector<32x256xf32>
    %123 = arith.addf %122, %116 : vector<32x256xf32>
    %124 = vector.extract_strided_slice %30 {offsets = [96, 0], sizes = [32, 1], strides = [1, 1]} : vector<128x1xf32> to vector<32x1xf32>
    %125 = vector.shape_cast %124 : vector<32x1xf32> to vector<1x32x1xf32>
    %cst_32 = arith.constant dense<0.000000e+00> : vector<1xf32>
    %126 = vector.multi_reduction <add>, %125, %cst_32 [1, 2] : vector<1x32x1xf32> to vector<1xf32>
    %127 = vector.shape_cast %126 : vector<1xf32> to vector<1x1x1xf32>
    %128 = vector.extract %127[0, 0, 0] : f32 from vector<1x1x1xf32>
    %129 = vector.broadcast %128 : f32 to vector<1x1xf32>
    %cst_33 = arith.constant 1.22070313E-4 : f32
    %130 = vector.broadcast %cst_33 : f32 to vector<1x1xf32>
    %131 = arith.mulf %129, %130 : vector<1x1xf32>
    %132 = vector.extract_strided_slice %33 {offsets = [96, 0], sizes = [32, 1], strides = [1, 1]} : vector<128x1xf32> to vector<32x1xf32>
    %133 = vector.shape_cast %132 : vector<32x1xf32> to vector<1x32x1xf32>
    %cst_34 = arith.constant dense<0.000000e+00> : vector<1xf32>
    %134 = vector.multi_reduction <add>, %133, %cst_34 [1, 2] : vector<1x32x1xf32> to vector<1xf32>
    %135 = vector.shape_cast %134 : vector<1xf32> to vector<1x1x1xf32>
    %136 = vector.extract %135[0, 0, 0] : f32 from vector<1x1x1xf32>
    %137 = vector.broadcast %136 : f32 to vector<1x1xf32>
    %cst_35 = arith.constant 1.22070313E-4 : f32
    %138 = vector.broadcast %cst_35 : f32 to vector<1x1xf32>
    %139 = arith.mulf %137, %138 : vector<1x1xf32>
    %140 = arith.mulf %131, %131 : vector<1x1xf32>
    %141 = arith.subf %139, %140 : vector<1x1xf32>
    %cst_36 = arith.constant 9.99999974E-6 : f32
    %142 = vector.broadcast %cst_36 : f32 to vector<1x1xf32>
    %143 = arith.addf %141, %142 : vector<1x1xf32>
    %144 = math.rsqrt %143 : vector<1x1xf32>
    %c96 = arith.constant 96 : index
    %c0_37 = arith.constant 0 : index
    %145 = vector.load %arg9[%c96, %c0_37] : memref<832x256xf32, #tpu.memory_space<vmem>>, vector<32x256xf32>
    %c224 = arith.constant 224 : index
    %c0_38 = arith.constant 0 : index
    %146 = vector.load %arg9[%c224, %c0_38] : memref<832x256xf32, #tpu.memory_space<vmem>>, vector<32x256xf32>
    %147 = vector.extract_strided_slice %28 {offsets = [96, 0], sizes = [32, 256], strides = [1, 1]} : vector<128x256xf32> to vector<32x256xf32>
    %148 = vector.broadcast %131 : vector<1x1xf32> to vector<32x256xf32>
    %149 = arith.subf %147, %148 : vector<32x256xf32>
    %150 = vector.broadcast %144 : vector<1x1xf32> to vector<32x256xf32>
    %151 = arith.mulf %149, %150 : vector<32x256xf32>
    %152 = arith.mulf %151, %145 : vector<32x256xf32>
    %153 = arith.addf %152, %146 : vector<32x256xf32>
    %c0_39 = arith.constant 0 : index
    %c0_40 = arith.constant 0 : index
    %c0_41 = arith.constant 0 : index
    %154 = vector.load %arg2[%c0_39, %c0_40, %c0_41] : memref<1x32x384xbf16, #tpu.memory_space<vmem>>, vector<1x32x384xbf16>
    %155 = vector.shape_cast %154 : vector<1x32x384xbf16> to vector<32x384xbf16>
    %c0_42 = arith.constant 0 : index
    %c0_43 = arith.constant 0 : index
    %c0_44 = arith.constant 0 : index
    %156 = vector.load %arg7[%c0_42, %c0_43, %c0_44] : memref<2x128x289xbf16, #tpu.memory_space<vmem>>, vector<1x128x289xbf16>
    %157 = vector.shape_cast %156 : vector<1x128x289xbf16> to vector<128x289xbf16>
    %158 = vector.extract_strided_slice %155 {offsets = [0, 0], sizes = [32, 256], strides = [1, 1]} : vector<32x384xbf16> to vector<32x256xbf16>
    %159 = vector.broadcast %0 : vector<1x256xbf16> to vector<32x256xbf16>
    %160 = arith.mulf %158, %159 : vector<32x256xbf16>
    %161 = vector.extract_strided_slice %155 {offsets = [0, 1], sizes = [32, 256], strides = [1, 1]} : vector<32x384xbf16> to vector<32x256xbf16>
    %162 = vector.extract_strided_slice %155 {offsets = [0, 2], sizes = [32, 256], strides = [1, 1]} : vector<32x384xbf16> to vector<32x256xbf16>
    %163 = vector.broadcast %1 : vector<1x256xbf16> to vector<32x256xbf16>
    %164 = arith.mulf %162, %163 : vector<32x256xbf16>
    %165 = vector.extract_strided_slice %155 {offsets = [0, 16], sizes = [32, 256], strides = [1, 1]} : vector<32x384xbf16> to vector<32x256xbf16>
    %166 = vector.broadcast %0 : vector<1x256xbf16> to vector<32x256xbf16>
    %167 = arith.mulf %165, %166 : vector<32x256xbf16>
    %168 = vector.extract_strided_slice %155 {offsets = [0, 17], sizes = [32, 256], strides = [1, 1]} : vector<32x384xbf16> to vector<32x256xbf16>
    %169 = vector.extract_strided_slice %155 {offsets = [0, 18], sizes = [32, 256], strides = [1, 1]} : vector<32x384xbf16> to vector<32x256xbf16>
    %170 = vector.broadcast %1 : vector<1x256xbf16> to vector<32x256xbf16>
    %171 = arith.mulf %169, %170 : vector<32x256xbf16>
    %172 = vector.extract_strided_slice %155 {offsets = [0, 32], sizes = [32, 256], strides = [1, 1]} : vector<32x384xbf16> to vector<32x256xbf16>
    %173 = vector.broadcast %0 : vector<1x256xbf16> to vector<32x256xbf16>
    %174 = arith.mulf %172, %173 : vector<32x256xbf16>
    %175 = vector.extract_strided_slice %155 {offsets = [0, 33], sizes = [32, 256], strides = [1, 1]} : vector<32x384xbf16> to vector<32x256xbf16>
    %176 = vector.extract_strided_slice %155 {offsets = [0, 34], sizes = [32, 256], strides = [1, 1]} : vector<32x384xbf16> to vector<32x256xbf16>
    %177 = vector.broadcast %1 : vector<1x256xbf16> to vector<32x256xbf16>
    %178 = arith.mulf %176, %177 : vector<32x256xbf16>
    %179 = tpu.concatenate %160, %161, %164, %167, %168, %171, %174, %175, %178, %2 in 0 : vector<32x256xbf16>, vector<32x256xbf16>, vector<32x256xbf16>, vector<32x256xbf16>, vector<32x256xbf16>, vector<32x256xbf16>, vector<32x256xbf16>, vector<32x256xbf16>, vector<32x256xbf16>, vector<1x256xbf16> -> vector<289x256xbf16>
    %cst_45 = arith.constant dense<0.000000e+00> : vector<128x256xf32>
    %180 = tpu.matmul %157, %179, %cst_45 {dimension_numbers = #tpu.dot_dimension_numbers<[1], [0], [0], [1], [0, 0, 1, 1], [], []>} : vector<128x289xbf16>, vector<289x256xbf16>, vector<128x256xf32> -> vector<128x256xf32>
    %cst_46 = arith.constant dense<0.000000e+00> : vector<128xf32>
    %181 = vector.multi_reduction <add>, %180, %cst_46 [1] : vector<128x256xf32> to vector<128xf32>
    %182 = vector.shape_cast %181 : vector<128xf32> to vector<128x1xf32>
    %183 = arith.mulf %180, %180 : vector<128x256xf32>
    %cst_47 = arith.constant dense<0.000000e+00> : vector<128xf32>
    %184 = vector.multi_reduction <add>, %183, %cst_47 [1] : vector<128x256xf32> to vector<128xf32>
    %185 = vector.shape_cast %184 : vector<128xf32> to vector<128x1xf32>
    %186 = vector.extract_strided_slice %182 {offsets = [0, 0], sizes = [32, 1], strides = [1, 1]} : vector<128x1xf32> to vector<32x1xf32>
    %187 = vector.shape_cast %186 : vector<32x1xf32> to vector<1x32x1xf32>
    %cst_48 = arith.constant dense<0.000000e+00> : vector<1xf32>
    %188 = vector.multi_reduction <add>, %187, %cst_48 [1, 2] : vector<1x32x1xf32> to vector<1xf32>
    %189 = vector.shape_cast %188 : vector<1xf32> to vector<1x1x1xf32>
    %190 = vector.extract %189[0, 0, 0] : f32 from vector<1x1x1xf32>
    %191 = vector.broadcast %190 : f32 to vector<1x1xf32>
    %cst_49 = arith.constant 1.22070313E-4 : f32
    %192 = vector.broadcast %cst_49 : f32 to vector<1x1xf32>
    %193 = arith.mulf %191, %192 : vector<1x1xf32>
    %194 = vector.extract_strided_slice %185 {offsets = [0, 0], sizes = [32, 1], strides = [1, 1]} : vector<128x1xf32> to vector<32x1xf32>
    %195 = vector.shape_cast %194 : vector<32x1xf32> to vector<1x32x1xf32>
    %cst_50 = arith.constant dense<0.000000e+00> : vector<1xf32>
    %196 = vector.multi_reduction <add>, %195, %cst_50 [1, 2] : vector<1x32x1xf32> to vector<1xf32>
    %197 = vector.shape_cast %196 : vector<1xf32> to vector<1x1x1xf32>
    %198 = vector.extract %197[0, 0, 0] : f32 from vector<1x1x1xf32>
    %199 = vector.broadcast %198 : f32 to vector<1x1xf32>
    %cst_51 = arith.constant 1.22070313E-4 : f32
    %200 = vector.broadcast %cst_51 : f32 to vector<1x1xf32>
    %201 = arith.mulf %199, %200 : vector<1x1xf32>
    %202 = arith.mulf %193, %193 : vector<1x1xf32>
    %203 = arith.subf %201, %202 : vector<1x1xf32>
    %cst_52 = arith.constant 9.99999974E-6 : f32
    %204 = vector.broadcast %cst_52 : f32 to vector<1x1xf32>
    %205 = arith.addf %203, %204 : vector<1x1xf32>
    %206 = math.rsqrt %205 : vector<1x1xf32>
    %c256 = arith.constant 256 : index
    %c0_53 = arith.constant 0 : index
    %207 = vector.load %arg9[%c256, %c0_53] : memref<832x256xf32, #tpu.memory_space<vmem>>, vector<32x256xf32>
    %c384 = arith.constant 384 : index
    %c0_54 = arith.constant 0 : index
    %208 = vector.load %arg9[%c384, %c0_54] : memref<832x256xf32, #tpu.memory_space<vmem>>, vector<32x256xf32>
    %209 = vector.extract_strided_slice %180 {offsets = [0, 0], sizes = [32, 256], strides = [1, 1]} : vector<128x256xf32> to vector<32x256xf32>
    %210 = vector.broadcast %193 : vector<1x1xf32> to vector<32x256xf32>
    %211 = arith.subf %209, %210 : vector<32x256xf32>
    %212 = vector.broadcast %206 : vector<1x1xf32> to vector<32x256xf32>
    %213 = arith.mulf %211, %212 : vector<32x256xf32>
    %214 = arith.mulf %213, %207 : vector<32x256xf32>
    %215 = arith.addf %214, %208 : vector<32x256xf32>
    %216 = vector.extract_strided_slice %182 {offsets = [32, 0], sizes = [32, 1], strides = [1, 1]} : vector<128x1xf32> to vector<32x1xf32>
    %217 = vector.shape_cast %216 : vector<32x1xf32> to vector<1x32x1xf32>
    %cst_55 = arith.constant dense<0.000000e+00> : vector<1xf32>
    %218 = vector.multi_reduction <add>, %217, %cst_55 [1, 2] : vector<1x32x1xf32> to vector<1xf32>
    %219 = vector.shape_cast %218 : vector<1xf32> to vector<1x1x1xf32>
    %220 = vector.extract %219[0, 0, 0] : f32 from vector<1x1x1xf32>
    %221 = vector.broadcast %220 : f32 to vector<1x1xf32>
    %cst_56 = arith.constant 1.22070313E-4 : f32
    %222 = vector.broadcast %cst_56 : f32 to vector<1x1xf32>
    %223 = arith.mulf %221, %222 : vector<1x1xf32>
    %224 = vector.extract_strided_slice %185 {offsets = [32, 0], sizes = [32, 1], strides = [1, 1]} : vector<128x1xf32> to vector<32x1xf32>
    %225 = vector.shape_cast %224 : vector<32x1xf32> to vector<1x32x1xf32>
    %cst_57 = arith.constant dense<0.000000e+00> : vector<1xf32>
    %226 = vector.multi_reduction <add>, %225, %cst_57 [1, 2] : vector<1x32x1xf32> to vector<1xf32>
    %227 = vector.shape_cast %226 : vector<1xf32> to vector<1x1x1xf32>
    %228 = vector.extract %227[0, 0, 0] : f32 from vector<1x1x1xf32>
    %229 = vector.broadcast %228 : f32 to vector<1x1xf32>
    %cst_58 = arith.constant 1.22070313E-4 : f32
    %230 = vector.broadcast %cst_58 : f32 to vector<1x1xf32>
    %231 = arith.mulf %229, %230 : vector<1x1xf32>
    %232 = arith.mulf %223, %223 : vector<1x1xf32>
    %233 = arith.subf %231, %232 : vector<1x1xf32>
    %cst_59 = arith.constant 9.99999974E-6 : f32
    %234 = vector.broadcast %cst_59 : f32 to vector<1x1xf32>
    %235 = arith.addf %233, %234 : vector<1x1xf32>
    %236 = math.rsqrt %235 : vector<1x1xf32>
    %c288 = arith.constant 288 : index
    %c0_60 = arith.constant 0 : index
    %237 = vector.load %arg9[%c288, %c0_60] : memref<832x256xf32, #tpu.memory_space<vmem>>, vector<32x256xf32>
    %c416 = arith.constant 416 : index
    %c0_61 = arith.constant 0 : index
    %238 = vector.load %arg9[%c416, %c0_61] : memref<832x256xf32, #tpu.memory_space<vmem>>, vector<32x256xf32>
    %239 = vector.extract_strided_slice %180 {offsets = [32, 0], sizes = [32, 256], strides = [1, 1]} : vector<128x256xf32> to vector<32x256xf32>
    %240 = vector.broadcast %223 : vector<1x1xf32> to vector<32x256xf32>
    %241 = arith.subf %239, %240 : vector<32x256xf32>
    %242 = vector.broadcast %236 : vector<1x1xf32> to vector<32x256xf32>
    %243 = arith.mulf %241, %242 : vector<32x256xf32>
    %244 = arith.mulf %243, %237 : vector<32x256xf32>
    %245 = arith.addf %244, %238 : vector<32x256xf32>
    %246 = vector.extract_strided_slice %182 {offsets = [64, 0], sizes = [32, 1], strides = [1, 1]} : vector<128x1xf32> to vector<32x1xf32>
    %247 = vector.shape_cast %246 : vector<32x1xf32> to vector<1x32x1xf32>
    %cst_62 = arith.constant dense<0.000000e+00> : vector<1xf32>
    %248 = vector.multi_reduction <add>, %247, %cst_62 [1, 2] : vector<1x32x1xf32> to vector<1xf32>
    %249 = vector.shape_cast %248 : vector<1xf32> to vector<1x1x1xf32>
    %250 = vector.extract %249[0, 0, 0] : f32 from vector<1x1x1xf32>
    %251 = vector.broadcast %250 : f32 to vector<1x1xf32>
    %cst_63 = arith.constant 1.22070313E-4 : f32
    %252 = vector.broadcast %cst_63 : f32 to vector<1x1xf32>
    %253 = arith.mulf %251, %252 : vector<1x1xf32>
    %254 = vector.extract_strided_slice %185 {offsets = [64, 0], sizes = [32, 1], strides = [1, 1]} : vector<128x1xf32> to vector<32x1xf32>
    %255 = vector.shape_cast %254 : vector<32x1xf32> to vector<1x32x1xf32>
    %cst_64 = arith.constant dense<0.000000e+00> : vector<1xf32>
    %256 = vector.multi_reduction <add>, %255, %cst_64 [1, 2] : vector<1x32x1xf32> to vector<1xf32>
    %257 = vector.shape_cast %256 : vector<1xf32> to vector<1x1x1xf32>
    %258 = vector.extract %257[0, 0, 0] : f32 from vector<1x1x1xf32>
    %259 = vector.broadcast %258 : f32 to vector<1x1xf32>
    %cst_65 = arith.constant 1.22070313E-4 : f32
    %260 = vector.broadcast %cst_65 : f32 to vector<1x1xf32>
    %261 = arith.mulf %259, %260 : vector<1x1xf32>
    %262 = arith.mulf %253, %253 : vector<1x1xf32>
    %263 = arith.subf %261, %262 : vector<1x1xf32>
    %cst_66 = arith.constant 9.99999974E-6 : f32
    %264 = vector.broadcast %cst_66 : f32 to vector<1x1xf32>
    %265 = arith.addf %263, %264 : vector<1x1xf32>
    %266 = math.rsqrt %265 : vector<1x1xf32>
    %c320 = arith.constant 320 : index
    %c0_67 = arith.constant 0 : index
    %267 = vector.load %arg9[%c320, %c0_67] : memref<832x256xf32, #tpu.memory_space<vmem>>, vector<32x256xf32>
    %c448 = arith.constant 448 : index
    %c0_68 = arith.constant 0 : index
    %268 = vector.load %arg9[%c448, %c0_68] : memref<832x256xf32, #tpu.memory_space<vmem>>, vector<32x256xf32>
    %269 = vector.extract_strided_slice %180 {offsets = [64, 0], sizes = [32, 256], strides = [1, 1]} : vector<128x256xf32> to vector<32x256xf32>
    %270 = vector.broadcast %253 : vector<1x1xf32> to vector<32x256xf32>
    %271 = arith.subf %269, %270 : vector<32x256xf32>
    %272 = vector.broadcast %266 : vector<1x1xf32> to vector<32x256xf32>
    %273 = arith.mulf %271, %272 : vector<32x256xf32>
    %274 = arith.mulf %273, %267 : vector<32x256xf32>
    %275 = arith.addf %274, %268 : vector<32x256xf32>
    %276 = vector.extract_strided_slice %182 {offsets = [96, 0], sizes = [32, 1], strides = [1, 1]} : vector<128x1xf32> to vector<32x1xf32>
    %277 = vector.shape_cast %276 : vector<32x1xf32> to vector<1x32x1xf32>
    %cst_69 = arith.constant dense<0.000000e+00> : vector<1xf32>
    %278 = vector.multi_reduction <add>, %277, %cst_69 [1, 2] : vector<1x32x1xf32> to vector<1xf32>
    %279 = vector.shape_cast %278 : vector<1xf32> to vector<1x1x1xf32>
    %280 = vector.extract %279[0, 0, 0] : f32 from vector<1x1x1xf32>
    %281 = vector.broadcast %280 : f32 to vector<1x1xf32>
    %cst_70 = arith.constant 1.22070313E-4 : f32
    %282 = vector.broadcast %cst_70 : f32 to vector<1x1xf32>
    %283 = arith.mulf %281, %282 : vector<1x1xf32>
    %284 = vector.extract_strided_slice %185 {offsets = [96, 0], sizes = [32, 1], strides = [1, 1]} : vector<128x1xf32> to vector<32x1xf32>
    %285 = vector.shape_cast %284 : vector<32x1xf32> to vector<1x32x1xf32>
    %cst_71 = arith.constant dense<0.000000e+00> : vector<1xf32>
    %286 = vector.multi_reduction <add>, %285, %cst_71 [1, 2] : vector<1x32x1xf32> to vector<1xf32>
    %287 = vector.shape_cast %286 : vector<1xf32> to vector<1x1x1xf32>
    %288 = vector.extract %287[0, 0, 0] : f32 from vector<1x1x1xf32>
    %289 = vector.broadcast %288 : f32 to vector<1x1xf32>
    %cst_72 = arith.constant 1.22070313E-4 : f32
    %290 = vector.broadcast %cst_72 : f32 to vector<1x1xf32>
    %291 = arith.mulf %289, %290 : vector<1x1xf32>
    %292 = arith.mulf %283, %283 : vector<1x1xf32>
    %293 = arith.subf %291, %292 : vector<1x1xf32>
    %cst_73 = arith.constant 9.99999974E-6 : f32
    %294 = vector.broadcast %cst_73 : f32 to vector<1x1xf32>
    %295 = arith.addf %293, %294 : vector<1x1xf32>
    %296 = math.rsqrt %295 : vector<1x1xf32>
    %c352 = arith.constant 352 : index
    %c0_74 = arith.constant 0 : index
    %297 = vector.load %arg9[%c352, %c0_74] : memref<832x256xf32, #tpu.memory_space<vmem>>, vector<32x256xf32>
    %c480 = arith.constant 480 : index
    %c0_75 = arith.constant 0 : index
    %298 = vector.load %arg9[%c480, %c0_75] : memref<832x256xf32, #tpu.memory_space<vmem>>, vector<32x256xf32>
    %299 = vector.extract_strided_slice %180 {offsets = [96, 0], sizes = [32, 256], strides = [1, 1]} : vector<128x256xf32> to vector<32x256xf32>
    %300 = vector.broadcast %283 : vector<1x1xf32> to vector<32x256xf32>
    %301 = arith.subf %299, %300 : vector<32x256xf32>
    %302 = vector.broadcast %296 : vector<1x1xf32> to vector<32x256xf32>
    %303 = arith.mulf %301, %302 : vector<32x256xf32>
    %304 = arith.mulf %303, %297 : vector<32x256xf32>
    %305 = arith.addf %304, %298 : vector<32x256xf32>
    %c0_76 = arith.constant 0 : index
    %c0_77 = arith.constant 0 : index
    %c0_78 = arith.constant 0 : index
    %306 = vector.load %arg3[%c0_76, %c0_77, %c0_78] : memref<1x32x384xbf16, #tpu.memory_space<vmem>>, vector<1x32x384xbf16>
    %307 = vector.shape_cast %306 : vector<1x32x384xbf16> to vector<32x384xbf16>
    %c1_79 = arith.constant 1 : index
    %c0_80 = arith.constant 0 : index
    %c0_81 = arith.constant 0 : index
    %308 = vector.load %arg7[%c1_79, %c0_80, %c0_81] : memref<2x128x289xbf16, #tpu.memory_space<vmem>>, vector<1x128x289xbf16>
    %309 = vector.shape_cast %308 : vector<1x128x289xbf16> to vector<128x289xbf16>
    %310 = vector.extract_strided_slice %307 {offsets = [0, 0], sizes = [32, 256], strides = [1, 1]} : vector<32x384xbf16> to vector<32x256xbf16>
    %311 = vector.broadcast %0 : vector<1x256xbf16> to vector<32x256xbf16>
    %312 = arith.mulf %310, %311 : vector<32x256xbf16>
    %313 = vector.extract_strided_slice %307 {offsets = [0, 1], sizes = [32, 256], strides = [1, 1]} : vector<32x384xbf16> to vector<32x256xbf16>
    %314 = vector.extract_strided_slice %307 {offsets = [0, 2], sizes = [32, 256], strides = [1, 1]} : vector<32x384xbf16> to vector<32x256xbf16>
    %315 = vector.broadcast %1 : vector<1x256xbf16> to vector<32x256xbf16>
    %316 = arith.mulf %314, %315 : vector<32x256xbf16>
    %317 = vector.extract_strided_slice %307 {offsets = [0, 16], sizes = [32, 256], strides = [1, 1]} : vector<32x384xbf16> to vector<32x256xbf16>
    %318 = vector.broadcast %0 : vector<1x256xbf16> to vector<32x256xbf16>
    %319 = arith.mulf %317, %318 : vector<32x256xbf16>
    %320 = vector.extract_strided_slice %307 {offsets = [0, 17], sizes = [32, 256], strides = [1, 1]} : vector<32x384xbf16> to vector<32x256xbf16>
    %321 = vector.extract_strided_slice %307 {offsets = [0, 18], sizes = [32, 256], strides = [1, 1]} : vector<32x384xbf16> to vector<32x256xbf16>
    %322 = vector.broadcast %1 : vector<1x256xbf16> to vector<32x256xbf16>
    %323 = arith.mulf %321, %322 : vector<32x256xbf16>
    %324 = vector.extract_strided_slice %307 {offsets = [0, 32], sizes = [32, 256], strides = [1, 1]} : vector<32x384xbf16> to vector<32x256xbf16>
    %325 = vector.broadcast %0 : vector<1x256xbf16> to vector<32x256xbf16>
    %326 = arith.mulf %324, %325 : vector<32x256xbf16>
    %327 = vector.extract_strided_slice %307 {offsets = [0, 33], sizes = [32, 256], strides = [1, 1]} : vector<32x384xbf16> to vector<32x256xbf16>
    %328 = vector.extract_strided_slice %307 {offsets = [0, 34], sizes = [32, 256], strides = [1, 1]} : vector<32x384xbf16> to vector<32x256xbf16>
    %329 = vector.broadcast %1 : vector<1x256xbf16> to vector<32x256xbf16>
    %330 = arith.mulf %328, %329 : vector<32x256xbf16>
    %331 = tpu.concatenate %312, %313, %316, %319, %320, %323, %326, %327, %330, %2 in 0 : vector<32x256xbf16>, vector<32x256xbf16>, vector<32x256xbf16>, vector<32x256xbf16>, vector<32x256xbf16>, vector<32x256xbf16>, vector<32x256xbf16>, vector<32x256xbf16>, vector<32x256xbf16>, vector<1x256xbf16> -> vector<289x256xbf16>
    %cst_82 = arith.constant dense<0.000000e+00> : vector<128x256xf32>
    %332 = tpu.matmul %309, %331, %cst_82 {dimension_numbers = #tpu.dot_dimension_numbers<[1], [0], [0], [1], [0, 0, 1, 1], [], []>} : vector<128x289xbf16>, vector<289x256xbf16>, vector<128x256xf32> -> vector<128x256xf32>
    %cst_83 = arith.constant dense<0.000000e+00> : vector<128xf32>
    %333 = vector.multi_reduction <add>, %332, %cst_83 [1] : vector<128x256xf32> to vector<128xf32>
    %334 = vector.shape_cast %333 : vector<128xf32> to vector<128x1xf32>
    %335 = arith.mulf %332, %332 : vector<128x256xf32>
    %cst_84 = arith.constant dense<0.000000e+00> : vector<128xf32>
    %336 = vector.multi_reduction <add>, %335, %cst_84 [1] : vector<128x256xf32> to vector<128xf32>
    %337 = vector.shape_cast %336 : vector<128xf32> to vector<128x1xf32>
    %338 = vector.extract_strided_slice %334 {offsets = [0, 0], sizes = [32, 1], strides = [1, 1]} : vector<128x1xf32> to vector<32x1xf32>
    %339 = vector.shape_cast %338 : vector<32x1xf32> to vector<1x32x1xf32>
    %cst_85 = arith.constant dense<0.000000e+00> : vector<1xf32>
    %340 = vector.multi_reduction <add>, %339, %cst_85 [1, 2] : vector<1x32x1xf32> to vector<1xf32>
    %341 = vector.shape_cast %340 : vector<1xf32> to vector<1x1x1xf32>
    %342 = vector.extract %341[0, 0, 0] : f32 from vector<1x1x1xf32>
    %343 = vector.broadcast %342 : f32 to vector<1x1xf32>
    %cst_86 = arith.constant 1.22070313E-4 : f32
    %344 = vector.broadcast %cst_86 : f32 to vector<1x1xf32>
    %345 = arith.mulf %343, %344 : vector<1x1xf32>
    %346 = vector.extract_strided_slice %337 {offsets = [0, 0], sizes = [32, 1], strides = [1, 1]} : vector<128x1xf32> to vector<32x1xf32>
    %347 = vector.shape_cast %346 : vector<32x1xf32> to vector<1x32x1xf32>
    %cst_87 = arith.constant dense<0.000000e+00> : vector<1xf32>
    %348 = vector.multi_reduction <add>, %347, %cst_87 [1, 2] : vector<1x32x1xf32> to vector<1xf32>
    %349 = vector.shape_cast %348 : vector<1xf32> to vector<1x1x1xf32>
    %350 = vector.extract %349[0, 0, 0] : f32 from vector<1x1x1xf32>
    %351 = vector.broadcast %350 : f32 to vector<1x1xf32>
    %cst_88 = arith.constant 1.22070313E-4 : f32
    %352 = vector.broadcast %cst_88 : f32 to vector<1x1xf32>
    %353 = arith.mulf %351, %352 : vector<1x1xf32>
    %354 = arith.mulf %345, %345 : vector<1x1xf32>
    %355 = arith.subf %353, %354 : vector<1x1xf32>
    %cst_89 = arith.constant 9.99999974E-6 : f32
    %356 = vector.broadcast %cst_89 : f32 to vector<1x1xf32>
    %357 = arith.addf %355, %356 : vector<1x1xf32>
    %358 = math.rsqrt %357 : vector<1x1xf32>
    %c512 = arith.constant 512 : index
    %c0_90 = arith.constant 0 : index
    %359 = vector.load %arg9[%c512, %c0_90] : memref<832x256xf32, #tpu.memory_space<vmem>>, vector<32x256xf32>
    %c640 = arith.constant 640 : index
    %c0_91 = arith.constant 0 : index
    %360 = vector.load %arg9[%c640, %c0_91] : memref<832x256xf32, #tpu.memory_space<vmem>>, vector<32x256xf32>
    %361 = vector.extract_strided_slice %332 {offsets = [0, 0], sizes = [32, 256], strides = [1, 1]} : vector<128x256xf32> to vector<32x256xf32>
    %362 = vector.broadcast %345 : vector<1x1xf32> to vector<32x256xf32>
    %363 = arith.subf %361, %362 : vector<32x256xf32>
    %364 = vector.broadcast %358 : vector<1x1xf32> to vector<32x256xf32>
    %365 = arith.mulf %363, %364 : vector<32x256xf32>
    %366 = arith.mulf %365, %359 : vector<32x256xf32>
    %367 = arith.addf %366, %360 : vector<32x256xf32>
    %368 = vector.extract_strided_slice %334 {offsets = [32, 0], sizes = [32, 1], strides = [1, 1]} : vector<128x1xf32> to vector<32x1xf32>
    %369 = vector.shape_cast %368 : vector<32x1xf32> to vector<1x32x1xf32>
    %cst_92 = arith.constant dense<0.000000e+00> : vector<1xf32>
    %370 = vector.multi_reduction <add>, %369, %cst_92 [1, 2] : vector<1x32x1xf32> to vector<1xf32>
    %371 = vector.shape_cast %370 : vector<1xf32> to vector<1x1x1xf32>
    %372 = vector.extract %371[0, 0, 0] : f32 from vector<1x1x1xf32>
    %373 = vector.broadcast %372 : f32 to vector<1x1xf32>
    %cst_93 = arith.constant 1.22070313E-4 : f32
    %374 = vector.broadcast %cst_93 : f32 to vector<1x1xf32>
    %375 = arith.mulf %373, %374 : vector<1x1xf32>
    %376 = vector.extract_strided_slice %337 {offsets = [32, 0], sizes = [32, 1], strides = [1, 1]} : vector<128x1xf32> to vector<32x1xf32>
    %377 = vector.shape_cast %376 : vector<32x1xf32> to vector<1x32x1xf32>
    %cst_94 = arith.constant dense<0.000000e+00> : vector<1xf32>
    %378 = vector.multi_reduction <add>, %377, %cst_94 [1, 2] : vector<1x32x1xf32> to vector<1xf32>
    %379 = vector.shape_cast %378 : vector<1xf32> to vector<1x1x1xf32>
    %380 = vector.extract %379[0, 0, 0] : f32 from vector<1x1x1xf32>
    %381 = vector.broadcast %380 : f32 to vector<1x1xf32>
    %cst_95 = arith.constant 1.22070313E-4 : f32
    %382 = vector.broadcast %cst_95 : f32 to vector<1x1xf32>
    %383 = arith.mulf %381, %382 : vector<1x1xf32>
    %384 = arith.mulf %375, %375 : vector<1x1xf32>
    %385 = arith.subf %383, %384 : vector<1x1xf32>
    %cst_96 = arith.constant 9.99999974E-6 : f32
    %386 = vector.broadcast %cst_96 : f32 to vector<1x1xf32>
    %387 = arith.addf %385, %386 : vector<1x1xf32>
    %388 = math.rsqrt %387 : vector<1x1xf32>
    %c544 = arith.constant 544 : index
    %c0_97 = arith.constant 0 : index
    %389 = vector.load %arg9[%c544, %c0_97] : memref<832x256xf32, #tpu.memory_space<vmem>>, vector<32x256xf32>
    %c672 = arith.constant 672 : index
    %c0_98 = arith.constant 0 : index
    %390 = vector.load %arg9[%c672, %c0_98] : memref<832x256xf32, #tpu.memory_space<vmem>>, vector<32x256xf32>
    %391 = vector.extract_strided_slice %332 {offsets = [32, 0], sizes = [32, 256], strides = [1, 1]} : vector<128x256xf32> to vector<32x256xf32>
    %392 = vector.broadcast %375 : vector<1x1xf32> to vector<32x256xf32>
    %393 = arith.subf %391, %392 : vector<32x256xf32>
    %394 = vector.broadcast %388 : vector<1x1xf32> to vector<32x256xf32>
    %395 = arith.mulf %393, %394 : vector<32x256xf32>
    %396 = arith.mulf %395, %389 : vector<32x256xf32>
    %397 = arith.addf %396, %390 : vector<32x256xf32>
    %398 = vector.extract_strided_slice %334 {offsets = [64, 0], sizes = [32, 1], strides = [1, 1]} : vector<128x1xf32> to vector<32x1xf32>
    %399 = vector.shape_cast %398 : vector<32x1xf32> to vector<1x32x1xf32>
    %cst_99 = arith.constant dense<0.000000e+00> : vector<1xf32>
    %400 = vector.multi_reduction <add>, %399, %cst_99 [1, 2] : vector<1x32x1xf32> to vector<1xf32>
    %401 = vector.shape_cast %400 : vector<1xf32> to vector<1x1x1xf32>
    %402 = vector.extract %401[0, 0, 0] : f32 from vector<1x1x1xf32>
    %403 = vector.broadcast %402 : f32 to vector<1x1xf32>
    %cst_100 = arith.constant 1.22070313E-4 : f32
    %404 = vector.broadcast %cst_100 : f32 to vector<1x1xf32>
    %405 = arith.mulf %403, %404 : vector<1x1xf32>
    %406 = vector.extract_strided_slice %337 {offsets = [64, 0], sizes = [32, 1], strides = [1, 1]} : vector<128x1xf32> to vector<32x1xf32>
    %407 = vector.shape_cast %406 : vector<32x1xf32> to vector<1x32x1xf32>
    %cst_101 = arith.constant dense<0.000000e+00> : vector<1xf32>
    %408 = vector.multi_reduction <add>, %407, %cst_101 [1, 2] : vector<1x32x1xf32> to vector<1xf32>
    %409 = vector.shape_cast %408 : vector<1xf32> to vector<1x1x1xf32>
    %410 = vector.extract %409[0, 0, 0] : f32 from vector<1x1x1xf32>
    %411 = vector.broadcast %410 : f32 to vector<1x1xf32>
    %cst_102 = arith.constant 1.22070313E-4 : f32
    %412 = vector.broadcast %cst_102 : f32 to vector<1x1xf32>
    %413 = arith.mulf %411, %412 : vector<1x1xf32>
    %414 = arith.mulf %405, %405 : vector<1x1xf32>
    %415 = arith.subf %413, %414 : vector<1x1xf32>
    %cst_103 = arith.constant 9.99999974E-6 : f32
    %416 = vector.broadcast %cst_103 : f32 to vector<1x1xf32>
    %417 = arith.addf %415, %416 : vector<1x1xf32>
    %418 = math.rsqrt %417 : vector<1x1xf32>
    %c576 = arith.constant 576 : index
    %c0_104 = arith.constant 0 : index
    %419 = vector.load %arg9[%c576, %c0_104] : memref<832x256xf32, #tpu.memory_space<vmem>>, vector<32x256xf32>
    %c704 = arith.constant 704 : index
    %c0_105 = arith.constant 0 : index
    %420 = vector.load %arg9[%c704, %c0_105] : memref<832x256xf32, #tpu.memory_space<vmem>>, vector<32x256xf32>
    %421 = vector.extract_strided_slice %332 {offsets = [64, 0], sizes = [32, 256], strides = [1, 1]} : vector<128x256xf32> to vector<32x256xf32>
    %422 = vector.broadcast %405 : vector<1x1xf32> to vector<32x256xf32>
    %423 = arith.subf %421, %422 : vector<32x256xf32>
    %424 = vector.broadcast %418 : vector<1x1xf32> to vector<32x256xf32>
    %425 = arith.mulf %423, %424 : vector<32x256xf32>
    %426 = arith.mulf %425, %419 : vector<32x256xf32>
    %427 = arith.addf %426, %420 : vector<32x256xf32>
    %428 = vector.extract_strided_slice %334 {offsets = [96, 0], sizes = [32, 1], strides = [1, 1]} : vector<128x1xf32> to vector<32x1xf32>
    %429 = vector.shape_cast %428 : vector<32x1xf32> to vector<1x32x1xf32>
    %cst_106 = arith.constant dense<0.000000e+00> : vector<1xf32>
    %430 = vector.multi_reduction <add>, %429, %cst_106 [1, 2] : vector<1x32x1xf32> to vector<1xf32>
    %431 = vector.shape_cast %430 : vector<1xf32> to vector<1x1x1xf32>
    %432 = vector.extract %431[0, 0, 0] : f32 from vector<1x1x1xf32>
    %433 = vector.broadcast %432 : f32 to vector<1x1xf32>
    %cst_107 = arith.constant 1.22070313E-4 : f32
    %434 = vector.broadcast %cst_107 : f32 to vector<1x1xf32>
    %435 = arith.mulf %433, %434 : vector<1x1xf32>
    %436 = vector.extract_strided_slice %337 {offsets = [96, 0], sizes = [32, 1], strides = [1, 1]} : vector<128x1xf32> to vector<32x1xf32>
    %437 = vector.shape_cast %436 : vector<32x1xf32> to vector<1x32x1xf32>
    %cst_108 = arith.constant dense<0.000000e+00> : vector<1xf32>
    %438 = vector.multi_reduction <add>, %437, %cst_108 [1, 2] : vector<1x32x1xf32> to vector<1xf32>
    %439 = vector.shape_cast %438 : vector<1xf32> to vector<1x1x1xf32>
    %440 = vector.extract %439[0, 0, 0] : f32 from vector<1x1x1xf32>
    %441 = vector.broadcast %440 : f32 to vector<1x1xf32>
    %cst_109 = arith.constant 1.22070313E-4 : f32
    %442 = vector.broadcast %cst_109 : f32 to vector<1x1xf32>
    %443 = arith.mulf %441, %442 : vector<1x1xf32>
    %444 = arith.mulf %435, %435 : vector<1x1xf32>
    %445 = arith.subf %443, %444 : vector<1x1xf32>
    %cst_110 = arith.constant 9.99999974E-6 : f32
    %446 = vector.broadcast %cst_110 : f32 to vector<1x1xf32>
    %447 = arith.addf %445, %446 : vector<1x1xf32>
    %448 = math.rsqrt %447 : vector<1x1xf32>
    %c608 = arith.constant 608 : index
    %c0_111 = arith.constant 0 : index
    %449 = vector.load %arg9[%c608, %c0_111] : memref<832x256xf32, #tpu.memory_space<vmem>>, vector<32x256xf32>
    %c736 = arith.constant 736 : index
    %c0_112 = arith.constant 0 : index
    %450 = vector.load %arg9[%c736, %c0_112] : memref<832x256xf32, #tpu.memory_space<vmem>>, vector<32x256xf32>
    %451 = vector.extract_strided_slice %332 {offsets = [96, 0], sizes = [32, 256], strides = [1, 1]} : vector<128x256xf32> to vector<32x256xf32>
    %452 = vector.broadcast %435 : vector<1x1xf32> to vector<32x256xf32>
    %453 = arith.subf %451, %452 : vector<32x256xf32>
    %454 = vector.broadcast %448 : vector<1x1xf32> to vector<32x256xf32>
    %455 = arith.mulf %453, %454 : vector<32x256xf32>
    %456 = arith.mulf %455, %449 : vector<32x256xf32>
    %457 = arith.addf %456, %450 : vector<32x256xf32>
    %c0_113 = arith.constant 0 : index
    %c0_114 = arith.constant 0 : index
    %c0_115 = arith.constant 0 : index
    %458 = vector.load %arg4[%c0_113, %c0_114, %c0_115] : memref<1x64x256xf32, #tpu.memory_space<vmem>>, vector<1x64x256xf32>
    %459 = vector.shape_cast %458 : vector<1x64x256xf32> to vector<64x256xf32>
    %460 = vector.extract_strided_slice %459 {offsets = [0, 0], sizes = [32, 256], strides = [1, 1]} : vector<64x256xf32> to vector<32x256xf32>
    %461 = vector.extract_strided_slice %459 {offsets = [32, 0], sizes = [32, 256], strides = [1, 1]} : vector<64x256xf32> to vector<32x256xf32>
    %462 = arith.addf %63, %215 : vector<32x256xf32>
    %463 = arith.negf %462 : vector<32x256xf32>
    %464 = math.exp %463 : vector<32x256xf32>
    %cst_116 = arith.constant 1.000000e+00 : f32
    %465 = vector.broadcast %cst_116 : f32 to vector<32x256xf32>
    %466 = arith.addf %465, %464 : vector<32x256xf32>
    %467 = arith.divf %465, %466 : vector<32x256xf32>
    %468 = arith.addf %63, %367 : vector<32x256xf32>
    %469 = arith.negf %468 : vector<32x256xf32>
    %470 = math.exp %469 : vector<32x256xf32>
    %cst_117 = arith.constant 1.000000e+00 : f32
    %471 = vector.broadcast %cst_117 : f32 to vector<32x256xf32>
    %472 = arith.addf %471, %470 : vector<32x256xf32>
    %473 = arith.divf %471, %472 : vector<32x256xf32>
    %474 = arith.addf %93, %245 : vector<32x256xf32>
    %475 = math.tanh %474 : vector<32x256xf32>
    %476 = arith.addf %93, %397 : vector<32x256xf32>
    %477 = math.tanh %476 : vector<32x256xf32>
    %478 = arith.addf %123, %275 : vector<32x256xf32>
    %cst_118 = arith.constant 1.000000e+00 : f32
    %479 = vector.broadcast %cst_118 : f32 to vector<32x256xf32>
    %480 = arith.addf %478, %479 : vector<32x256xf32>
    %481 = arith.negf %480 : vector<32x256xf32>
    %482 = math.exp %481 : vector<32x256xf32>
    %cst_119 = arith.constant 1.000000e+00 : f32
    %483 = vector.broadcast %cst_119 : f32 to vector<32x256xf32>
    %484 = arith.addf %483, %482 : vector<32x256xf32>
    %485 = arith.divf %483, %484 : vector<32x256xf32>
    %486 = arith.addf %123, %427 : vector<32x256xf32>
    %cst_120 = arith.constant 1.000000e+00 : f32
    %487 = vector.broadcast %cst_120 : f32 to vector<32x256xf32>
    %488 = arith.addf %486, %487 : vector<32x256xf32>
    %489 = arith.negf %488 : vector<32x256xf32>
    %490 = math.exp %489 : vector<32x256xf32>
    %cst_121 = arith.constant 1.000000e+00 : f32
    %491 = vector.broadcast %cst_121 : f32 to vector<32x256xf32>
    %492 = arith.addf %491, %490 : vector<32x256xf32>
    %493 = arith.divf %491, %492 : vector<32x256xf32>
    %494 = arith.addf %153, %305 : vector<32x256xf32>
    %495 = arith.addf %494, %457 : vector<32x256xf32>
    %496 = arith.negf %495 : vector<32x256xf32>
    %497 = math.exp %496 : vector<32x256xf32>
    %cst_122 = arith.constant 1.000000e+00 : f32
    %498 = vector.broadcast %cst_122 : f32 to vector<32x256xf32>
    %499 = arith.addf %498, %497 : vector<32x256xf32>
    %500 = arith.divf %498, %499 : vector<32x256xf32>
    %501 = arith.mulf %493, %461 : vector<32x256xf32>
    %502 = arith.mulf %473, %477 : vector<32x256xf32>
    %503 = arith.addf %501, %502 : vector<32x256xf32>
    %504 = arith.mulf %485, %460 : vector<32x256xf32>
    %505 = arith.mulf %467, %475 : vector<32x256xf32>
    %506 = arith.addf %504, %505 : vector<32x256xf32>
    %cst_123 = arith.constant 1.000000e+00 : f32
    %507 = vector.broadcast %cst_123 : f32 to vector<1x256xf32>
    %508 = tpu.concatenate %506, %503, %507 in 0 : vector<32x256xf32>, vector<32x256xf32>, vector<1x256xf32> -> vector<65x256xf32>
    %c0_124 = arith.constant 0 : index
    %c0_125 = arith.constant 0 : index
    %509 = vector.load %arg8[%c0_124, %c0_125] : memref<32x65xf32, #tpu.memory_space<vmem>>, vector<32x65xf32>
    %cst_126 = arith.constant dense<0.000000e+00> : vector<32x256xf32>
    %510 = tpu.matmul %509, %508, %cst_126 {dimension_numbers = #tpu.dot_dimension_numbers<[1], [0], [0], [1], [0, 0, 1, 1], [], []>} : vector<32x65xf32>, vector<65x256xf32>, vector<32x256xf32> -> vector<32x256xf32>
    %511 = vector.shape_cast %510 : vector<32x256xf32> to vector<1x32x256xf32>
    %cst_127 = arith.constant dense<0.000000e+00> : vector<1xf32>
    %512 = vector.multi_reduction <add>, %511, %cst_127 [1, 2] : vector<1x32x256xf32> to vector<1xf32>
    %513 = vector.shape_cast %512 : vector<1xf32> to vector<1x1x1xf32>
    %514 = vector.extract %513[0, 0, 0] : f32 from vector<1x1x1xf32>
    %515 = vector.broadcast %514 : f32 to vector<1x1xf32>
    %cst_128 = arith.constant 1.22070313E-4 : f32
    %516 = vector.broadcast %cst_128 : f32 to vector<1x1xf32>
    %517 = arith.mulf %515, %516 : vector<1x1xf32>
    %518 = arith.mulf %510, %510 : vector<32x256xf32>
    %519 = vector.shape_cast %518 : vector<32x256xf32> to vector<1x32x256xf32>
    %cst_129 = arith.constant dense<0.000000e+00> : vector<1xf32>
    %520 = vector.multi_reduction <add>, %519, %cst_129 [1, 2] : vector<1x32x256xf32> to vector<1xf32>
    %521 = vector.shape_cast %520 : vector<1xf32> to vector<1x1x1xf32>
    %522 = vector.extract %521[0, 0, 0] : f32 from vector<1x1x1xf32>
    %523 = vector.broadcast %522 : f32 to vector<1x1xf32>
    %cst_130 = arith.constant 1.22070313E-4 : f32
    %524 = vector.broadcast %cst_130 : f32 to vector<1x1xf32>
    %525 = arith.mulf %523, %524 : vector<1x1xf32>
    %526 = arith.mulf %517, %517 : vector<1x1xf32>
    %527 = arith.subf %525, %526 : vector<1x1xf32>
    %cst_131 = arith.constant 9.99999974E-6 : f32
    %528 = vector.broadcast %cst_131 : f32 to vector<1x1xf32>
    %529 = arith.addf %527, %528 : vector<1x1xf32>
    %530 = math.rsqrt %529 : vector<1x1xf32>
    %c768 = arith.constant 768 : index
    %c0_132 = arith.constant 0 : index
    %531 = vector.load %arg9[%c768, %c0_132] : memref<832x256xf32, #tpu.memory_space<vmem>>, vector<32x256xf32>
    %c800 = arith.constant 800 : index
    %c0_133 = arith.constant 0 : index
    %532 = vector.load %arg9[%c800, %c0_133] : memref<832x256xf32, #tpu.memory_space<vmem>>, vector<32x256xf32>
    %533 = vector.broadcast %517 : vector<1x1xf32> to vector<32x256xf32>
    %534 = arith.subf %510, %533 : vector<32x256xf32>
    %535 = vector.broadcast %530 : vector<1x1xf32> to vector<32x256xf32>
    %536 = arith.mulf %534, %535 : vector<32x256xf32>
    %537 = arith.mulf %536, %531 : vector<32x256xf32>
    %538 = arith.addf %537, %532 : vector<32x256xf32>
    %539 = math.tanh %538 : vector<32x256xf32>
    %540 = arith.mulf %500, %539 : vector<32x256xf32>
    %c0_134 = arith.constant 0 : index
    %c0_135 = arith.constant 0 : index
    %c0_136 = arith.constant 0 : index
    %541 = vector.load %arg10[%c0_134, %c0_135, %c0_136] : memref<1x32x256xf32, #tpu.memory_space<vmem>>, vector<1x32x256xf32>
    %542 = vector.shape_cast %541 : vector<1x32x256xf32> to vector<32x256xf32>
    %543 = vector.shape_cast %540 : vector<32x256xf32> to vector<1x32x256xf32>
    tpu.vector_store %arg10[%c0_134, %c0_135, %c0_136], %543 {strides = array<i32>} : memref<1x32x256xf32, #tpu.memory_space<vmem>>, vector<1x32x256xf32>,
    %c0_137 = arith.constant 0 : index
    %c0_138 = arith.constant 0 : index
    %c0_139 = arith.constant 0 : index
    %544 = vector.load %arg11[%c0_137, %c0_138, %c0_139] : memref<1x32x256xf32, #tpu.memory_space<vmem>>, vector<1x32x256xf32>
    %545 = vector.shape_cast %544 : vector<1x32x256xf32> to vector<32x256xf32>
    %546 = vector.shape_cast %506 : vector<32x256xf32> to vector<1x32x256xf32>
    tpu.vector_store %arg11[%c0_137, %c0_138, %c0_139], %546 {strides = array<i32>} : memref<1x32x256xf32, #tpu.memory_space<vmem>>, vector<1x32x256xf32>,
    %c0_140 = arith.constant 0 : index
    %c0_141 = arith.constant 0 : index
    %c0_142 = arith.constant 0 : index
    %547 = vector.load %arg12[%c0_140, %c0_141, %c0_142] : memref<1x32x256xf32, #tpu.memory_space<vmem>>, vector<1x32x256xf32>
    %548 = vector.shape_cast %547 : vector<1x32x256xf32> to vector<32x256xf32>
    %549 = vector.shape_cast %503 : vector<32x256xf32> to vector<1x32x256xf32>
    tpu.vector_store %arg12[%c0_140, %c0_141, %c0_142], %549 {strides = array<i32>} : memref<1x32x256xf32, #tpu.memory_space<vmem>>, vector<1x32x256xf32>,
    return
  }
  func.func @transform_0(%arg0: i32) -> (i32, i32, i32) {
    %c0_i32 = arith.constant 0 : i32
    %c0_i32_0 = arith.constant 0 : i32
    %c0_i32_1 = arith.constant 0 : i32
    return %arg0, %c0_i32, %c0_i32_0 : i32, i32, i32
  }
  func.func @transform_1(%arg0: i32) -> (i32, i32, i32) {
    %c0_i32 = arith.constant 0 : i32
    %c0_i32_0 = arith.constant 0 : i32
    %c0_i32_1 = arith.constant 0 : i32
    return %arg0, %c0_i32, %c0_i32_0 : i32, i32, i32
  }
  func.func @transform_2(%arg0: i32) -> (i32, i32, i32) {
    %c0_i32 = arith.constant 0 : i32
    %c0_i32_0 = arith.constant 0 : i32
    %c0_i32_1 = arith.constant 0 : i32
    return %arg0, %c0_i32, %c0_i32_0 : i32, i32, i32
  }
  func.func @transform_3(%arg0: i32) -> (i32, i32, i32) {
    %c0_i32 = arith.constant 0 : i32
    %c0_i32_0 = arith.constant 0 : i32
    %c0_i32_1 = arith.constant 0 : i32
    return %arg0, %c0_i32, %c0_i32_0 : i32, i32, i32
  }
  func.func @transform_4(%arg0: i32) -> (i32, i32) {
    %c0_i32 = arith.constant 0 : i32
    %c0_i32_0 = arith.constant 0 : i32
    %c0_i32_1 = arith.constant 0 : i32
    return %c0_i32, %c0_i32_0 : i32, i32
  }
  func.func @transform_5(%arg0: i32) -> (i32, i32) {
    %c0_i32 = arith.constant 0 : i32
    %c0_i32_0 = arith.constant 0 : i32
    %c0_i32_1 = arith.constant 0 : i32
    return %c0_i32, %c0_i32_0 : i32, i32
  }
  func.func @transform_6(%arg0: i32) -> (i32, i32, i32) {
    %c0_i32 = arith.constant 0 : i32
    %c0_i32_0 = arith.constant 0 : i32
    %c0_i32_1 = arith.constant 0 : i32
    %c0_i32_2 = arith.constant 0 : i32
    return %c0_i32, %c0_i32_0, %c0_i32_1 : i32, i32, i32
  }
  func.func @transform_7(%arg0: i32) -> (i32, i32) {
    %c0_i32 = arith.constant 0 : i32
    %c0_i32_0 = arith.constant 0 : i32
    %c0_i32_1 = arith.constant 0 : i32
    return %c0_i32, %c0_i32_0 : i32, i32
  }
  func.func @transform_8(%arg0: i32) -> (i32, i32) {
    %c0_i32 = arith.constant 0 : i32
    %c0_i32_0 = arith.constant 0 : i32
    %c0_i32_1 = arith.constant 0 : i32
    return %c0_i32, %c0_i32_0 : i32, i32
  }
  func.func @transform_9(%arg0: i32) -> (i32, i32, i32) {
    %c0_i32 = arith.constant 0 : i32
    %c0_i32_0 = arith.constant 0 : i32
    %c0_i32_1 = arith.constant 0 : i32
    return %arg0, %c0_i32, %c0_i32_0 : i32, i32, i32
  }
  func.func @transform_10(%arg0: i32) -> (i32, i32, i32) {
    %c0_i32 = arith.constant 0 : i32
    %c0_i32_0 = arith.constant 0 : i32
    %c0_i32_1 = arith.constant 0 : i32
    return %arg0, %c0_i32, %c0_i32_0 : i32, i32, i32
  }
  func.func @transform_11(%arg0: i32) -> (i32, i32, i32) {
    %c0_i32 = arith.constant 0 : i32
    %c0_i32_0 = arith.constant 0 : i32
    %c0_i32_1 = arith.constant 0 : i32
    return %arg0, %c0_i32, %c0_i32_0 : i32, i32, i32
  }
}

</mosaic_0001>

<bundles_post_ra>
// kernel: stlstm_cell_pallas.1
= control target key start
LH: loop header
LB: loop body
LE: loop exit
PB: predicated region body
PF: predicated region fallthrough
CT: control target
= control target key end

     0   :  { %s5625_s17 = smov 0   ;;  %s8858_s0 = inlined_call_operand.vmem [shape: bf16[2,16,384], index: 0, kind: input, shape index: {}]   ;;  %s8859_s1 = inlined_call_operand.vmem [shape: bf16[2,32,384], index: 1, kind: input, shape index: {}]   ;;  %s8860_s2 = inlined_call_operand.vmem [shape: bf16[2,32,384], index: 2, kind: input, shape index: {}]   ;;  %s8861_s3 = inlined_call_operand.vmem [shape: f32[2,64,256], index: 3, kind: input, shape index: {}]   ;;  %s8862_s4 = inlined_call_operand.vmem [shape: bf16[2,256], index: 4, kind: input, shape index: {}]   ;;  %s8863_s5 = inlined_call_operand.vmem [shape: bf16[128,145], index: 5, kind: input, shape index: {}]   ;;  %s8864_s6 = inlined_call_operand.vmem [shape: bf16[2,128,289], index: 6, kind: input, shape index: {}]   ;;  %s8865_s7 = inlined_call_operand.vmem [shape: f32[32,65], index: 7, kind: input, shape index: {}]   ;;  %s8866_s8 = inlined_call_operand.vmem [shape: f32[832,256], index: 8, kind: input, shape index: {}]   ;;  %s8867_s9 = inlined_call_operand.vmem [shape: f32[2,32,256], index: 9, kind: output, shape index: {0}]   ;;  %s8868_s10 = inlined_call_operand.vmem [shape: f32[2,32,256], index: 10, kind: output, shape index: {1}]   ;;  %s8869_s11 = inlined_call_operand.vmem [shape: f32[2,32,256], index: 11, kind: output, shape index: {2}]  }
   0x1 LB: > { %s4831_s18 = sadd.s32 4294967295, %s5546_s17   ;;  %p4835_p0 = scmp.ge.s32.totalorder %s5546_s17, 1  ;;  %s5546_s17 = sphi %s5625_s17, %s22_s17  }
   0x2   : > { %p372_p1 = scmp.lt.s32.totalorder %s5546_s17, 3 }
   0x4   : > { %p373_p2 = pnand %p4835_p0, %p372_p1 }
   0x6   : > { %376 = sbr.rel (%p373_p2) target bundleno = 1632 (0x660), region = 56 }
   0xb   : > { %p437_p3 = scmp.lt.s32.totalorder %s4831_s18, 1  ;;  %v4847_v0 = vld.sshfl [vmem:[%s8862_s4] sm:$0x11 pattern:$0x75316420]  ;;  %v507_v1 = vlaneseq  ;;  %s5549_s25 = smov 95  }
   0xc   : > { %v5548_v2 = vmov 1966171168   ;;  %v503_v5 = vcombine.high %v4847_v0, %v4847_v0  ;;  %s5550_s26 = smov 111   ;;  %s5551_s27 = smov 32   ;;  %vm761_vm0 = vcmask 777216   ;;  %vm573_vm1 = vcmask 130048  }
   0xd   : > { %s9254_s18 = smov (!%p437_p3, %s4831_s18), 1  ;;  %v505_v3 = vunpack.c.l.s4 %v5548_v2  ;;  %v508_v4 = vshrl.u32 %v507_v1, 7  ;;  %s5552_s28 = smov 18   ;;  %vm595_vm2 = vcmask 261120   ;;  %vm584_vm3 = vcmask 146432  }
   0xe   : > { %s5122_s21 = smul.u32 24, %s9254_s18  ;;  %s5553_s30 = smov 16   ;;  %vm562_vm4 = vcmask 15360   ;;  %vm606_vm5 = vcmask 277504   ;;  %vm862_vm6 = vcmask 138240   ;;  %vm750_vm7 = vcmask 785408  }
   0xf   : > { %v506_v6 = vunpack.c.0.s8 %v505_v3  ;;  %v523_v15 = vsub.s32 0, %v508_v4  ;;  %s5123_s29 = smul.u32 48, %s9254_s18  ;;  %s5554_s12 = smov 34   ;;  %vm691_vm8 = vcmask 916480   ;;  %vm726_vm9 = vcmask 900096  }
  0x10   : > { %s5642_s24 = scalar_lea.vmem %s8858_s0, %s5122_s21  ;;  %s5555_s16 = smov 2   ;;  %vm702_vm10 = vcmask 908288   ;;  %vm667_vm11 = vcmask 1031168   ;;  %vm643_vm12 = vcmask 1039360   ;;  %vm887_vm13 = vcmask 1040384  }
  0x11   : > { %v509_v7 = vsub.s32 %v506_v6, %v508_v4  ;;  %v5645_v8 = vld [vmem:[%s5642_s24 + $0x8] sm:$0xf]  ;;  %v5648_v9 = vld [vmem:[%s5642_s24 + $0x14] sm:$0xf]  ;;  %v5651_v10 = vld [vmem:[%s5642_s24] sm:$0xff]  ;;  %s446_s15 = scalar_lea.vmem %s8859_s1, %s5123_s29  ;;  %s5556_s19 = smov 127  }
  0x12   : > { %v4854_v11 = vcombine.low %v5645_v8, %v5648_v9  ;;  %v5656_v12 = vld [vmem:[%s5642_s24 + $0xc] sm:$0xff]  ;;  %v5677_v30 = vld [vmem:[%s446_s15 + $0x20] sm:$0xf]  ;;  %v5683_v32 = vld [vmem:[%s446_s15 + $0x18] sm:$0xff]  ;;  %s5557_s20 = smov 96   ;;  %s5558_s21 = smov 112  }
  0x13   : > { %v510_v13 = vrot.slane %v4847_v0, %v509_v7  ;;  %v517_v14 = vrot.slane %v503_v5, %v509_v7  ;;  %v4853_v16 = vcombine.high %v5651_v10, %v5656_v12  ;;  %v4852_v21 = vcombine.low %v5651_v10, %v5656_v12  ;;  %v5679_v31 = vld [vmem:[%s446_s15 + $0x2c] sm:$0xf]  ;;  %v5685_v33 = vld [vmem:[%s446_s15 + $0x24] sm:$0xff]  ;;  %v5715_v41 = vld [vmem:[%s446_s15 + $0x14] sm:$0xf] }
  0x14   : > { %759 = vrot.lane.b32.xlu0 %v4854_v11, %s5549_s25  ;;  %v5690_v34 = vcombine.low %v5677_v30, %v5679_v31  ;;  %v5695_v35 = vcombine.high %v5683_v32, %v5685_v33  ;;  %v5697_v36 = vld [vmem:[%s446_s15] sm:$0xff]  ;;  %v5699_v37 = vld [vmem:[%s446_s15 + $0xc] sm:$0xff]  ;;  %v5711_v39 = vcombine.low %v5683_v32, %v5685_v33  ;;  %v5713_v40 = vld [vmem:[%s446_s15 + $0x8] sm:$0xf]  ;;  %vm785_vm14 = vcmask 769024  }
  0x15   : > { %v519_v17 = vpack.i.b16 %v510_v13, %v510_v13  ;;  %v526_v18 = vpack.i.b16 %v517_v14, %v517_v14  ;;  %v540_v19 = vshrl.u32 %v510_v13, 16  ;;  %v547_v20 = vshrl.u32 %v517_v14, 16  ;;  %757 = vrot.lane.b32.xlu1 %v4853_v16, %s5549_s25 }
  0x16   : > { %v5705_v38 = vcombine.high %v5697_v36, %v5699_v37  ;;  %v5721_v42 = vcombine.low %v5697_v36, %v5699_v37  ;;  %v5727_v43 = vcombine.low %v5713_v40, %v5715_v41  ;;  %vm2027_vm15 = vcmask 269312  }
  0x17   : > { %v524_v22 = vrot.slane %v519_v17, %v523_v15  ;;  %v531_v23 = vrot.slane %v526_v18, %v523_v15  ;;  %v541_v24 = vpack.i.b16 %v540_v19, %v540_v19  ;;  %v548_v25 = vpack.i.b16 %v547_v20, %v547_v20 }
  0x18   : > { %698 = vrot.lane.b32.xlu0 %v4853_v16, %s5550_s26 }
  0x19   : > { %v5665_v26 = vcombine.low %v524_v22, %v531_v23  ;;  %v546_v27 = vrot.slane %v541_v24, %v523_v15  ;;  %v553_v28 = vrot.slane %v548_v25, %v523_v15  ;;  %755 = vrot.lane.b32.xlu1 %v4852_v21, %s5549_s25 }
  0x1b   : > { %v4849_v29 = vcombine.low %v546_v27, %v553_v28 }
  0x1c   : > { %592 = vrot.lane.b32.xlu0 %v5665_v26, %s5551_s27  ;;  %s5816_s27 = scalar_lea.vmem %s8860_s2, %s5123_s29  ;;  %s5560_s29 = smov 94  }
  0x1d   : > { %700 = vrot.lane.b32.xlu1 %v4854_v11, %s5550_s26 }
  0x20   : > { %581 = vrot.lane.b32.xlu0 %v4849_v29, %s5552_s28  ;;  %s5559_s28 = smov 126  }
  0x21   : > { %570 = vrot.lane.b32.xlu1 %v5665_v26, %s5553_s30  ;;  %s5561_s30 = smov 110  }
  0x24   : > { %603 = vrot.lane.b32.xlu0 %v4849_v29, %s5554_s12 }
  0x25   : > { %559 = vrot.lane.b32.xlu1 %v4849_v29, %s5555_s16 }
  0x28   : > { %696 = vrot.lane.b32.xlu0 %v4852_v21, %s5550_s26 }
  0x29   : > { %639 = vrot.lane.b32.xlu1 %v4853_v16, %s5556_s19 }
  0x2c   : > { %641 = vrot.lane.b32.xlu0 %v4854_v11, %s5556_s19 }
  0x2d   : > { %637 = vrot.lane.b32.xlu1 %v4852_v21, %s5556_s19 }
  0x30   : > { %1627 = vrot.lane.b32.xlu0 %v5690_v34, %s5556_s19 }
  0x31   : > { %1625 = vrot.lane.b32.xlu1 %v5695_v35, %s5556_s19 }
  0x34   : > { %1619 = vrot.lane.b32.xlu0 %v5705_v38, %s5556_s19 }
  0x35   : > { %1623 = vrot.lane.b32.xlu1 %v5711_v39, %s5556_s19 }
  0x38   : > { %1617 = vrot.lane.b32.xlu0 %v5721_v42, %s5556_s19 }
  0x39   : > { %1621 = vrot.lane.b32.xlu1 %v5727_v43, %s5556_s19 }
  0x3c   : > { %1851 = vrot.lane.b32.xlu0 %v5690_v34, %s5549_s25 }
  0x3d   : > { %1849 = vrot.lane.b32.xlu1 %v5695_v35, %s5549_s25 }
  0x40   : > { %1843 = vrot.lane.b32.xlu0 %v5705_v38, %s5549_s25 }
  0x41   : > { %1847 = vrot.lane.b32.xlu1 %v5711_v39, %s5549_s25 }
  0x86   : > { %v760_v44 = vpop.permute.xlu0 %759 }
  0x87   : > { %v758_v45 = vpop.permute.xlu1 %757 }
  0x88   : > { %v763_v46 = vsel %vm761_vm0, %v758_v45, %v760_v44 }
  0x89   : > { %893 = vmatprep.subr.bf16.mxu0 %v763_v46 }
  0x8a   : > { %v5742_v47 = vpop.permute.xlu0 %698 }
  0x8b   : > { %v756_v48 = vpop.permute.xlu1 %755 }
  0x8c   : > { %v762_v49 = vsel %vm761_vm0, %v756_v48, %v758_v45 }
  0x8d   : > { %894 = vmatpush1.bf16.msra.mxu0 %v762_v49 }
  0x8e   : > { %v593_v50 = vpop.permute.xlu0 %592 }
  0x8f   : > { %v5745_v51 = vrot.slane %v593_v50, 4  ;;  %v5747_v52 = vpop.permute.xlu1 %700 }
  0x91   : > { %v600_v53 = vmul.bf16 %v5745_v51, %v5645_v8  ;;  %v602_v54 = vmul.bf16 %v5745_v51, %v5648_v9  ;;  %v5776_v5 = vsel %vm595_vm2, %v5745_v51, %v593_v50 }
  0x92   : > { %v599_v11 = vmul.bf16 %v5776_v5, %v5651_v10  ;;  %v601_v13 = vmul.bf16 %v5776_v5, %v5656_v12  ;;  %v582_v14 = vpop.permute.xlu0 %581 }
  0x93   : > { %v571_v55 = vpop.permute.xlu1 %570  ;;  %v4866_v56 = vcombine.low %v600_v53, %v602_v54  ;;  %v5819_v45 = vrot.slane %v582_v14, 4  ;;  %v5827_v53 = vld [vmem:[%s5816_s27 + $0x8] sm:$0xf] }
  0x94   : > { %v5753_v57 = vrot.slane %v571_v55, 4  ;;  %v4865_v19 = vcombine.high %v599_v11, %v601_v13  ;;  %v4864_v23 = vcombine.low %v599_v11, %v601_v13 }
  0x95   : > { %748 = vrot.lane.b32.xlu1 %v4866_v56, %s5557_s20  ;;  %v589_v54 = vmul.bf16 %v5819_v45, %v5645_v8  ;;  %v5835_v56 = vld [vmem:[%s5816_s27 + $0x14] sm:$0xf]  ;;  %v5867_v13 = vsel %vm584_vm3, %v5819_v45, %v582_v14 }
  0x96   : > { %v5757_v58 = vsel %vm573_vm1, %v5753_v57, %v571_v55  ;;  %v1540_v59 = vmul.bf16 %v5713_v40, %v5753_v57  ;;  %v1542_v60 = vmul.bf16 %v5715_v41, %v5753_v57  ;;  %v578_v61 = vmul.bf16 %v5753_v57, %v5645_v8  ;;  %v5797_v22 = vpop.permute.xlu0 %603 }
  0x97   : > { %v580_v62 = vmul.bf16 %v5753_v57, %v5648_v9  ;;  %v577_v0 = vmul.bf16 %v5757_v58, %v5651_v10  ;;  %v579_v1 = vmul.bf16 %v5757_v58, %v5656_v12  ;;  %v1544_v3 = vmul.bf16 %v5677_v30, %v5753_v57  ;;  %v5786_v15 = vpop.permute.xlu1 %559 }
  0x98   : > { %v4912_v63 = vcombine.low %v1540_v59, %v1542_v60  ;;  %v1546_v4 = vmul.bf16 %v5679_v31, %v5753_v57  ;;  %v1543_v17 = vmul.bf16 %v5683_v32, %v5757_v58  ;;  %v1545_v18 = vmul.bf16 %v5685_v33, %v5757_v58  ;;  %v5838_v59 = vld [vmem:[%s5816_s27 + $0x20] sm:$0xf]  ;;  %v5841_v60 = vld [vmem:[%s5816_s27 + $0x2c] sm:$0xf] }
  0x99   : > { %v4860_v2 = vcombine.low %v578_v61, %v580_v62  ;;  %v4859_v6 = vcombine.high %v577_v0, %v579_v1  ;;  %v4858_v16 = vcombine.low %v577_v0, %v579_v1  ;;  %v5794_v20 = vrot.slane %v5786_v15, 4 }
  0x9a   : > { %1713 = vrot.lane.b32.xlu1 %v4912_v63, %s5558_s21  ;;  %v4915_v7 = vcombine.low %v1544_v3, %v1546_v4  ;;  %v4914_v21 = vcombine.high %v1543_v17, %v1545_v18  ;;  %v1539_v24 = vmul.bf16 %v5697_v36, %v5757_v58  ;;  %v1541_v25 = vmul.bf16 %v5699_v37, %v5757_v58 }
  0x9b   : > { %689 = vrot.lane.b32.xlu0 %v4860_v2, %s5558_s21  ;;  %v5804_v27 = vrot.slane %v5797_v22, 4  ;;  %v567_v28 = vmul.bf16 %v5794_v20, %v5645_v8  ;;  %v569_v29 = vmul.bf16 %v5794_v20, %v5648_v9  ;;  %v4913_v44 = vcombine.low %v1543_v17, %v1545_v18 }
  0x9c   : > { %v4911_v46 = vcombine.high %v1539_v24, %v1541_v25  ;;  %v591_v55 = vmul.bf16 %v5819_v45, %v5648_v9  ;;  %v4910_v61 = vcombine.low %v1539_v24, %v1541_v25  ;;  %v1532_v62 = vmul.bf16 %v5713_v40, %v5794_v20 }
  0x9d   : > { %v4857_v48 = vcombine.low %v567_v28, %v569_v29  ;;  %v611_v49 = vmul.bf16 %v5804_v27, %v5645_v8  ;;  %v613_v50 = vmul.bf16 %v5804_v27, %v5648_v9  ;;  %v2812_v63 = vmul.bf16 %v5827_v53, %v5753_v57 }
  0x9e   : > { %687 = vrot.lane.b32.xlu1 %v4859_v6, %s5558_s21  ;;  %v1534_v9 = vmul.bf16 %v5715_v41, %v5794_v20  ;;  %v2814_v0 = vmul.bf16 %v5835_v56, %v5753_v57  ;;  %v2816_v1 = vmul.bf16 %v5838_v59, %v5753_v57  ;;  %v4863_v2 = vcombine.low %v589_v54, %v591_v55 }
  0x9f   : > { %1719 = vrot.lane.b32.xlu0 %v4915_v7, %s5558_s21  ;;  %v4869_v8 = vcombine.low %v611_v49, %v613_v50  ;;  %v1536_v3 = vmul.bf16 %v5677_v30, %v5794_v20  ;;  %v1538_v4 = vmul.bf16 %v5679_v31, %v5794_v20  ;;  %v2818_v6 = vmul.bf16 %v5841_v60, %v5753_v57 }
  0xa0   : > { %v5861_v7 = vcombine.low %v2812_v63, %v2814_v0  ;;  %v2804_v11 = vmul.bf16 %v5827_v53, %v5794_v20  ;;  %v2806_v17 = vmul.bf16 %v5835_v56, %v5794_v20  ;;  %v4906_v18 = vcombine.low %v1532_v62, %v1534_v9 }
  0xa1   : > { %v2808_v57 = vmul.bf16 %v5838_v59, %v5794_v20  ;;  %v4909_v14 = vcombine.low %v1536_v3, %v1538_v4  ;;  %v590_v24 = vmul.bf16 %v5867_v13, %v5656_v12  ;;  %v2828_v28 = vmul.bf16 %v5827_v53, %v5745_v51 }
  0xa2   : > { %685 = vrot.lane.b32.xlu1 %v4858_v16, %s5558_s21  ;;  %v5869_v16 = vcombine.low %v2816_v1, %v2818_v6  ;;  %v2830_v29 = vmul.bf16 %v5835_v56, %v5745_v51  ;;  %v1560_v49 = vmul.bf16 %v5677_v30, %v5745_v51  ;;  %v1562_v50 = vmul.bf16 %v5679_v31, %v5745_v51 }
  0xa3   : > { %746 = vrot.lane.b32.xlu0 %v4865_v19, %s5557_s20  ;;  %v2810_v19 = vmul.bf16 %v5841_v60, %v5794_v20  ;;  %v2826_v62 = vmul.bf16 %v5841_v60, %v5819_v45  ;;  %v2820_v63 = vmul.bf16 %v5827_v53, %v5819_v45  ;;  %v1557_v3 = vmul.bf16 %v5699_v37, %v5776_v5 }
  0xa4   : > { %v5901_v54 = vcombine.low %v2828_v28, %v2830_v29  ;;  %v4927_v1 = vcombine.low %v1560_v49, %v1562_v50  ;;  %v2840_v6 = vmul.bf16 %v5838_v59, %v5804_v27  ;;  %v1556_v50 = vmul.bf16 %v5713_v40, %v5745_v51 }
  0xa5   : > { %v5885_v25 = vcombine.low %v2808_v57, %v2810_v19  ;;  %v2836_v57 = vmul.bf16 %v5827_v53, %v5804_v27  ;;  %vm4433_vm1 = vcmask 531456  }
  0xa6   : > { %1717 = vrot.lane.b32.xlu1 %v4914_v21, %s5558_s21  ;;  %v5879_v21 = vcombine.low %v2804_v11, %v2806_v17  ;;  %v2842_v11 = vmul.bf16 %v5841_v60, %v5804_v27  ;;  %v1559_v17 = vmul.bf16 %v5683_v32, %v5776_v5 }
  0xa7   : > { %744 = vrot.lane.b32.xlu0 %v4864_v23, %s5557_s20  ;;  %v588_v23 = vmul.bf16 %v5867_v13, %v5651_v10 }
  0xa9   : > { %v4861_v9 = vcombine.low %v588_v23, %v590_v24 }
  0xaa   : > { %1715 = vrot.lane.b32.xlu1 %v4913_v44, %s5558_s21  ;;  %v2832_v44 = vmul.bf16 %v5838_v59, %v5745_v51 }
  0xab   : > { %1711 = vrot.lane.b32.xlu0 %v4911_v46, %s5558_s21  ;;  %v4862_v46 = vcombine.high %v588_v23, %v590_v24  ;;  %v2838_v23 = vmul.bf16 %v5835_v56, %v5804_v27 }
  0xad   : > { %v5943_v24 = vcombine.low %v2836_v57, %v2838_v23  ;;  %v6000_v57 = vpop.permute.xlu1 %639 }
  0xae   : > { %665 = vrot.lane.b32.xlu1 %v4857_v48, %s5559_s28  ;;  %v2834_v48 = vmul.bf16 %v5841_v60, %v5745_v51 }
  0xaf   : > { %1709 = vrot.lane.b32.xlu0 %v4910_v61, %s5558_s21  ;;  %v2824_v61 = vmul.bf16 %v5838_v59, %v5819_v45 }
  0xb0   : > { %v5904_v55 = vcombine.low %v2832_v44, %v2834_v48  ;;  %v1552_v44 = vmul.bf16 %v5677_v30, %v5819_v45  ;;  %v5951_v48 = vsel %vm562_vm4, %v5794_v20, %v5786_v15  ;;  %v1548_v20 = vmul.bf16 %v5713_v40, %v5819_v45 }
  0xb1   : > { %v5916_v0 = vcombine.low %v2824_v61, %v2826_v62  ;;  %v1558_v61 = vmul.bf16 %v5715_v41, %v5745_v51 }
  0xb2   : > { %783 = vrot.lane.b32.xlu1 %v4869_v8, %s5560_s29  ;;  %v2822_v8 = vmul.bf16 %v5835_v56, %v5819_v45 }
  0xb3   : > { %724 = vrot.lane.b32.xlu0 %v4863_v2, %s5561_s30  ;;  %v1555_v2 = vmul.bf16 %v5697_v36, %v5776_v5  ;;  %v4924_v15 = vcombine.low %v1556_v50, %v1558_v61 }
  0xb4   : > { %v5922_v4 = vcombine.low %v2820_v63, %v2822_v8  ;;  %v566_v63 = vmul.bf16 %v5951_v48, %v5651_v10  ;;  %v568_v8 = vmul.bf16 %v5951_v48, %v5656_v12 }
  0xb5   : > { %v4923_v19 = vcombine.high %v1555_v2, %v1557_v3  ;;  %v4922_v29 = vcombine.low %v1555_v2, %v1557_v3  ;;  %v1568_v3 = vmul.bf16 %v5677_v30, %v5804_v27  ;;  %v1535_v30 = vmul.bf16 %v5683_v32, %v5951_v48 }
  0xb6   : > { %1667 = vrot.lane.b32.xlu1 %v4906_v18, %s5559_s28  ;;  %v1561_v18 = vmul.bf16 %v5685_v33, %v5776_v5  ;;  %v4855_v2 = vcombine.low %v566_v63, %v568_v8 }
  0xb7   : > { %1673 = vrot.lane.b32.xlu0 %v4909_v14, %s5559_s28  ;;  %v5936_v14 = vcombine.low %v2840_v6, %v2842_v11  ;;  %v1570_v6 = vmul.bf16 %v5679_v31, %v5804_v27  ;;  %v5218_v11 = vld [vmem:[%s8863_s5 + $0x4] ss:$8 sps:$4 sm:$0xff]  }
  0xb8   : > { %v4926_v28 = vcombine.high %v1559_v17, %v1561_v18  ;;  %v4925_v49 = vcombine.low %v1559_v17, %v1561_v18  ;;  %4886 = vmatprep.mubr.msk.bf16.mxu0 %vm862_vm6, %v5218_v11 }
  0xb9   : > { %v4933_v17 = vcombine.low %v1568_v3, %v1570_v6 }
  0xba   : > { %722 = vrot.lane.b32.xlu1 %v4862_v46, %s5561_s30  ;;  %v1554_v46 = vmul.bf16 %v5679_v31, %v5819_v45  ;;  %v1537_v31 = vmul.bf16 %v5685_v33, %v5951_v48 }
  0xbb   : > { %1841 = vrot.lane.b32.xlu0 %v5721_v42, %s5549_s25 }
  0xbc   : > { %v4921_v62 = vcombine.low %v1552_v44, %v1554_v46 }
  0xbe   : > { %720 = vrot.lane.b32.xlu1 %v4861_v9, %s5561_s30  ;;  %v1550_v9 = vmul.bf16 %v5715_v41, %v5819_v45  ;;  %v5979_v45 = vsel %vm606_vm5, %v5804_v27, %v5797_v22 }
  0xbf   : > { %1831 = vrot.lane.b32.xlu0 %v4927_v1, %s5557_s20  ;;  %v4856_v1 = vcombine.high %v566_v63, %v568_v8  ;;  %v610_v22 = vmul.bf16 %v5979_v45, %v5651_v10  ;;  %v1551_v10 = vmul.bf16 %v5683_v32, %v5867_v13  ;;  %v1567_v61 = vmul.bf16 %v5683_v32, %v5979_v45 }
  0xc0   : > { %v4918_v51 = vcombine.low %v1548_v20, %v1550_v9  ;;  %v1547_v8 = vmul.bf16 %v5697_v36, %v5867_v13  ;;  %v1563_v3 = vmul.bf16 %v5697_v36, %v5979_v45  ;;  %v1565_v6 = vmul.bf16 %v5699_v37, %v5979_v45 }
  0xc2   : > { %1845 = vrot.lane.b32.xlu1 %v5727_v43, %s5549_s25 }
  0xc3   : > { %1823 = vrot.lane.b32.xlu0 %v4923_v19, %s5557_s20  ;;  %v4907_v19 = vcombine.low %v1535_v30, %v1537_v31 }
  0xc6   : > { %1829 = vrot.lane.b32.xlu1 %v4926_v28, %s5557_s20  ;;  %v1533_v28 = vmul.bf16 %v5699_v37, %v5951_v48 }
  0xc7   : > { %1821 = vrot.lane.b32.xlu0 %v4922_v29, %s5557_s20  ;;  %v6014_v29 = vpop.permute.xlu1 %637 }
  0xca   : > { %1827 = vrot.lane.b32.xlu1 %v4925_v49, %s5557_s20  ;;  %v6017_v49 = vpop.permute.xlu0 %696 }
  0xcb   : > { %1785 = vrot.lane.b32.xlu0 %v4921_v62, %s5561_s30  ;;  %v1569_v62 = vmul.bf16 %v5685_v33, %v5979_v45  ;;  %v6028_v20 = vpop.permute.xlu1 %1625 }
  0xce   : > { %1825 = vrot.lane.b32.xlu1 %v4924_v15, %s5557_s20  ;;  %v1549_v15 = vmul.bf16 %v5699_v37, %v5867_v13  ;;  %v6032_v9 = vpop.permute.xlu0 %641 }
  0xcf   : > { %663 = vrot.lane.b32.xlu0 %v4856_v1, %s5559_s28  ;;  %v4932_v1 = vcombine.high %v1567_v61, %v1569_v62 }
  0xd0   : > { %v4916_v11 = vcombine.low %v1547_v8, %v1549_v15 }
  0xd2   : > { %1779 = vrot.lane.b32.xlu1 %v4918_v51, %s5561_s30  ;;  %v4917_v51 = vcombine.high %v1547_v8, %v1549_v15 }
  0xd3   : > { %661 = vrot.lane.b32.xlu0 %v4855_v2, %s5559_s28  ;;  %v6036_v2 = vpop.permute.xlu1 %1623 }
  0xd6   : > { %1737 = vrot.lane.b32.xlu1 %v5695_v35, %s5550_s26  ;;  %v612_v35 = vmul.bf16 %v5979_v45, %v5656_v12  ;;  %v1553_v12 = vmul.bf16 %v5685_v33, %v5867_v13 }
  0xd7   : > { %1739 = vrot.lane.b32.xlu0 %v5690_v34, %s5550_s26  ;;  %v4908_v34 = vcombine.high %v1535_v30, %v1537_v31  ;;  %v6042_v30 = vpop.permute.xlu0 %1627  ;;  %v4929_v31 = vcombine.high %v1563_v3, %v1565_v6 }
  0xd8   : > { %v4868_v18 = vcombine.high %v610_v22, %v612_v35  ;;  %v4867_v23 = vcombine.low %v610_v22, %v612_v35  ;;  %v4920_v44 = vcombine.high %v1551_v10, %v1553_v12  ;;  %v4919_v50 = vcombine.low %v1551_v10, %v1553_v12  ;;  %v6047_v22 = vpop.permute.xlu1 %1621  ;;  %v6050_v35 = vld [vmem:[%s5816_s27 + $0x18] sm:$0xff] }
  0xd9   : > { %v1564_v10 = vmul.bf16 %v5713_v40, %v5804_v27  ;;  %v1566_v12 = vmul.bf16 %v5715_v41, %v5804_v27  ;;  %v2807_v27 = vmul.bf16 %v6050_v35, %v5951_v48 }
  0xda   : > { %1735 = vrot.lane.b32.xlu1 %v5711_v39, %s5550_s26  ;;  %v1531_v39 = vmul.bf16 %v5697_v36, %v5951_v48 }
  0xdb   : > { %1897 = vrot.lane.b32.xlu0 %v4933_v17, %s5560_s29  ;;  %v4931_v17 = vcombine.low %v1567_v61, %v1569_v62 }
  0xdc   : > { %v4905_v46 = vcombine.high %v1531_v39, %v1533_v28  ;;  %v4904_v63 = vcombine.low %v1531_v39, %v1533_v28 }
  0xde   : > { %1671 = vrot.lane.b32.xlu1 %v4908_v34, %s5559_s28  ;;  %v6053_v34 = vld [vmem:[%s5816_s27 + $0x24] sm:$0xff] }
  0xdf   : > { %781 = vrot.lane.b32.xlu0 %v4868_v18, %s5560_s29  ;;  %v6057_v18 = vpop.permute.xlu0 %1619  ;;  %v2809_v61 = vmul.bf16 %v6053_v34, %v5951_v48 }
  0xe2   : > { %1669 = vrot.lane.b32.xlu1 %v4907_v19, %s5559_s28  ;;  %v2815_v19 = vmul.bf16 %v6050_v35, %v5757_v58 }
  0xe3   : > { %779 = vrot.lane.b32.xlu0 %v4867_v23, %s5560_s29  ;;  %v6071_v23 = vpop.permute.xlu1 %1849  ;;  %v6073_v28 = vpop.permute.xlu0 %1617 }
  0xe6   : > { %1783 = vrot.lane.b32.xlu1 %v4920_v44, %s5561_s30  ;;  %v4930_v44 = vcombine.low %v1564_v10, %v1566_v12 }
  0xe7   : > { %1665 = vrot.lane.b32.xlu0 %v4905_v46, %s5559_s28  ;;  %v4928_v46 = vcombine.low %v1563_v3, %v1565_v6  ;;  %v6079_v41 = vpop.permute.xlu1 %1847  ;;  %v5011_v6 = vcombine.low %v2807_v27, %v2809_v61 }
  0xea   : > { %1781 = vrot.lane.b32.xlu1 %v4919_v50, %s5561_s30  ;;  %v6077_v50 = vpop.permute.xlu0 %1851 }
  0xeb   : > { %1663 = vrot.lane.b32.xlu0 %v4904_v63, %s5559_s28 }
  0xee   : > { %1895 = vrot.lane.b32.xlu1 %v4932_v1, %s5560_s29  ;;  %v6101_v8 = vpop.permute.xlu0 %1843  ;;  %v5012_v1 = vcombine.high %v2807_v27, %v2809_v61  ;;  %v6142_v61 = vcombine.low %v5827_v53, %v5835_v56 }
  0xef   : > { %1777 = vrot.lane.b32.xlu0 %v4917_v51, %s5561_s30 }
  0xf2   : > { %1731 = vrot.lane.b32.xlu1 %v5705_v38, %s5550_s26  ;;  %v2817_v38 = vmul.bf16 %v6053_v34, %v5757_v58 }
  0xf3   : > { %1775 = vrot.lane.b32.xlu0 %v4916_v11, %s5561_s30 }
  0xf4   : > { %v5018_v39 = vcombine.high %v2815_v19, %v2817_v38  ;;  %v5017_v40 = vcombine.low %v2815_v19, %v2817_v38  ;;  %v6119_v19 = vcombine.high %v6050_v35, %v6053_v34  ;;  %v5242_v38 = vld [vmem:[%s8864_s6 + $0x4] ss:$12 sps:$4 sm:$0xff]  }
  0xf5   : > { %2084 = vmatprep.mubr.bf16.mxu1 %v5242_v38 }
  0xf6   : > { %1889 = vrot.lane.b32.xlu1 %v4929_v31, %s5560_s29 }
  0xf7   : > { %1893 = vrot.lane.b32.xlu0 %v4931_v17, %s5560_s29 }
  0xfa   : > { %1729 = vrot.lane.b32.xlu1 %v5721_v42, %s5550_s26  ;;  %v6083_v42 = vld [vmem:[%s5816_s27] sm:$0xff] }
  0xfb   : > { %1733 = vrot.lane.b32.xlu0 %v5727_v43, %s5550_s26  ;;  %v6086_v43 = vld [vmem:[%s5816_s27 + $0xc] sm:$0xff]  ;;  %v2811_v62 = vmul.bf16 %v6083_v42, %v5757_v58  ;;  %v2803_v31 = vmul.bf16 %v6083_v42, %v5951_v48 }
  0xfc   : > { %v2813_v63 = vmul.bf16 %v6086_v43, %v5757_v58  ;;  %v2805_v17 = vmul.bf16 %v6086_v43, %v5951_v48  ;;  %v6157_v53 = vcombine.high %v6083_v42, %v6086_v43 }
  0xfe   : > { %2989 = vrot.lane.b32.xlu1 %v5018_v39, %s5558_s21  ;;  %v5015_v51 = vcombine.high %v2811_v62, %v2813_v63  ;;  %v5014_v58 = vcombine.low %v2811_v62, %v2813_v63  ;;  %v5009_v48 = vcombine.high %v2803_v31, %v2805_v17  ;;  %v6133_v39 = vcombine.low %v6050_v35, %v6053_v34 }
  0xff   : > { %1891 = vrot.lane.b32.xlu0 %v4930_v44, %s5560_s29  ;;  %v6147_v62 = vcombine.low %v5838_v59, %v5841_v60 }
 0x102   : > { %2987 = vrot.lane.b32.xlu1 %v5017_v40, %s5558_s21  ;;  %v5008_v40 = vcombine.low %v2803_v31, %v2805_v17  ;;  %v2831_v31 = vmul.bf16 %v6050_v35, %v5776_v5  ;;  %v2833_v17 = vmul.bf16 %v6053_v34, %v5776_v5 }
 0x103   : > { %1887 = vrot.lane.b32.xlu0 %v4928_v46, %s5560_s29 }
 0x106   : > { %2985 = vrot.lane.b32.xlu1 %v5861_v7, %s5558_s21 }
 0x107   : > { %2991 = vrot.lane.b32.xlu0 %v5869_v16, %s5558_s21  ;;  %v749_v15 = vpop.permute.xlu1 %748 }
 0x10a   : > { %2943 = vrot.lane.b32.xlu1 %v5012_v1, %s5559_s28 }
 0x10b   : > { %2983 = vrot.lane.b32.xlu0 %v5015_v51, %s5558_s21 }
 0x10c   : > { %v1714_v3 = vpop.permute.xlu1 %1713 }
 0x10d   : > { %v6105_v11 = vpop.permute.xlu0 %689 }
 0x10e   : > { %2941 = vrot.lane.b32.xlu1 %v5011_v6, %s5559_s28 }
 0x10f   : > { %2981 = vrot.lane.b32.xlu0 %v5014_v58, %s5558_s21 }
 0x110   : > { %v6109_v7 = vpop.permute.xlu1 %687 }
 0x111   : > { %v1720_v16 = vpop.permute.xlu0 %1719 }
 0x112   : > { %2939 = vrot.lane.b32.xlu1 %v5879_v21, %s5559_s28 }
 0x113   : > { %2945 = vrot.lane.b32.xlu0 %v5885_v25, %s5559_s28 }
 0x114   : > { %v6126_v10 = vpop.permute.xlu1 %685 }
 0x115   : > { %v747_v12 = vpop.permute.xlu0 %746 }
 0x116   : > { %2897 = vrot.lane.b32.xlu1 %v6119_v19, %s5556_s19  ;;  %v752_v21 = vsel %vm750_vm7, %v747_v12, %v749_v15 }
 0x117   : > { %2937 = vrot.lane.b32.xlu0 %v5009_v48, %s5559_s28  ;;  %895 = vmatprep.subr.bf16.mxu0 %v752_v21  ;;  %v5030_v48 = vcombine.high %v2831_v31, %v2833_v17 }
 0x118   : > { %v1718_v44 = vpop.permute.xlu1 %1717 }
 0x119   : > { %v745_v25 = vpop.permute.xlu0 %744  ;;  %v1724_v46 = vsel %vm691_vm8, %v1718_v44, %v1720_v16 }
 0x11a   : > { %2895 = vrot.lane.b32.xlu1 %v6133_v39, %s5556_s19  ;;  %v751_v27 = vsel %vm750_vm7, %v745_v25, %v747_v12  ;;  %2052 = vmatprep.subr.bf16.mxu1 %v1724_v46 }
 0x11b   : > { %2935 = vrot.lane.b32.xlu0 %v5008_v40, %s5559_s28  ;;  %896 = vmatpush1.bf16.msra.mxu0 %v751_v27  ;;  %v5029_v40 = vcombine.low %v2831_v31, %v2833_v17  ;;  %v693_v31 = vsel %vm691_vm8, %v6109_v7, %v6105_v11 }
 0x11c   : > { %v1716_v63 = vpop.permute.xlu1 %1715 }
 0x11d   : > { %v1712_v15 = vpop.permute.xlu0 %1711  ;;  %v1723_v1 = vsel %vm691_vm8, %v1716_v63, %v1718_v44  ;;  %v704_v63 = vsel %vm702_vm10, %v5742_v47, %v5747_v52  ;;  %v2827_v52 = vmul.bf16 %v6083_v42, %v5776_v5 }
 0x11e   : > { %2893 = vrot.lane.b32.xlu1 %v6142_v61, %s5556_s19  ;;  %2053 = vmatpush1.bf16.msra.mxu1 %v1723_v1  ;;  %v1722_v51 = vsel %vm691_vm8, %v1712_v15, %v1714_v3  ;;  %v6168_v3 = vcombine.low %v6083_v42, %v6086_v43  ;;  %v2823_v1 = vmul.bf16 %v6050_v35, %v5867_v13 }
 0x11f   : > { %2899 = vrot.lane.b32.xlu0 %v6147_v62, %s5556_s19  ;;  %2054 = vmatprep.subr.bf16.mxu1 %v1722_v51  ;;  %v2825_v51 = vmul.bf16 %v6053_v34, %v5867_v13 }
 0x120   : > { %v6159_v56 = vpop.permute.xlu1 %665 }
 0x121   : > { %v1710_v59 = vpop.permute.xlu0 %1709  ;;  %v5023_v11 = vcombine.low %v2823_v1, %v2825_v51 }
 0x122   : > { %3121 = vrot.lane.b32.xlu1 %v6119_v19, %s5549_s25  ;;  %v1721_v60 = vsel %vm691_vm8, %v1710_v59, %v1712_v15 }
 0x123   : > { %2891 = vrot.lane.b32.xlu0 %v6157_v53, %s5556_s19  ;;  %2055 = vmatpush1.bf16.msra.mxu1 %v1721_v60  ;;  %v703_v60 = vsel %vm702_vm10, %v6017_v49, %v5742_v47  ;;  %v5024_v47 = vcombine.high %v2823_v1, %v2825_v51  ;;  %v2841_v1 = vmul.bf16 %v6053_v34, %v5979_v45 }
 0x124   : > { %v6170_v6 = vpop.permute.xlu1 %783 }
 0x125   : > { %v725_v58 = vpop.permute.xlu0 %724 }
 0x126   : > { %3119 = vrot.lane.b32.xlu1 %v6133_v39, %s5549_s25 }
 0x127   : > { %2889 = vrot.lane.b32.xlu0 %v6168_v3, %s5556_s19 }
 0x128   : > { %v6176_v16 = vpop.permute.xlu1 %1667 }
 0x129   : > { %v6182_v38 = vpop.permute.xlu0 %1673 }
 0x12a   : > { %3117 = vrot.lane.b32.xlu1 %v6142_v61, %s5549_s25 }
 0x12b   : > { %3123 = vrot.lane.b32.xlu0 %v6147_v62, %s5549_s25 }
 0x12c   : > { %v723_v12 = vpop.permute.xlu1 %722 }
 0x12d   : > { %v6188_v21 = vpop.permute.xlu0 %1841  ;;  %v728_v44 = vsel %vm726_vm9, %v723_v12, %v725_v58  ;;  %v2829_v58 = vmul.bf16 %v6086_v43, %v5776_v5  ;;  %v692_v5 = vsel %vm691_vm8, %v6126_v10, %v6109_v7  ;;  %v2819_v10 = vmul.bf16 %v6083_v42, %v5867_v13 }
 0x12e   : > { %3101 = vrot.lane.b32.xlu1 %v5030_v48, %s5557_s20  ;;  %897 = vmatprep.subr.bf16.mxu0 %v728_v44 }
 0x12f   : > { %3115 = vrot.lane.b32.xlu0 %v6157_v53, %s5549_s25  ;;  %v5026_v48 = vcombine.low %v2827_v52, %v2829_v58 }
 0x130   : > { %v721_v25 = vpop.permute.xlu1 %720 }
 0x131   : > { %v6194_v46 = vpop.permute.xlu0 %1831  ;;  %v727_v27 = vsel %vm726_vm9, %v721_v25, %v723_v12  ;;  %v5027_v12 = vcombine.high %v2827_v52, %v2829_v58  ;;  %v2821_v25 = vmul.bf16 %v6086_v43, %v5867_v13  ;;  %v5538_v13 = vld [vmem:[%s5642_s24] sm:$0xff]  ;;  %v645_v58 = vsel %vm643_vm12, %v6000_v57, %v6032_v9 }
 0x132   : > { %3099 = vrot.lane.b32.xlu1 %v5029_v40, %s5557_s20  ;;  %898 = vmatpush1.bf16.msra.mxu0 %v727_v27  ;;  %v538_v51 = vmul.bf16 %v5538_v13, %v5665_v26 }
 0x133   : > { %3113 = vrot.lane.b32.xlu0 %v6168_v3, %s5549_s25  ;;  %899 = vmatprep.subr.bf16.mxu0 %v704_v63  ;;  %v2839_v63 = vmul.bf16 %v6050_v35, %v5979_v45  ;;  %v5021_v52 = vcombine.high %v2819_v10, %v2821_v25 }
 0x134   : > { %v6203_v15 = vpop.permute.xlu1 %1845 }
 0x135   : > { %v6209_v59 = vpop.permute.xlu0 %1823 }
 0x136   : > { %3097 = vrot.lane.b32.xlu1 %v5901_v54, %s5557_s20  ;;  %900 = vmatpush1.bf16.msra.mxu0 %v703_v60 }
 0x137   : > { %3103 = vrot.lane.b32.xlu0 %v5904_v55, %s5557_s20  ;;  %901 = vmatprep.subr.bf16.mxu0 %v693_v31 }
 0x138   : > { %v6225_v17 = vpop.permute.xlu1 %1829 }
 0x139   : > { %v6227_v49 = vpop.permute.xlu0 %1821 }
 0x13a   : > { %3055 = vrot.lane.b32.xlu1 %v5024_v47, %s5561_s30  ;;  %902 = vmatpush1.bf16.msra.mxu0 %v692_v5  ;;  %v5036_v47 = vcombine.high %v2839_v63, %v2841_v1 }
 0x13b   : > { %3095 = vrot.lane.b32.xlu0 %v5027_v12, %s5557_s20 }
 0x13c   : > { %v6234_v54 = vpop.permute.xlu1 %1827 }
 0x13d   : > { %v6236_v55 = vpop.permute.xlu0 %1785 }
 0x13e   : > { %3053 = vrot.lane.b32.xlu1 %v5023_v11, %s5561_s30  ;;  %v5020_v11 = vcombine.low %v2819_v10, %v2821_v25 }
 0x13f   : > { %3093 = vrot.lane.b32.xlu0 %v5026_v48, %s5557_s20  ;;  %v5562_v48 = vmov 0  }
 0x140   : > { %v6240_v44 = vpop.permute.xlu1 %1825 }
 0x141   : > { %v664_v7 = vpop.permute.xlu0 %663 }
 0x142   : > { %3051 = vrot.lane.b32.xlu1 %v5922_v4, %s5561_s30  ;;  %v669_v40 = vsel %vm667_vm11, %v664_v7, %v6159_v56  ;;  %v5539_v4 = vld [vmem:[%s5642_s24 + $0xc] sm:$0xff] }
 0x143   : > { %3057 = vrot.lane.b32.xlu0 %v5916_v0, %s5561_s30  ;;  %903 = vmatprep.subr.bf16.mxu0 %v669_v40  ;;  %v539_v60 = vmul.bf16 %v5539_v4, %v5665_v26 }
 0x144   : > { %v6252_v27 = vpop.permute.xlu1 %1779 }
 0x145   : > { %v662_v56 = vpop.permute.xlu0 %661  ;;  %v4851_v12 = vcombine.high %v538_v51, %v539_v60  ;;  %v4850_v9 = vcombine.low %v538_v51, %v539_v60 }
 0x146   : > { %3009 = vrot.lane.b32.xlu1 %v6119_v19, %s5550_s26  ;;  %v668_v0 = vsel %vm667_vm11, %v662_v56, %v664_v7  ;;  %v889_v19 = vsel %vm887_vm13, 65535, %v5562_v48  ;;  %v644_v7 = vsel %vm643_vm12, %v6014_v29, %v6000_v57  ;;  %v2835_v57 = vmul.bf16 %v6083_v42, %v5979_v45 }
 0x147   : > { %3049 = vrot.lane.b32.xlu0 %v5021_v52, %s5561_s30  ;;  %904 = vmatpush1.bf16.msra.mxu0 %v668_v0  ;;  %v6282_v13 = vand.u32 1065369472, %v889_v19  ;;  %v2837_v29 = vmul.bf16 %v6086_v43, %v5979_v45  ;;  %v5035_v56 = vcombine.low %v2839_v63, %v2841_v1  ;;  %v1530_v19 = vmul.bf16 %v5665_v26, %v5685_v33 }
 0x148   : > { %905 = vmatprep.subr.bf16.mxu0 %v645_v58  ;;  %v6269_v31 = vpop.permute.xlu1 %1737 }
 0x149   : > { %v6271_v5 = vpop.permute.xlu0 %1739  ;;  %v5033_v60 = vcombine.high %v2835_v57, %v2837_v29 }
 0x14a   : > { %3167 = vrot.lane.b32.xlu1 %v5036_v47, %s5560_s29 }
 0x14b   : > { %3047 = vrot.lane.b32.xlu0 %v5020_v11, %s5561_s30  ;;  %906 = vmatpush1.bf16.msra.mxu0 %v644_v7  ;;  %v1529_v11 = vmul.bf16 %v5665_v26, %v5683_v32  ;;  %v1630_v32 = vsel %vm643_vm12, %v6057_v18, %v6047_v22  ;;  %v5224_v22 = vld [vmem:[%s8863_s5 + $0x20] ss:$8 sps:$4 sm:$0xff]  }
 0x14c   : > { %v6280_v40 = vpop.permute.xlu1 %1735  ;;  %907 = vmatprep.subr.bf16.mxu0 %v4851_v12  ;;  %v5222_v12 = vld [vmem:[%s8863_s5 + $0x24] ss:$8 sps:$4 sm:$0xff]  }
 0x14d   : > { %v1898_v10 = vpop.permute.xlu0 %1897 }
 0x14e   : > { %3007 = vrot.lane.b32.xlu1 %v6133_v39, %s5550_s26 }
 0x14f   : > { %3011 = vrot.lane.b32.xlu0 %v6147_v62, %s5550_s26  ;;  %908 = vmatpush1.bf16.msra.mxu0 %v4850_v9 }
 0x150   : > { %v1672_v25 = vpop.permute.xlu1 %1671  ;;  %921 = vmatprep.subr.bf16.mxu0 %v6282_v13 }
 0x151   : > { %v782_v51 = vpop.permute.xlu0 %781  ;;  %v1678_v4 = vsel %vm667_vm11, %v1672_v25, %v6182_v38  ;;  %v5219_v38 = vld [vmem:[%s8863_s5 + $0x14] ss:$8 sps:$4 sm:$0xff]  }
 0x152   : > { %3003 = vrot.lane.b32.xlu1 %v6157_v53, %s5550_s26  ;;  %2056 = vmatprep.subr.bf16.mxu1 %v1678_v4  ;;  %v787_v39 = vsel %vm785_vm14, %v782_v51, %v6170_v6  ;;  %v5216_v6 = vld [vmem:[%s8863_s5] ss:$8 sps:$4 sm:$0xff]  }
 0x153   : > { %3169 = vrot.lane.b32.xlu0 %v5936_v14, %s5560_s29  ;;  %922 = vmatpush2.bf16.msra.mxu0 %v6282_v13 }
 0x154   : > { %923 = vmatprep.subr.bf16.mxu0 %v787_v39  ;;  %v1670_v62 = vpop.permute.xlu1 %1669 }
 0x155   : > { %v780_v45 = vpop.permute.xlu0 %779  ;;  %v1677_v52 = vsel %vm667_vm11, %v1670_v62, %v1672_v25  ;;  %v4897_v25 = vcombine.high %v1529_v11, %v1530_v19 }
 0x156   : > { %3161 = vrot.lane.b32.xlu1 %v5033_v60, %s5560_s29  ;;  %v786_v53 = vsel %vm785_vm14, %v780_v45, %v782_v51  ;;  %2057 = vmatpush1.bf16.msra.mxu1 %v1677_v52  ;;  %v5227_v60 = vld [vmem:[%s8863_s5 + $0x30] ss:$8 sps:$4 sm:$0xff]   ;;  %v1856_v45 = vsel %vm761_vm0, %v6071_v23, %v6077_v50  ;;  %v5228_v52 = vld [vmem:[%s8863_s5 + $0x44] ss:$8 sps:$4 sm:$0xff]   ;;  %v1854_v50 = vsel %vm761_vm0, %v6101_v8, %v6203_v15 }
 0x157   : > { %3165 = vrot.lane.b32.xlu0 %v5035_v56, %s5560_s29  ;;  %924 = vmatpush2.bf16.msra.mxu0 %v786_v53  ;;  %v1836_v15 = vsel %vm750_vm7, %v6225_v17, %v6194_v46 }
 0x158   : > { %v6309_v14 = vpop.permute.xlu1 %1783  ;;  %2175 = vmatprep.subr.bf16.mxu0 %v6282_v13 }
 0x159   : > { %v1666_v63 = vpop.permute.xlu0 %1665 }
 0x15a   : > { %926 = vmatmul.mubr.bf16.vlgmr.msra.gmra.mxu0 %v5216_v6  ;;  %v1676_v1 = vsel %vm667_vm11, %v1666_v63, %v6176_v16  ;;  %3001 = vrot.lane.b32.xlu1 %v6168_v3, %s5550_s26  ;;  %v5221_v16 = vld [vmem:[%s8863_s5 + $0x10] ss:$8 sps:$4 sm:$0xff]   ;;  %v1855_v6 = vsel %vm761_vm0, %v6079_v41, %v6071_v23  ;;  %v1853_v23 = vsel %vm761_vm0, %v6188_v21, %v6101_v8  ;;  %v5230_v41 = vld [vmem:[%s8863_s5 + $0x40] ss:$8 sps:$4 sm:$0xff]  }
 0x15b   : > { %3005 = vrot.lane.b32.xlu0 %v6142_v61, %s5550_s26  ;;  %2058 = vmatprep.subr.bf16.mxu1 %v1676_v1  ;;  %v1632_v61 = vsel %vm643_vm12, %v6028_v20, %v6042_v30  ;;  %v1631_v30 = vsel %vm643_vm12, %v6036_v2, %v6028_v20  ;;  %v1528_v20 = vmul.bf16 %v5665_v26, %v5699_v37 }
 0x15c   : > { %v6321_v0 = vpop.permute.xlu1 %1781  ;;  %4887 = vmatprep.mubr.msk.bf16.mxu0 %vm862_vm6, %v5219_v38  ;;  %2176 = vmatpush1.bf16.msra.mxu0 %v6282_v13  ;;  %v1835_v8 = vsel %vm750_vm7, %v6234_v54, %v6225_v17  ;;  %v1834_v21 = vsel %vm750_vm7, %v6209_v59, %v6240_v44  ;;  %v1790_v17 = vsel %vm726_vm9, %v6309_v14, %v6236_v55  ;;  %v5234_v54 = vld [vmem:[%s8863_s5 + $0x64] ss:$8 sps:$4 sm:$0xff]  }
 0x15d   : > { %v1664_v58 = vpop.permute.xlu0 %1663 }
 0x15e   : > { %v1675_v47 = vsel %vm667_vm11, %v1664_v58, %v1666_v63 }
 0x15f   : > { %3163 = vrot.lane.b32.xlu0 %v5943_v24, %s5560_s29  ;;  %2059 = vmatpush1.bf16.msra.mxu1 %v1675_v47  ;;  %v5032_v24 = vcombine.low %v2835_v57, %v2837_v29  ;;  %v1629_v57 = vsel %vm643_vm12, %v6073_v28, %v6057_v18  ;;  %v4896_v29 = vcombine.low %v1529_v11, %v1530_v19  ;;  %v5231_v47 = vld [vmem:[%s8863_s5 + $0x54] ss:$8 sps:$4 sm:$0xff]   ;;  %v5233_v11 = vld [vmem:[%s8863_s5 + $0x50] ss:$8 sps:$4 sm:$0xff]  }
 0x160   : > { %2060 = vmatprep.subr.bf16.mxu1 %v1632_v61  ;;  %v1896_v3 = vpop.permute.xlu1 %1895 }
 0x161   : > { %v6341_v7 = vpop.permute.xlu0 %1777  ;;  %v1902_v9 = vsel %vm785_vm14, %v1896_v3, %v1898_v10  ;;  %v1527_v10 = vmul.bf16 %v5665_v26, %v5697_v36  ;;  %v5225_v36 = vld [vmem:[%s8863_s5 + $0x34] ss:$8 sps:$4 sm:$0xff]  }
 0x162   : > { %936 = vmatmul.mubr.bf16.gmra.mxu0 %v5221_v16  ;;  %2177 = vmatprep.subr.bf16.mxu0 %v1902_v9 }
 0x163   : > { %3159 = vrot.lane.b32.xlu0 %v5032_v24, %s5560_s29  ;;  %2061 = vmatpush1.bf16.msra.mxu1 %v1631_v30  ;;  %v4895_v4 = vcombine.high %v1527_v10, %v1528_v20  ;;  %v4894_v18 = vcombine.low %v1527_v10, %v1528_v20  ;;  %v5236_v30 = vld [vmem:[%s8863_s5 + $0x60] ss:$8 sps:$4 sm:$0xff]  }
 0x164   : > { %2062 = vmatprep.subr.bf16.mxu1 %v1630_v32  ;;  %v6351_v33 = vpop.permute.xlu1 %1731  ;;  %4888 = vmatprep.mubr.msk.bf16.mxu0 %vm862_vm6, %v5222_v12  ;;  %v1833_v12 = vsel %vm750_vm7, %v6227_v49, %v6209_v59  ;;  %v1789_v59 = vsel %vm726_vm9, %v6321_v0, %v6309_v14  ;;  %v1788_v49 = vsel %vm726_vm9, %v6341_v7, %v6252_v27  ;;  %v5237_v27 = vld [vmem:[%s8863_s5 + $0x74] ss:$8 sps:$4 sm:$0xff]  }
 0x165   : > { %v6358_v2 = vpop.permute.xlu0 %1775  ;;  %v1744_v14 = vsel %vm702_vm10, %v6269_v31, %v6271_v5 }
 0x166   : > { %v1787_v9 = vsel %vm726_vm9, %v6358_v2, %v6341_v7  ;;  %v1743_v7 = vsel %vm702_vm10, %v6280_v40, %v6269_v31  ;;  %v5239_v2 = vld [vmem:[%s8863_s5 + $0x70] ss:$8 sps:$4 sm:$0xff]   ;;  %v5240_v31 = vld [vmem:[%s8864_s6] ss:$12 sps:$4 sm:$0xff]  }
 0x167   : > { %2063 = vmatpush1.bf16.msra.mxu1 %v1629_v57 }
 0x168   : > { %v1890_v51 = vpop.permute.xlu1 %1889  ;;  %2064 = vmatprep.subr.bf16.mxu1 %v4897_v25 }
 0x169   : > { %v1894_v37 = vpop.permute.xlu0 %1893 }
 0x16a   : > { %v1901_v39 = vsel %vm785_vm14, %v1894_v37, %v1896_v3  ;;  %946 = vmatmul.mubr.bf16.gmra.mxu0 %v5224_v22  ;;  %v5244_v22 = vld [vmem:[%s8864_s6 + $0x1c] ss:$12 sps:$4 sm:$0xff]  }
 0x16b   : > { %2065 = vmatpush1.bf16.msra.mxu1 %v4896_v29  ;;  %2178 = vmatpush1.bf16.msra.mxu0 %v1901_v39  ;;  %v5243_v39 = vld [vmem:[%s8864_s6 + $0x8] ss:$12 sps:$4 sm:$0xff]  }
 0x16c   : > { %v6370_v28 = vpop.permute.xlu1 %1729  ;;  %2066 = vmatprep.subr.bf16.mxu1 %v4895_v4  ;;  %4889 = vmatprep.mubr.msk.bf16.mxu0 %vm862_vm6, %v5225_v36 }
 0x16d   : > { %v6373_v62 = vpop.permute.xlu0 %1733  ;;  %v1741_v20 = vsel %vm702_vm10, %v6370_v28, %v6351_v33 }
 0x16e   : > { %v1742_v25 = vsel %vm702_vm10, %v6351_v33, %v6373_v62 }
 0x16f   : > { %2067 = vmatpush1.bf16.msra.mxu1 %v4894_v18  ;;  %v5246_v18 = vld [vmem:[%s8864_s6 + $0x18] ss:$12 sps:$4 sm:$0xff]  }
 0x170   : > { %2068 = vmatprep.subr.bf16.mxu1 %v1856_v45  ;;  %v6381_v56 = vpop.permute.xlu1 %2989 }
 0x171   : > { %v1892_v53 = vpop.permute.xlu0 %1891 }
 0x172   : > { %956 = vmatmul.mubr.bf16.gmra.mxu0 %v5227_v60  ;;  %v1900_v38 = vsel %vm785_vm14, %v1890_v51, %v1892_v53  ;;  %v5248_v60 = vld [vmem:[%s8864_s6 + $0x34] ss:$12 sps:$4 sm:$0xff]  }
 0x173   : > { %2069 = vmatpush2.bf16.msra.mxu1 %v1855_v6  ;;  %2179 = vmatprep.subr.bf16.mxu0 %v1900_v38 }
 0x174   : > { %2070 = vmatprep.subr.bf16.mxu1 %v1854_v50  ;;  %v6393_v63 = vpop.permute.xlu1 %2987  ;;  %4890 = vmatprep.mubr.msk.bf16.mxu0 %vm862_vm6, %v5228_v52  ;;  %v5247_v50 = vld [vmem:[%s8864_s6 + $0x20] ss:$12 sps:$4 sm:$0xff]  }
 0x175   : > { %v1888_v1 = vpop.permute.xlu0 %1887  ;;  %v2995_v33 = vsel %vm691_vm8, %v6393_v63, %v6381_v56  ;;  %v5250_v63 = vld [vmem:[%s8864_s6 + $0x30] ss:$12 sps:$4 sm:$0xff]  }
 0x176   : > { %v1899_v58 = vsel %vm785_vm14, %v1888_v1, %v1890_v51 }
 0x177   : > { %2071 = vmatpush2.bf16.msra.mxu1 %v1853_v23  ;;  %2180 = vmatpush1.bf16.msra.mxu0 %v1899_v58  ;;  %v2801_v23 = vmul.bf16 %v5665_v26, %v6050_v35 }
 0x178   : > { %2072 = vmatprep.subr.bf16.mxu1 %v1836_v15  ;;  %v2986_v16 = vpop.permute.xlu1 %2985  ;;  %3446 = vmatprep.subr.bf16.mxu0 %v6282_v13 }
 0x179   : > { %v2992_v61 = vpop.permute.xlu0 %2991 }
 0x17a   : > { %966 = vmatmul.mubr.bf16.gmra.mxu0 %v5230_v41  ;;  %v2996_v40 = vsel %vm691_vm8, %v6381_v56, %v2992_v61  ;;  %v5252_v41 = vld [vmem:[%s8864_s6 + $0x4c] ss:$12 sps:$4 sm:$0xff]  }
 0x17b   : > { %2073 = vmatpush2.bf16.msra.mxu1 %v1835_v8  ;;  %4891 = vmatprep.mubr.msk.bf16.mxu0 %vm862_vm6, %v5231_v47  ;;  %v2800_v8 = vmul.bf16 %v5665_v26, %v6086_v43 }
 0x17c   : > { %2074 = vmatprep.subr.bf16.mxu1 %v1834_v21  ;;  %v6417_v46 = vpop.permute.xlu1 %2943 }
 0x17d   : > { %v2984_v3 = vpop.permute.xlu0 %2983 }
 0x17e   : > { %v2994_v51 = vsel %vm691_vm8, %v2984_v3, %v2986_v16 }
 0x17f   : > { %2075 = vmatpush2.bf16.msra.mxu1 %v1833_v12  ;;  %v5254_v12 = vld [vmem:[%s8864_s6 + $0x48] ss:$12 sps:$4 sm:$0xff]  }
 0x180   : > { %2076 = vmatprep.subr.bf16.mxu1 %v1790_v17  ;;  %v2942_v44 = vpop.permute.xlu1 %2941 }
 0x181   : > { %v2982_v19 = vpop.permute.xlu0 %2981  ;;  %v2949_v56 = vsel %vm667_vm11, %v2942_v44, %v6417_v46 }
 0x182   : > { %976 = vmatmul.mubr.bf16.gmra.mxu0 %v5233_v11  ;;  %v2993_v37 = vsel %vm691_vm8, %v2982_v19, %v2984_v3  ;;  %v5251_v3 = vld [vmem:[%s8864_s6 + $0x38] ss:$12 sps:$4 sm:$0xff]  }
 0x183   : > { %2077 = vmatpush2.bf16.msra.mxu1 %v1789_v59  ;;  %4892 = vmatprep.mubr.msk.bf16.mxu0 %vm862_vm6, %v5234_v54  ;;  %v5255_v59 = vld [vmem:[%s8864_s6 + $0x50] ss:$12 sps:$4 sm:$0xff]  }
 0x184   : > { %2078 = vmatprep.subr.bf16.mxu1 %v1788_v49  ;;  %v2940_v55 = vpop.permute.xlu1 %2939  ;;  %v5258_v49 = vld [vmem:[%s8864_s6 + $0x60] ss:$12 sps:$4 sm:$0xff]  }
 0x185   : > { %v2946_v24 = vpop.permute.xlu0 %2945 }
 0x186   : > { %v2950_v28 = vsel %vm667_vm11, %v6417_v46, %v2946_v24 }
 0x187   : > { %2079 = vmatpush2.bf16.msra.mxu1 %v1787_v9  ;;  %v5260_v9 = vld [vmem:[%s8864_s6 + $0x7c] ss:$12 sps:$4 sm:$0xff]  }
 0x188   : > { %2080 = vmatprep.subr.bf16.mxu1 %v1744_v14  ;;  %v2898_v0 = vpop.permute.xlu1 %2897 }
 0x189   : > { %v2938_v32 = vpop.permute.xlu0 %2937 }
 0x18a   : > { %986 = vmatmul.mubr.bf16.gmra.mxu0 %v5236_v30  ;;  %v2948_v52 = vsel %vm667_vm11, %v2938_v32, %v2940_v55 }
 0x18b   : > { %2081 = vmatpush2.bf16.msra.mxu1 %v1743_v7  ;;  %4893 = vmatprep.mubr.msk.bf16.mxu0 %vm862_vm6, %v5237_v27 }
 0x18c   : > { %2082 = vmatprep.subr.bf16.mxu1 %v1742_v25  ;;  %v2896_v5 = vpop.permute.xlu1 %2895  ;;  %v5259_v25 = vld [vmem:[%s8864_s6 + $0x68] ss:$12 sps:$4 sm:$0xff]  }
 0x18d   : > { %v2936_v10 = vpop.permute.xlu0 %2935  ;;  %v2903_v47 = vsel %vm643_vm12, %v2896_v5, %v2898_v0  ;;  %v5262_v5 = vld [vmem:[%s8864_s6 + $0x78] ss:$12 sps:$4 sm:$0xff]  }
 0x18e   : > { %v2947_v38 = vsel %vm667_vm11, %v2936_v10, %v2938_v32 }
 0x18f   : > { %2083 = vmatpush2.bf16.msra.mxu1 %v1741_v20 }
 0x190   : > { %3323 = vmatprep.subr.bf16.mxu1 %v2996_v40  ;;  %v2894_v57 = vpop.permute.xlu1 %2893 }
 0x191   : > { %v2900_v29 = vpop.permute.xlu0 %2899 }
 0x192   : > { %996 = vmatmul.mubr.bf16.gmra.mxu0 %v5239_v2  ;;  %2085 = vmatmul.mubr.bf16.vlgmr.msra.gmra.mxu1 %v5240_v31  ;;  %v2904_v1 = vsel %vm643_vm12, %v2898_v0, %v2900_v29  ;;  %v5264_v2 = vld [vmem:[%s8864_s6 + $0x94] ss:$12 sps:$4 sm:$0xff]  }
 0x193   : > { %3324 = vmatpush1.bf16.msra.mxu1 %v2995_v33  ;;  %2197 = vmatprep.mubr.bf16.mxu0 %v5562_v48 }
 0x194   : > { %3325 = vmatprep.subr.bf16.mxu1 %v2994_v51  ;;  %v6476_v4 = vpop.permute.xlu1 %3121  ;;  %2094 = vmatprep.mubr.bf16.mxu1 %v5244_v22  ;;  %v5263_v51 = vld [vmem:[%s8864_s6 + $0x80] ss:$12 sps:$4 sm:$0xff]  }
 0x195   : > { %v2892_v36 = vpop.permute.xlu0 %2891 }
 0x196   : > { %v2902_v16 = vsel %vm643_vm12, %v2892_v36, %v2894_v57 }
 0x197   : > { %3326 = vmatpush1.bf16.msra.mxu1 %v2993_v37 }
 0x198   : > { %3327 = vmatprep.subr.bf16.mxu1 %v2950_v28  ;;  %v6487_v62 = vpop.permute.xlu1 %3119 }
 0x199   : > { %v2890_v45 = vpop.permute.xlu0 %2889  ;;  %v3127_v14 = vsel %vm761_vm0, %v6487_v62, %v6476_v4 }
 0x19a   : > { %4958 = vmatmul.mubr.msk.bf16.vlgmr.msra.gmra.mxu0 %vm2027_vm15, %v5243_v39  ;;  %2095 = vmatmul.mubr.bf16.gmra.mxu1 %v5246_v18  ;;  %v2901_v46 = vsel %vm643_vm12, %v2890_v45, %v2892_v36  ;;  %v5268_v39 = vld [vmem:[%s8864_s6 + $0xac] ss:$12 sps:$4 sm:$0xff]  }
 0x19b   : > { %3328 = vmatpush1.bf16.msra.mxu1 %v2949_v56  ;;  %2207 = vmatprep.mubr.bf16.mxu0 %v5562_v48 }
 0x19c   : > { %3329 = vmatprep.subr.bf16.mxu1 %v2948_v52  ;;  %v3118_v53 = vpop.permute.xlu1 %3117  ;;  %2104 = vmatprep.mubr.bf16.mxu1 %v5248_v60 }
 0x19d   : > { %v3124_v6 = vpop.permute.xlu0 %3123  ;;  %3447 = vmatpush1.bf16.msra.mxu0 %v6282_v13  ;;  %v2802_v13 = vmul.bf16 %v5665_v26, %v6053_v34  ;;  %v2799_v34 = vmul.bf16 %v5665_v26, %v6083_v42  ;;  %v5256_v26 = vld [vmem:[%s8864_s6 + $0x64] ss:$12 sps:$4 sm:$0xff]  }
 0x19e   : > { %v3128_v55 = vsel %vm761_vm0, %v6476_v4, %v3124_v6  ;;  %v5266_v4 = vld [vmem:[%s8864_s6 + $0x90] ss:$12 sps:$4 sm:$0xff]   ;;  %v5270_v6 = vld [vmem:[%s8864_s6 + $0xa8] ss:$12 sps:$4 sm:$0xff]  }
 0x19f   : > { %3330 = vmatpush1.bf16.msra.mxu1 %v2947_v38  ;;  %v5001_v61 = vcombine.high %v2801_v23, %v2802_v13  ;;  %v5000_v11 = vcombine.low %v2801_v23, %v2802_v13  ;;  %v4999_v54 = vcombine.high %v2799_v34, %v2800_v8  ;;  %v4998_v43 = vcombine.low %v2799_v34, %v2800_v8 }
 0x1a0   : > { %3331 = vmatprep.subr.bf16.mxu1 %v2904_v1  ;;  %v6506_v58 = vpop.permute.xlu1 %3101 }
 0x1a1   : > { %v3116_v15 = vpop.permute.xlu0 %3115 }
 0x1a2   : > { %4959 = vmatmul.mubr.msk.bf16.gmra.mxu0 %vm2027_vm15, %v5247_v50  ;;  %2105 = vmatmul.mubr.bf16.gmra.mxu1 %v5250_v63  ;;  %v3126_v27 = vsel %vm761_vm0, %v3116_v15, %v3118_v53  ;;  %v5267_v53 = vld [vmem:[%s8864_s6 + $0x98] ss:$12 sps:$4 sm:$0xff]  }
 0x1a3   : > { %3332 = vmatpush1.bf16.msra.mxu1 %v2903_v47  ;;  %2217 = vmatprep.mubr.bf16.mxu0 %v5562_v48  ;;  %v5274_v63 = vld [vmem:[%s8864_s6 + $0xc4] ss:$12 sps:$4 sm:$0xff]  }
 0x1a4   : > { %3333 = vmatprep.subr.bf16.mxu1 %v2902_v16  ;;  %v3100_v35 = vpop.permute.xlu1 %3099  ;;  %2114 = vmatprep.mubr.bf16.mxu1 %v5252_v41  ;;  %v5271_v16 = vld [vmem:[%s8864_s6 + $0xb0] ss:$12 sps:$4 sm:$0xff]  }
 0x1a5   : > { %v3114_v21 = vpop.permute.xlu0 %3113  ;;  %v3107_v40 = vsel %vm750_vm7, %v3100_v35, %v6506_v58  ;;  %v5272_v35 = vld [vmem:[%s8864_s6 + $0xc0] ss:$12 sps:$4 sm:$0xff]  }
 0x1a6   : > { %v3125_v7 = vsel %vm761_vm0, %v3114_v21, %v3116_v15  ;;  %vm1134_vm0 = vcmask 7168  }
 0x1a7   : > { %3334 = vmatpush1.bf16.msra.mxu1 %v2901_v46 }
 0x1a8   : > { %v3098_v17 = vpop.permute.xlu1 %3097  ;;  %3335 = vmatprep.subr.bf16.mxu1 %v5001_v61  ;;  %v5276_v61 = vld [vmem:[%s8864_s6 + $0xdc] ss:$12 sps:$4 sm:$0xff]  }
 0x1a9   : > { %v3104_v42 = vpop.permute.xlu0 %3103 }
 0x1aa   : > { %4960 = vmatmul.mubr.msk.bf16.gmra.mxu0 %vm2027_vm15, %v5251_v3  ;;  %2115 = vmatmul.mubr.bf16.gmra.mxu1 %v5254_v12  ;;  %v3108_v10 = vsel %vm750_vm7, %v6506_v58, %v3104_v42  ;;  %v5275_v3 = vld [vmem:[%s8864_s6 + $0xc8] ss:$12 sps:$4 sm:$0xff]   ;;  %v5278_v12 = vld [vmem:[%s8864_s6 + $0xd8] ss:$12 sps:$4 sm:$0xff]  }
 0x1ab   : > { %3336 = vmatpush1.bf16.msra.mxu1 %v5000_v11  ;;  %2227 = vmatprep.mubr.bf16.mxu0 %v5562_v48  ;;  %v5280_v11 = vld [vmem:[%s8864_s6 + $0xf4] ss:$12 sps:$4 sm:$0xff]   ;;  %v5283_v42 = vld [vmem:[%s8864_s6 + $0xf8] ss:$12 sps:$4 sm:$0xff]  }
 0x1ac   : > { %v3056_v44 = vpop.permute.xlu1 %3055  ;;  %3337 = vmatprep.subr.bf16.mxu1 %v4999_v54  ;;  %2124 = vmatprep.mubr.bf16.mxu1 %v5256_v26  ;;  %v5282_v54 = vld [vmem:[%s8864_s6 + $0xf0] ss:$12 sps:$4 sm:$0xff]   ;;  %v5284_v26 = vld [vmem:[%s8864_s6 + $0x10c] ss:$12 sps:$4 sm:$0xff]  }
 0x1ad   : > { %v3096_v19 = vpop.permute.xlu0 %3095 }
 0x1ae   : > { %v3106_v57 = vsel %vm750_vm7, %v3096_v19, %v3098_v17  ;;  %v5279_v17 = vld [vmem:[%s8864_s6 + $0xe0] ss:$12 sps:$4 sm:$0xff]  }
 0x1af   : > { %3338 = vmatpush1.bf16.msra.mxu1 %v4998_v43  ;;  %v5286_v43 = vld [vmem:[%s8864_s6 + $0x108] ss:$12 sps:$4 sm:$0xff]  }
 0x1b0   : > { %3339 = vmatprep.subr.bf16.mxu1 %v3128_v55  ;;  %v3054_v24 = vpop.permute.xlu1 %3053  ;;  %v5291_v55 = vld [vmem:[%s8864_s6 + $0x128] ss:$12 sps:$4 sm:$0xff]  }
 0x1b1   : > { %v3094_v30 = vpop.permute.xlu0 %3093  ;;  %v3061_v28 = vsel %vm726_vm9, %v3054_v24, %v3056_v44  ;;  %v5294_v24 = vld [vmem:[%s8864_s6 + $0x138] ss:$12 sps:$4 sm:$0xff]  }
 0x1b2   : > { %4961 = vmatmul.mubr.msk.bf16.gmra.mxu0 %vm2027_vm15, %v5255_v59  ;;  %2125 = vmatmul.mubr.bf16.gmra.mxu1 %v5258_v49  ;;  %v3105_v33 = vsel %vm750_vm7, %v3094_v30, %v3096_v19  ;;  %v5287_v19 = vld [vmem:[%s8864_s6 + $0x110] ss:$12 sps:$4 sm:$0xff]   ;;  %v5290_v59 = vld [vmem:[%s8864_s6 + $0x120] ss:$12 sps:$4 sm:$0xff]  }
 0x1b3   : > { %3340 = vmatpush2.bf16.msra.mxu1 %v3127_v14  ;;  %2237 = vmatprep.mubr.bf16.mxu0 %v5562_v48  ;;  %v5292_v49 = vld [vmem:[%s8864_s6 + $0x13c] ss:$12 sps:$4 sm:$0xff]   ;;  %v5296_v30 = vld [vmem:[%s8864_s6 + $0x154] ss:$12 sps:$4 sm:$0xff]  }
 0x1b4   : > { %3341 = vmatprep.subr.bf16.mxu1 %v3126_v27  ;;  %v3052_v0 = vpop.permute.xlu1 %3051  ;;  %2134 = vmatprep.mubr.bf16.mxu1 %v5260_v9  ;;  %v5295_v9 = vld [vmem:[%s8864_s6 + $0x140] ss:$12 sps:$4 sm:$0xff]   ;;  %v5298_v14 = vld [vmem:[%s8864_s6 + $0x150] ss:$12 sps:$4 sm:$0xff]   ;;  %v5299_v27 = vld [vmem:[%s8864_s6 + $0x158] ss:$12 sps:$4 sm:$0xff]  }
 0x1b5   : > { %v3058_v32 = vpop.permute.xlu0 %3057 }
 0x1b6   : > { %v3062_v36 = vsel %vm726_vm9, %v3056_v44, %v3058_v32  ;;  %v5288_v44 = vld [vmem:[%s8864_s6 + $0x124] ss:$12 sps:$4 sm:$0xff]  }
 0x1b7   : > { %3342 = vmatpush2.bf16.msra.mxu1 %v3125_v7 }
 0x1b8   : > { %3343 = vmatprep.subr.bf16.mxu1 %v3108_v10  ;;  %v3010_v20 = vpop.permute.xlu1 %3009 }
 0x1b9   : > { %v3050_v31 = vpop.permute.xlu0 %3049 }
 0x1ba   : > { %4962 = vmatmul.mubr.msk.bf16.gmra.mxu0 %vm2027_vm15, %v5259_v25  ;;  %2135 = vmatmul.mubr.bf16.gmra.mxu1 %v5262_v5  ;;  %v3060_v62 = vsel %vm726_vm9, %v3050_v31, %v3052_v0 }
 0x1bb   : > { %3344 = vmatpush2.bf16.msra.mxu1 %v3107_v40  ;;  %2247 = vmatprep.mubr.bf16.mxu0 %v5562_v48 }
 0x1bc   : > { %3345 = vmatprep.subr.bf16.mxu1 %v3106_v57  ;;  %v3168_v22 = vpop.permute.xlu1 %3167  ;;  %2144 = vmatprep.mubr.bf16.mxu1 %v5264_v2  ;;  %v5300_v2 = vld [vmem:[%s8864_s6 + $0x16c] ss:$12 sps:$4 sm:$0xff]   ;;  %v5302_v57 = vld [vmem:[%s8864_s6 + $0x168] ss:$12 sps:$4 sm:$0xff]  }
 0x1bd   : > { %v3048_v29 = vpop.permute.xlu0 %3047 }
 0x1be   : > { %v3059_v56 = vsel %vm726_vm9, %v3048_v29, %v3050_v31 }
 0x1bf   : > { %3346 = vmatpush2.bf16.msra.mxu1 %v3105_v33 }
 0x1c0   : > { %3347 = vmatprep.subr.bf16.mxu1 %v3062_v36  ;;  %v3008_v37 = vpop.permute.xlu1 %3007 }
 0x1c1   : > { %v3012_v18 = vpop.permute.xlu0 %3011  ;;  %v3015_v58 = vsel %vm702_vm10, %v3008_v37, %v3010_v20 }
 0x1c2   : > { %4963 = vmatmul.mubr.msk.bf16.gmra.mxu0 %vm2027_vm15, %v5263_v51  ;;  %2145 = vmatmul.mubr.bf16.gmra.mxu1 %v5266_v4  ;;  %v3016_v38 = vsel %vm702_vm10, %v3010_v20, %v3012_v18 }
 0x1c3   : > { %3348 = vmatpush2.bf16.msra.mxu1 %v3061_v28  ;;  %2257 = vmatprep.mubr.bf16.mxu0 %v5562_v48 }
 0x1c4   : > { %3349 = vmatprep.subr.bf16.mxu1 %v3060_v62  ;;  %v3004_v60 = vpop.permute.xlu1 %3003  ;;  %2154 = vmatprep.mubr.bf16.mxu1 %v5268_v39 }
 0x1c5   : > { %v3170_v45 = vpop.permute.xlu0 %3169 }
 0x1c6   : > { %v3174_v52 = vsel %vm785_vm14, %v3168_v22, %v3170_v45 }
 0x1c7   : > { %3350 = vmatpush2.bf16.msra.mxu1 %v3059_v56  ;;  %3448 = vmatprep.subr.bf16.mxu0 %v3174_v52 }
 0x1c8   : > { %3351 = vmatprep.subr.bf16.mxu1 %v3016_v38  ;;  %v3162_v50 = vpop.permute.xlu1 %3161 }
 0x1c9   : > { %v3166_v1 = vpop.permute.xlu0 %3165 }
 0x1ca   : > { %v3173_v23 = vsel %vm785_vm14, %v3166_v1, %v3168_v22  ;;  %4964 = vmatmul.mubr.msk.bf16.gmra.mxu0 %vm2027_vm15, %v5267_v53  ;;  %2155 = vmatmul.mubr.bf16.gmra.mxu1 %v5270_v6  ;;  %v5303_v22 = vld [vmem:[%s8864_s6 + $0x170] ss:$12 sps:$4 sm:$0xff]  }
 0x1cb   : > { %3352 = vmatpush2.bf16.msra.mxu1 %v3015_v58  ;;  %3449 = vmatpush1.bf16.msra.mxu0 %v3173_v23 }
 0x1cc   : > { %v3002_v13 = vpop.permute.xlu1 %3001  ;;  %2267 = vmatprep.mubr.bf16.mxu0 %v5562_v48  ;;  %3355 = vmatprep.mubr.bf16.mxu1 %v5274_v63 }
 0x1cd   : > { %v3006_v41 = vpop.permute.xlu0 %3005  ;;  %v3013_v15 = vsel %vm702_vm10, %v3002_v13, %v3004_v60 }
 0x1ce   : > { %v3014_v47 = vsel %vm702_vm10, %v3004_v60, %v3006_v41 }
 0x1cf   : > { %3353 = vmatprep.subr.bf16.mxu1 %v3014_v47 }
 0x1d0   : > { %3354 = vmatpush2.bf16.msra.mxu1 %v3013_v15 }
 0x1d1   : > { %v3164_v34 = vpop.permute.xlu0 %3163 }
 0x1d2   : > { %4965 = vmatmul.mubr.msk.bf16.gmra.mxu0 %vm2027_vm15, %v5271_v16  ;;  %v3172_v8 = vsel %vm785_vm14, %v3162_v50, %v3164_v34 }
 0x1d3   : > { %3450 = vmatprep.subr.bf16.mxu0 %v3172_v8  ;;  %3356 = vmatmul.mubr.bf16.vlgmr.msra.gmra.mxu1 %v5272_v35 }
 0x1d4   : > { %3468 = vmatprep.mubr.bf16.mxu0 %v5562_v48  ;;  %3365 = vmatprep.mubr.bf16.mxu1 %v5276_v61 }
 0x1d5   : > { %v3160_v21 = vpop.permute.xlu0 %3159 }
 0x1d6   : > { %v3171_v46 = vsel %vm785_vm14, %v3160_v21, %v3162_v50 }
 0x1d7   : > { %3451 = vmatpush1.bf16.msra.mxu0 %v3171_v46 }
 0x1da   : > { %5062 = vmatmul.mubr.msk.bf16.vlgmr.msra.gmra.mxu0 %vm2027_vm15, %v5275_v3 }
 0x1db   : > { %3366 = vmatmul.mubr.bf16.gmra.mxu1 %v5278_v12  ;;  %3478 = vmatprep.mubr.bf16.mxu0 %v5562_v48 }
 0x1dc   : > { %3375 = vmatprep.mubr.bf16.mxu1 %v5280_v11 }
 0x1e2   : > { %5063 = vmatmul.mubr.msk.bf16.gmra.mxu0 %vm2027_vm15, %v5279_v17 }
 0x1e3   : > { %3376 = vmatmul.mubr.bf16.gmra.mxu1 %v5282_v54  ;;  %3488 = vmatprep.mubr.bf16.mxu0 %v5562_v48 }
 0x1e4   : > { %3385 = vmatprep.mubr.bf16.mxu1 %v5284_v26 }
 0x1ea   : > { %5064 = vmatmul.mubr.msk.bf16.gmra.mxu0 %vm2027_vm15, %v5283_v42 }
 0x1eb   : > { %3386 = vmatmul.mubr.bf16.gmra.mxu1 %v5286_v43  ;;  %3498 = vmatprep.mubr.bf16.mxu0 %v5562_v48 }
 0x1ec   : > { %3395 = vmatprep.mubr.bf16.mxu1 %v5288_v44 }
 0x1f2   : > { %5065 = vmatmul.mubr.msk.bf16.gmra.mxu0 %vm2027_vm15, %v5287_v19 }
 0x1f3   : > { %3396 = vmatmul.mubr.bf16.gmra.mxu1 %v5290_v59  ;;  %3508 = vmatprep.mubr.bf16.mxu0 %v5562_v48 }
 0x1f4   : > { %3405 = vmatprep.mubr.bf16.mxu1 %v5292_v49 }
 0x1fa   : > { %5066 = vmatmul.mubr.msk.bf16.gmra.mxu0 %vm2027_vm15, %v5291_v55 }
 0x1fb   : > { %3406 = vmatmul.mubr.bf16.gmra.mxu1 %v5294_v24  ;;  %3518 = vmatprep.mubr.bf16.mxu0 %v5562_v48 }
 0x1fc   : > { %3415 = vmatprep.mubr.bf16.mxu1 %v5296_v30 }
 0x202   : > { %5067 = vmatmul.mubr.msk.bf16.gmra.mxu0 %vm2027_vm15, %v5295_v9 }
 0x203   : > { %3528 = vmatprep.mubr.bf16.mxu0 %v5562_v48  ;;  %3416 = vmatmul.mubr.bf16.gmra.mxu1 %v5298_v14 }
 0x204   : > { %3425 = vmatprep.mubr.bf16.mxu1 %v5300_v2 }
 0x20a   : > { %5068 = vmatmul.mubr.msk.bf16.gmra.mxu0 %vm2027_vm15, %v5299_v27 }
 0x20b   : > { %3538 = vmatprep.mubr.bf16.mxu0 %v5562_v48  ;;  %3426 = vmatmul.mubr.bf16.gmra.mxu1 %v5302_v57 }
 0x212   : > { %5069 = vmatmul.mubr.msk.bf16.gmra.mxu0 %vm2027_vm15, %v5303_v22 }
 0x21a   : > { %v6681_v0 = vpop.f32.mrf.mxu0 }
 0x21b   : > { %v1054_v7 = vmul.f32 %v6681_v0, %v6681_v0 }
 0x21c   : > { %v6684_v32 = vpop.f32.mrf.mxu0 }
 0x21d   : > { %v1006_v25 = vadd.f32 %v6684_v32, %v6681_v0  ;;  %v1055_v5 = vmul.f32 %v6684_v32, %v6684_v32 }
 0x21e   : > { %v6693_v10 = vpop.f32.mrf.mxu0 }
 0x21f   : > { %1007 = vadd.xlane.f32.xlu1 %v1006_v25  ;;  %v1086_v20 = vadd.f32 %v1055_v5, %v1054_v7  ;;  %v1056_v48 = vmul.f32 %v6693_v10, %v6693_v10 }
 0x220   : > { %v6698_v31 = vpop.f32.mrf.mxu0 }
 0x221   : > { %v1057_v40 = vmul.f32 %v6698_v31, %v6698_v31  ;;  %1087 = vadd.xlane.f32.xlu0 %v1086_v20  ;;  %v1009_v33 = vadd.f32 %v6698_v31, %v6693_v10 }
 0x222   : > { %v6710_v29 = vpop.f32.mrf.mxu0 }
 0x223   : > { %v1089_v51 = vadd.f32 %v1057_v40, %v1056_v48  ;;  %v1058_v28 = vmul.f32 %v6710_v29, %v6710_v29 }
 0x224   : > { %v6715_v4 = vpop.f32.mrf.mxu0 }
 0x225   : > { %1090 = vadd.xlane.f32.xlu1 %v1089_v51  ;;  %1010 = vadd.xlane.f32.xlu0 %v1009_v33  ;;  %v1012_v37 = vadd.f32 %v6715_v4, %v6710_v29  ;;  %v1059_v39 = vmul.f32 %v6715_v4, %v6715_v4 }
 0x226   : > { %v6717_v36 = vpop.f32.mrf.mxu0 }
 0x227   : > { %v1060_v56 = vmul.f32 %v6717_v36, %v6717_v36  ;;  %v1092_v52 = vadd.f32 %v1059_v39, %v1058_v28 }
 0x228   : > { %v6723_v18 = vpop.f32.mrf.mxu0 }
 0x229   : > { %v1015_v62 = vadd.f32 %v6723_v18, %v6717_v36  ;;  %v1061_v60 = vmul.f32 %v6723_v18, %v6723_v18  ;;  %1013 = vadd.xlane.f32.xlu0 %v1012_v37 }
 0x22a   : > { %v6731_v45 = vpop.f32.mrf.mxu0 }
 0x22b   : > { %8988 = vst [vmem:[#allocation2_spill] sm:$0xff] %v6731_v45  ;;  %1016 = vadd.xlane.f32.xlu1 %v1015_v62  ;;  %v1095_v6 = vadd.f32 %v1061_v60, %v1060_v56  ;;  %v1062_v58 = vmul.f32 %v6731_v45, %v6731_v45 }
 0x22c   : > { %v6735_v53 = vpop.f32.mrf.mxu0 }
 0x22d   : > { %1093 = vadd.xlane.f32.xlu0 %v1092_v52  ;;  %v1018_v50 = vadd.f32 %v6735_v53, %v6731_v45  ;;  %v1063_v63 = vmul.f32 %v6735_v53, %v6735_v53 }
 0x22e   : > { %v6737_v38 = vpop.f32.mrf.mxu0 }
 0x22f   : > { %1096 = vadd.xlane.f32.xlu1 %v1095_v6  ;;  %v1064_v15 = vmul.f32 %v6737_v38, %v6737_v38  ;;  %v1098_v47 = vadd.f32 %v1063_v63, %v1062_v58 }
 0x230   : > { %v6743_v1 = vpop.f32.mrf.mxu0 }
 0x231   : > { %v1021_v23 = vadd.f32 %v6743_v1, %v6737_v38  ;;  %v1065_v13 = vmul.f32 %v6743_v1, %v6743_v1  ;;  %1019 = vadd.xlane.f32.xlu0 %v1018_v50 }
 0x232   : > { %v6751_v41 = vpop.f32.mrf.mxu0 }
 0x233   : > { %1022 = vadd.xlane.f32.xlu1 %v1021_v23  ;;  %v1101_v35 = vadd.f32 %v1065_v13, %v1064_v15  ;;  %v1066_v11 = vmul.f32 %v6751_v41, %v6751_v41 }
 0x234   : > { %v6755_v16 = vpop.f32.mrf.mxu0 }
 0x235   : > { %1099 = vadd.xlane.f32.xlu0 %v1098_v47  ;;  %v1024_v8 = vadd.f32 %v6755_v16, %v6751_v41  ;;  %v1067_v21 = vmul.f32 %v6755_v16, %v6755_v16 }
 0x236   : > { %v6757_v61 = vpop.f32.mrf.mxu0 }
 0x237   : > { %1102 = vadd.xlane.f32.xlu1 %v1101_v35  ;;  %v1068_v17 = vmul.f32 %v6757_v61, %v6757_v61  ;;  %v1104_v26 = vadd.f32 %v1067_v21, %v1066_v11 }
 0x238   : > { %v6759_v34 = vpop.f32.mrf.mxu0 }
 0x239   : > { %v1027_v46 = vadd.f32 %v6759_v34, %v6757_v61  ;;  %v1069_v3 = vmul.f32 %v6759_v34, %v6759_v34 }
 0x23a   : > { %v6769_v12 = vpop.f32.mrf.mxu0 }
 0x23b   : > { %1025 = vadd.xlane.f32.xlu1 %v1024_v8  ;;  %1028 = vadd.xlane.f32.xlu0 %v1027_v46  ;;  %v1107_v42 = vadd.f32 %v1069_v3, %v1068_v17  ;;  %v1070_v9 = vmul.f32 %v6769_v12, %v6769_v12 }
 0x23c   : > { %v6775_v54 = vpop.f32.mrf.mxu0 }
 0x23d   : > { %v1030_v19 = vadd.f32 %v6775_v54, %v6769_v12  ;;  %v1071_v59 = vmul.f32 %v6775_v54, %v6775_v54 }
 0x23e   : > { %v6777_v43 = vpop.f32.mrf.mxu0 }
 0x23f   : > { %1105 = vadd.xlane.f32.xlu1 %v1104_v26  ;;  %1108 = vadd.xlane.f32.xlu0 %v1107_v42  ;;  %v1072_v30 = vmul.f32 %v6777_v43, %v6777_v43  ;;  %v1110_v27 = vadd.f32 %v1071_v59, %v1070_v9 }
 0x240   : > { %v6779_v44 = vpop.f32.mrf.mxu0 }
 0x241   : > { %v1033_v49 = vadd.f32 %v6779_v44, %v6777_v43  ;;  %v1073_v55 = vmul.f32 %v6779_v44, %v6779_v44 }
 0x242   : > { %v6789_v24 = vpop.f32.mrf.mxu0 }
 0x243   : > { %1031 = vadd.xlane.f32.xlu0 %v1030_v19  ;;  %1034 = vadd.xlane.f32.xlu1 %v1033_v49  ;;  %v1113_v7 = vadd.f32 %v1073_v55, %v1072_v30  ;;  %v1074_v22 = vmul.f32 %v6789_v24, %v6789_v24 }
 0x244   : > { %v6795_v14 = vpop.f32.mrf.mxu0 }
 0x245   : > { %v1036_v20 = vadd.f32 %v6795_v14, %v6789_v24  ;;  %v1075_v2 = vmul.f32 %v6795_v14, %v6795_v14 }
 0x246   : > { %v6797_v25 = vpop.f32.mrf.mxu0 }
 0x247   : > { %1111 = vadd.xlane.f32.xlu0 %v1110_v27  ;;  %1114 = vadd.xlane.f32.xlu1 %v1113_v7  ;;  %v1076_v33 = vmul.f32 %v6797_v25, %v6797_v25  ;;  %v1116_v37 = vadd.f32 %v1075_v2, %v1074_v22 }
 0x248   : > { %v6799_v5 = vpop.f32.mrf.mxu0 }
 0x249   : > { %v1039_v48 = vadd.f32 %v6799_v5, %v6797_v25  ;;  %v1077_v40 = vmul.f32 %v6799_v5, %v6799_v5 }
 0x24a   : > { %v6809_v57 = vpop.f32.mrf.mxu0 }
 0x24b   : > { %1037 = vadd.xlane.f32.xlu0 %v1036_v20  ;;  %1040 = vadd.xlane.f32.xlu1 %v1039_v48  ;;  %v1119_v39 = vadd.f32 %v1077_v40, %v1076_v33  ;;  %v1078_v58 = vmul.f32 %v6809_v57, %v6809_v57 }
 0x24c   : > { %v6815_v51 = vpop.f32.mrf.mxu0 }
 0x24d   : > { %v1042_v60 = vadd.f32 %v6815_v51, %v6809_v57  ;;  %v1079_v56 = vmul.f32 %v6815_v51, %v6815_v51 }
 0x24e   : > { %v6817_v28 = vpop.f32.mrf.mxu0 }
 0x24f   : > { %1117 = vadd.xlane.f32.xlu0 %v1116_v37  ;;  %1120 = vadd.xlane.f32.xlu1 %v1119_v39  ;;  %v1080_v23 = vmul.f32 %v6817_v28, %v6817_v28  ;;  %v1122_v47 = vadd.f32 %v1079_v56, %v1078_v58 }
 0x250   : > { %v6819_v62 = vpop.f32.mrf.mxu0 }
 0x251   : > { %v1045_v52 = vadd.f32 %v6819_v62, %v6817_v28  ;;  %v1081_v6 = vmul.f32 %v6819_v62, %v6819_v62 }
 0x252   : > { %v6829_v50 = vpop.f32.mrf.mxu0  ;;  %v2086_v63 = vpop.f32.mrf.mxu1 }
 0x253   : > { %1043 = vadd.xlane.f32.xlu0 %v1042_v60  ;;  %1046 = vadd.xlane.f32.xlu1 %v1045_v52  ;;  %v1125_v35 = vadd.f32 %v1081_v6, %v1080_v23  ;;  %v1082_v49 = vmul.f32 %v6829_v50, %v6829_v50 }
 0x254   : > { %v6835_v13 = vpop.f32.mrf.mxu0  ;;  %v2088_v15 = vpop.f32.mrf.mxu1 }
 0x255   : > { %v1048_v11 = vadd.f32 %v6835_v13, %v6829_v50  ;;  %v1083_v17 = vmul.f32 %v6835_v13, %v6835_v13 }
 0x256   : > { %v6837_v8 = vpop.f32.mrf.mxu0  ;;  %v2090_v21 = vpop.f32.mrf.mxu1 }
 0x257   : > { %8989 = vst [vmem:[#allocation3_spill] sm:$0xff] %v6837_v8  ;;  %1123 = vadd.xlane.f32.xlu0 %v1122_v47  ;;  %1126 = vadd.xlane.f32.xlu1 %v1125_v35  ;;  %v1084_v55 = vmul.f32 %v6837_v8, %v6837_v8  ;;  %v1128_v7 = vadd.f32 %v1083_v17, %v1082_v49 }
 0x258   : > { %v6839_v46 = vpop.f32.mrf.mxu0  ;;  %v2092_v3 = vpop.f32.mrf.mxu1 }
 0x259   : > { %8990 = vst [vmem:[#allocation4_spill] sm:$0xff] %v6839_v46  ;;  %v1051_v26 = vadd.f32 %v6839_v46, %v6837_v8  ;;  %v1085_v42 = vmul.f32 %v6839_v46, %v6839_v46 }
 0x25a   : > { %v2199_v19 = vpop.f32.mrf.mxu0  ;;  %v2096_v59 = vpop.f32.mrf.mxu1 }
 0x25b   : > { %1049 = vadd.xlane.f32.xlu1 %v1048_v11  ;;  %1052 = vadd.xlane.f32.xlu0 %v1051_v26  ;;  %v1131_v20 = vadd.f32 %v1085_v42, %v1084_v55  ;;  %v6855_v40 = vadd.f32 %v2199_v19, %v2086_v63 }
 0x25c   : > { %v2201_v9 = vpop.f32.mrf.mxu0  ;;  %v2098_v30 = vpop.f32.mrf.mxu1 }
 0x25d   : > { %v6853_v27 = vadd.f32 %v2201_v9, %v2088_v15  ;;  %8992 = vst [vmem:[#allocation6_spill] sm:$0xff] %v6855_v40  ;;  %v2326_v63 = vmul.f32 %v6855_v40, %v6855_v40 }
 0x25e   : > { %v2203_v2 = vpop.f32.mrf.mxu0  ;;  %v2100_v48 = vpop.f32.mrf.mxu1 }
 0x25f   : > { %8991 = vst [vmem:[#allocation5_spill] sm:$0xff] %v6853_v27  ;;  %1129 = vadd.xlane.f32.xlu1 %v1128_v7  ;;  %1132 = vadd.xlane.f32.xlu0 %v1131_v20  ;;  %v2327_v37 = vmul.f32 %v6853_v27, %v6853_v27  ;;  %v6859_v39 = vadd.f32 %v2203_v2, %v2090_v21 }
 0x260   : > { %v2205_v22 = vpop.f32.mrf.mxu0  ;;  %v2102_v33 = vpop.f32.mrf.mxu1  ;;  %v2278_v56 = vadd.f32 %v6853_v27, %v6855_v40 }
 0x261   : > { %8993 = vst [vmem:[#allocation7_spill] sm:$0xff] %v6859_v39  ;;  %v6861_v60 = vadd.f32 %v2205_v22, %v2092_v3  ;;  %v2328_v35 = vmul.f32 %v6859_v39, %v6859_v39  ;;  %v2358_v3 = vadd.f32 %v2327_v37, %v2326_v63 }
 0x262   : > { %v2209_v52 = vpop.f32.mrf.mxu0  ;;  %v2106_v6 = vpop.f32.mrf.mxu1 }
 0x263   : > { %8994 = vst [vmem:[#allocation8_spill] sm:$0xff] %v6861_v60  ;;  %v2329_v58 = vmul.f32 %v6861_v60, %v6861_v60  ;;  %2279 = vadd.xlane.f32.xlu0 %v2278_v56  ;;  %v2281_v23 = vadd.f32 %v6861_v60, %v6859_v39  ;;  %v6875_v26 = vadd.f32 %v2209_v52, %v2096_v59 }
 0x264   : > { %v2211_v15 = vpop.f32.mrf.mxu0  ;;  %v2108_v47 = vpop.f32.mrf.mxu1 }
 0x265   : > { %v6873_v21 = vadd.f32 %v2211_v15, %v2098_v30  ;;  %2282 = vadd.xlane.f32.xlu1 %v2281_v23  ;;  %8996 = vst [vmem:[#allocation10_spill] sm:$0xff] %v6875_v26  ;;  %v2361_v42 = vadd.f32 %v2329_v58, %v2328_v35  ;;  %v2330_v59 = vmul.f32 %v6875_v26, %v6875_v26 }
 0x266   : > { %v2213_v11 = vpop.f32.mrf.mxu0  ;;  %v2110_v17 = vpop.f32.mrf.mxu1 }
 0x267   : > { %8995 = vst [vmem:[#allocation9_spill] sm:$0xff] %v6873_v21  ;;  %2359 = vadd.xlane.f32.xlu0 %v2358_v3  ;;  %v2331_v55 = vmul.f32 %v6873_v21, %v6873_v21  ;;  %v6879_v9 = vadd.f32 %v2213_v11, %v2100_v48  ;;  %v2284_v30 = vadd.f32 %v6873_v21, %v6875_v26 }
 0x268   : > { %v2215_v19 = vpop.f32.mrf.mxu0  ;;  %v2112_v49 = vpop.f32.mrf.mxu1 }
 0x269   : > { %8997 = vst [vmem:[#allocation11_spill] sm:$0xff] %v6879_v9  ;;  %v6881_v7 = vadd.f32 %v2215_v19, %v2102_v33  ;;  %2362 = vadd.xlane.f32.xlu1 %v2361_v42  ;;  %v2332_v33 = vmul.f32 %v6879_v9, %v6879_v9  ;;  %v2364_v63 = vadd.f32 %v2331_v55, %v2330_v59 }
 0x26a   : > { %v2219_v20 = vpop.f32.mrf.mxu0  ;;  %v2116_v2 = vpop.f32.mrf.mxu1 }
 0x26b   : > { %8998 = vst [vmem:[#allocation12_spill] sm:$0xff] %v6881_v7  ;;  %v2333_v22 = vmul.f32 %v6881_v7, %v6881_v7  ;;  %2285 = vadd.xlane.f32.xlu0 %v2284_v30  ;;  %v2287_v37 = vadd.f32 %v6881_v7, %v6879_v9  ;;  %v6895_v15 = vadd.f32 %v2219_v20, %v2106_v6 }
 0x26c   : > { %v2221_v48 = vpop.f32.mrf.mxu0  ;;  %v2118_v56 = vpop.f32.mrf.mxu1 }
 0x26d   : > { %v6893_v52 = vadd.f32 %v2221_v48, %v2108_v47  ;;  %2288 = vadd.xlane.f32.xlu1 %v2287_v37  ;;  %9000 = vst [vmem:[#allocation14_spill] sm:$0xff] %v6895_v15  ;;  %v2367_v35 = vadd.f32 %v2333_v22, %v2332_v33  ;;  %v2334_v6 = vmul.f32 %v6895_v15, %v6895_v15 }
 0x26e   : > { %v2223_v58 = vpop.f32.mrf.mxu0  ;;  %v2120_v23 = vpop.f32.mrf.mxu1 }
 0x26f   : > { %8999 = vst [vmem:[#allocation13_spill] sm:$0xff] %v6893_v52  ;;  %2365 = vadd.xlane.f32.xlu0 %v2364_v63  ;;  %v2335_v42 = vmul.f32 %v6893_v52, %v6893_v52  ;;  %v6899_v19 = vadd.f32 %v2223_v58, %v2110_v17  ;;  %v2290_v47 = vadd.f32 %v6893_v52, %v6895_v15 }
 0x270   : > { %v2225_v3 = vpop.f32.mrf.mxu0  ;;  %v2122_v11 = vpop.f32.mrf.mxu1 }
 0x271   : > { %9001 = vst [vmem:[#allocation15_spill] sm:$0xff] %v6899_v19  ;;  %v6901_v30 = vadd.f32 %v2225_v3, %v2112_v49  ;;  %2368 = vadd.xlane.f32.xlu1 %v2367_v35  ;;  %v2336_v49 = vmul.f32 %v6899_v19, %v6899_v19  ;;  %v2370_v48 = vadd.f32 %v2335_v42, %v2334_v6 }
 0x272   : > { %v2229_v55 = vpop.f32.mrf.mxu0  ;;  %v2126_v59 = vpop.f32.mrf.mxu1 }
 0x273   : > { %9002 = vst [vmem:[#allocation16_spill] sm:$0xff] %v6901_v30  ;;  %v2337_v20 = vmul.f32 %v6901_v30, %v6901_v30  ;;  %2291 = vadd.xlane.f32.xlu0 %v2290_v47  ;;  %v2293_v22 = vadd.f32 %v6901_v30, %v6899_v19  ;;  %v6915_v15 = vadd.f32 %v2229_v55, %v2116_v2 }
 0x274   : > { %v2231_v17 = vpop.f32.mrf.mxu0  ;;  %v2128_v37 = vpop.f32.mrf.mxu1 }
 0x275   : > { %2294 = vadd.xlane.f32.xlu1 %v2293_v22  ;;  %v6913_v58 = vadd.f32 %v2231_v17, %v2118_v56  ;;  %v2373_v35 = vadd.f32 %v2337_v20, %v2336_v49  ;;  %9004 = vst [vmem:[#allocation18_spill] sm:$0xff] %v6915_v15 }
 0x276   : > { %v2233_v33 = vpop.f32.mrf.mxu0  ;;  %v2130_v63 = vpop.f32.mrf.mxu1 }
 0x277   : > { %9003 = vst [vmem:[#allocation17_spill] sm:$0xff] %v6913_v58  ;;  %2371 = vadd.xlane.f32.xlu0 %v2370_v48  ;;  %v6917_v47 = vadd.f32 %v2233_v33, %v2120_v23  ;;  %v2339_v42 = vmul.f32 %v6913_v58, %v6913_v58  ;;  %v2296_v6 = vadd.f32 %v6913_v58, %v6915_v15 }
 0x278   : > { %v2235_v3 = vpop.f32.mrf.mxu0  ;;  %v2132_v45 = vpop.f32.mrf.mxu1 }
 0x279   : > { %9005 = vst [vmem:[#allocation19_spill] sm:$0xff] %v6917_v47  ;;  %v6919_v40 = vadd.f32 %v2235_v3, %v2122_v11  ;;  %2374 = vadd.xlane.f32.xlu1 %v2373_v35  ;;  %v2338_v11 = vmul.f32 %v6915_v15, %v6915_v15  ;;  %v2340_v20 = vmul.f32 %v6917_v47, %v6917_v47 }
 0x27a   : > { %v2239_v52 = vpop.f32.mrf.mxu0  ;;  %v2136_v30 = vpop.f32.mrf.mxu1 }
 0x27b   : > { %9006 = vst [vmem:[#allocation20_spill] sm:$0xff] %v6919_v40  ;;  %v2341_v56 = vmul.f32 %v6919_v40, %v6919_v40  ;;  %v2299_v2 = vadd.f32 %v6919_v40, %v6917_v47  ;;  %v2376_v48 = vadd.f32 %v2339_v42, %v2338_v11  ;;  %v6935_v19 = vadd.f32 %v2239_v52, %v2126_v59 }
 0x27c   : > { %v2241_v55 = vpop.f32.mrf.mxu0  ;;  %v2138_v23 = vpop.f32.mrf.mxu1 }
 0x27d   : > { %2297 = vadd.xlane.f32.xlu1 %v2296_v6  ;;  %2300 = vadd.xlane.f32.xlu0 %v2299_v2  ;;  %v6933_v49 = vadd.f32 %v2241_v55, %v2128_v37  ;;  %v2379_v33 = vadd.f32 %v2341_v56, %v2340_v20  ;;  %9008 = vst [vmem:[#allocation22_spill] sm:$0xff] %v6935_v19 }
 0x27e   : > { %v2243_v22 = vpop.f32.mrf.mxu0  ;;  %v2140_v17 = vpop.f32.mrf.mxu1 }
 0x27f   : > { %9007 = vst [vmem:[#allocation21_spill] sm:$0xff] %v6933_v49  ;;  %v6937_v58 = vadd.f32 %v2243_v22, %v2130_v63  ;;  %v2343_v6 = vmul.f32 %v6933_v49, %v6933_v49  ;;  %v2302_v52 = vadd.f32 %v6933_v49, %v6935_v19 }
 0x280   : > { %v2245_v35 = vpop.f32.mrf.mxu0  ;;  %v2142_v3 = vpop.f32.mrf.mxu1 }
 0x281   : > { %9009 = vst [vmem:[#allocation23_spill] sm:$0xff] %v6937_v58  ;;  %v6939_v40 = vadd.f32 %v2245_v35, %v2132_v45  ;;  %2377 = vadd.xlane.f32.xlu1 %v2376_v48  ;;  %2380 = vadd.xlane.f32.xlu0 %v2379_v33  ;;  %v2342_v45 = vmul.f32 %v6935_v19, %v6935_v19 }
 0x282   : > { %v2249_v15 = vpop.f32.mrf.mxu0  ;;  %v2146_v47 = vpop.f32.mrf.mxu1  ;;  %v2344_v56 = vmul.f32 %v6937_v58, %v6937_v58 }
 0x283   : > { %9010 = vst [vmem:[#allocation24_spill] sm:$0xff] %v6939_v40  ;;  %v2345_v37 = vmul.f32 %v6939_v40, %v6939_v40  ;;  %v2305_v42 = vadd.f32 %v6939_v40, %v6937_v58  ;;  %v2382_v22 = vadd.f32 %v2343_v6, %v2342_v45  ;;  %v6955_v35 = vadd.f32 %v2249_v15, %v2136_v30 }
 0x284   : > { %v2251_v59 = vpop.f32.mrf.mxu0  ;;  %v2148_v63 = vpop.f32.mrf.mxu1 }
 0x285   : > { %2306 = vadd.xlane.f32.xlu1 %v2305_v42  ;;  %2303 = vadd.xlane.f32.xlu0 %v2302_v52  ;;  %v6953_v11 = vadd.f32 %v2251_v59, %v2138_v23  ;;  %v2385_v20 = vadd.f32 %v2345_v37, %v2344_v56  ;;  %9012 = vst [vmem:[#allocation26_spill] sm:$0xff] %v6955_v35 }
 0x286   : > { %v2253_v2 = vpop.f32.mrf.mxu0  ;;  %v2150_v55 = vpop.f32.mrf.mxu1 }
 0x287   : > { %9011 = vst [vmem:[#allocation25_spill] sm:$0xff] %v6953_v11  ;;  %v6957_v49 = vadd.f32 %v2253_v2, %v2140_v17  ;;  %v2347_v42 = vmul.f32 %v6953_v11, %v6953_v11  ;;  %v2308_v15 = vadd.f32 %v6953_v11, %v6955_v35 }
 0x288   : > { %v2255_v48 = vpop.f32.mrf.mxu0  ;;  %v2152_v33 = vpop.f32.mrf.mxu1 }
 0x289   : > { %9013 = vst [vmem:[#allocation27_spill] sm:$0xff] %v6957_v49  ;;  %v6959_v40 = vadd.f32 %v2255_v48, %v2142_v3  ;;  %2386 = vadd.xlane.f32.xlu1 %v2385_v20  ;;  %2383 = vadd.xlane.f32.xlu0 %v2382_v22  ;;  %v2346_v3 = vmul.f32 %v6955_v35, %v6955_v35 }
 0x28a   : > { %v2259_v19 = vpop.f32.mrf.mxu0  ;;  %v2156_v58 = vpop.f32.mrf.mxu1  ;;  %v2348_v37 = vmul.f32 %v6957_v49, %v6957_v49 }
 0x28b   : > { %9014 = vst [vmem:[#allocation28_spill] sm:$0xff] %v6959_v40  ;;  %v2349_v23 = vmul.f32 %v6959_v40, %v6959_v40  ;;  %v2311_v6 = vadd.f32 %v6959_v40, %v6957_v49  ;;  %v2388_v2 = vadd.f32 %v2347_v42, %v2346_v3  ;;  %v6975_v22 = vadd.f32 %v2259_v19, %v2146_v47 }
 0x28c   : > { %v2261_v30 = vpop.f32.mrf.mxu0  ;;  %v2158_v17 = vpop.f32.mrf.mxu1 }
 0x28d   : > { %2312 = vadd.xlane.f32.xlu1 %v2311_v6  ;;  %2309 = vadd.xlane.f32.xlu0 %v2308_v15  ;;  %v6973_v45 = vadd.f32 %v2261_v30, %v2148_v63  ;;  %v2391_v56 = vadd.f32 %v2349_v23, %v2348_v37  ;;  %9016 = vst [vmem:[#allocation30_spill] sm:$0xff] %v6975_v22 }
 0x28e   : > { %v2263_v52 = vpop.f32.mrf.mxu0  ;;  %v2160_v59 = vpop.f32.mrf.mxu1 }
 0x28f   : > { %9015 = vst [vmem:[#allocation29_spill] sm:$0xff] %v6973_v45  ;;  %v6977_v48 = vadd.f32 %v2263_v52, %v2150_v55  ;;  %v2351_v6 = vmul.f32 %v6973_v45, %v6973_v45  ;;  %v2314_v19 = vadd.f32 %v6973_v45, %v6975_v22 }
 0x290   : > { %v2265_v20 = vpop.f32.mrf.mxu0  ;;  %v2162_v35 = vpop.f32.mrf.mxu1 }
 0x291   : > { %9017 = vst [vmem:[#allocation31_spill] sm:$0xff] %v6977_v48  ;;  %v6979_v11 = vadd.f32 %v2265_v20, %v2152_v33  ;;  %2392 = vadd.xlane.f32.xlu1 %v2391_v56  ;;  %2389 = vadd.xlane.f32.xlu0 %v2388_v2  ;;  %v2350_v33 = vmul.f32 %v6975_v22, %v6975_v22 }
 0x292   : > { %v2269_v40 = vpop.f32.mrf.mxu0  ;;  %v2352_v23 = vmul.f32 %v6977_v48, %v6977_v48 }
 0x293   : > { %9018 = vst [vmem:[#allocation32_spill] sm:$0xff] %v6979_v11  ;;  %v2353_v63 = vmul.f32 %v6979_v11, %v6979_v11  ;;  %v2317_v42 = vadd.f32 %v6979_v11, %v6977_v48  ;;  %v3357_v47 = vpop.f32.mrf.mxu1  ;;  %v2394_v52 = vadd.f32 %v2351_v6, %v2350_v33  ;;  %v6995_v20 = vadd.f32 %v2269_v40, %v2156_v58 }
 0x294   : > { %v2271_v55 = vpop.f32.mrf.mxu0 }
 0x295   : > { %2318 = vadd.xlane.f32.xlu1 %v2317_v42  ;;  %2315 = vadd.xlane.f32.xlu0 %v2314_v19  ;;  %v3359_v15 = vpop.f32.mrf.mxu1  ;;  %v6993_v3 = vadd.f32 %v2271_v55, %v2158_v17  ;;  %v2397_v37 = vadd.f32 %v2353_v63, %v2352_v23  ;;  %9020 = vst [vmem:[#allocation34_spill] sm:$0xff] %v6995_v20 }
 0x296   : > { %v2273_v30 = vpop.f32.mrf.mxu0 }
 0x297   : > { %9019 = vst [vmem:[#allocation33_spill] sm:$0xff] %v6993_v3  ;;  %v3361_v56 = vpop.f32.mrf.mxu1  ;;  %v6997_v11 = vadd.f32 %v2273_v30, %v2160_v59  ;;  %v2355_v42 = vmul.f32 %v6993_v3, %v6993_v3  ;;  %v2320_v6 = vadd.f32 %v6993_v3, %v6995_v20 }
 0x298   : > { %v2275_v2 = vpop.f32.mrf.mxu0 }
 0x299   : > { %9021 = vst [vmem:[#allocation35_spill] sm:$0xff] %v6997_v11  ;;  %v6999_v45 = vadd.f32 %v2275_v2, %v2162_v35  ;;  %2398 = vadd.xlane.f32.xlu1 %v2397_v37  ;;  %2395 = vadd.xlane.f32.xlu0 %v2394_v52  ;;  %v3363_v22 = vpop.f32.mrf.mxu1  ;;  %v2354_v35 = vmul.f32 %v6995_v20, %v6995_v20 }
 0x29a   : > { %v3470_v48 = vpop.f32.mrf.mxu0  ;;  %v2356_v63 = vmul.f32 %v6997_v11, %v6997_v11 }
 0x29b   : > { %9022 = vst [vmem:[#allocation36_spill] sm:$0xff] %v6999_v45  ;;  %v2357_v17 = vmul.f32 %v6999_v45, %v6999_v45  ;;  %v2323_v40 = vadd.f32 %v6999_v45, %v6997_v11  ;;  %v3367_v58 = vpop.f32.mrf.mxu1  ;;  %v7013_v55 = vadd.f32 %v3470_v48, %v3357_v47  ;;  %v2400_v30 = vadd.f32 %v2355_v42, %v2354_v35 }
 0x29c   : > { %v3472_v59 = vpop.f32.mrf.mxu0 }
 0x29d   : > { %2321 = vadd.xlane.f32.xlu1 %v2320_v6  ;;  %2324 = vadd.xlane.f32.xlu0 %v2323_v40  ;;  %v3369_v19 = vpop.f32.mrf.mxu1  ;;  %9023 = vst [vmem:[#allocation37_spill] sm:$0xff] %v7013_v55  ;;  %v7015_v33 = vadd.f32 %v3472_v59, %v3359_v15  ;;  %v2403_v37 = vadd.f32 %v2357_v17, %v2356_v63 }
 0x29e   : > { %v3474_v23 = vpop.f32.mrf.mxu0  ;;  %v3597_v6 = vmul.f32 %v7013_v55, %v7013_v55 }
 0x29f   : > { %9024 = vst [vmem:[#allocation38_spill] sm:$0xff] %v7015_v33  ;;  %v3371_v52 = vpop.f32.mrf.mxu1  ;;  %v7017_v45 = vadd.f32 %v3474_v23, %v3361_v56  ;;  %v3598_v48 = vmul.f32 %v7015_v33, %v7015_v33 }
 0x2a0   : > { %v3476_v2 = vpop.f32.mrf.mxu0 }
 0x2a1   : > { %9025 = vst [vmem:[#allocation39_spill] sm:$0xff] %v7017_v45  ;;  %v7019_v3 = vadd.f32 %v3476_v2, %v3363_v22  ;;  %2401 = vadd.xlane.f32.xlu1 %v2400_v30  ;;  %2404 = vadd.xlane.f32.xlu0 %v2403_v37  ;;  %v3373_v20 = vpop.f32.mrf.mxu1  ;;  %v3549_v22 = vadd.f32 %v7015_v33, %v7013_v55 }
 0x2a2   : > { %v3480_v47 = vpop.f32.mrf.mxu0  ;;  %v3599_v59 = vmul.f32 %v7017_v45, %v7017_v45  ;;  %v3629_v2 = vadd.f32 %v3598_v48, %v3597_v6 }
 0x2a3   : > { %9026 = vst [vmem:[#allocation40_spill] sm:$0xff] %v7019_v3  ;;  %v3600_v15 = vmul.f32 %v7019_v3, %v7019_v3  ;;  %v7027_v42 = vadd.f32 %v3480_v47, %v3367_v58  ;;  %v3552_v56 = vadd.f32 %v7019_v3, %v7017_v45  ;;  %v3377_v17 = vpop.f32.mrf.mxu1 }
 0x2a4   : > { %v3482_v40 = vpop.f32.mrf.mxu0 }
 0x2a5   : > { %9027 = vst [vmem:[#allocation41_spill] sm:$0xff] %v7027_v42  ;;  %v7035_v35 = vadd.f32 %v3482_v40, %v3369_v19  ;;  %3553 = vadd.xlane.f32.xlu1 %v3552_v56  ;;  %3550 = vadd.xlane.f32.xlu0 %v3549_v22  ;;  %v3379_v63 = vpop.f32.mrf.mxu1  ;;  %v3601_v58 = vmul.f32 %v7027_v42, %v7027_v42 }
 0x2a6   : > { %v3484_v23 = vpop.f32.mrf.mxu0  ;;  %v3632_v37 = vadd.f32 %v3600_v15, %v3599_v59 }
 0x2a7   : > { %9028 = vst [vmem:[#allocation42_spill] sm:$0xff] %v7035_v35  ;;  %v3602_v30 = vmul.f32 %v7035_v35, %v7035_v35  ;;  %v3381_v47 = vpop.f32.mrf.mxu1  ;;  %v7041_v33 = vadd.f32 %v3484_v23, %v3371_v52  ;;  %v3555_v15 = vadd.f32 %v7035_v35, %v7027_v42 }
 0x2a8   : > { %v3486_v55 = vpop.f32.mrf.mxu0  ;;  %v7051_v48 = vpop.xlane.xlu1 %1007 }
 0x2a9   : > { %9029 = vst [vmem:[#allocation43_spill] sm:$0xff] %v7041_v33  ;;  %v7043_v3 = vadd.f32 %v3486_v55, %v3373_v20  ;;  %3633 = vadd.xlane.f32.xlu1 %v3632_v37  ;;  %3630 = vadd.xlane.f32.xlu0 %v3629_v2  ;;  %v3383_v19 = vpop.f32.mrf.mxu1  ;;  %v3635_v45 = vadd.f32 %v3602_v30, %v3601_v58 }
 0x2aa   : > { %v7045_v56 = vpop.xlane.xlu0 %1087  ;;  %v3490_v22 = vpop.f32.mrf.mxu0  ;;  %v3603_v20 = vmul.f32 %v7041_v33, %v7041_v33 }
 0x2ab   : > { %9030 = vst [vmem:[#allocation44_spill] sm:$0xff] %v7043_v3  ;;  %v3604_v40 = vmul.f32 %v7043_v3, %v7043_v3  ;;  %v3387_v6 = vpop.f32.mrf.mxu1  ;;  %v7057_v23 = vadd.f32 %v3490_v22, %v3377_v17  ;;  %v3558_v30 = vadd.f32 %v7043_v3, %v7041_v33 }
 0x2ac   : > { %v3492_v52 = vpop.f32.mrf.mxu0 }
 0x2ad   : > { %3636 = vadd.xlane.f32.xlu1 %v3635_v45  ;;  %3556 = vadd.xlane.f32.xlu0 %v3555_v15  ;;  %v3389_v55 = vpop.f32.mrf.mxu1  ;;  %9031 = vst [vmem:[#allocation45_spill] sm:$0xff] %v7057_v23  ;;  %v7059_v37 = vadd.f32 %v3492_v52, %v3379_v63  ;;  %v3638_v2 = vadd.f32 %v3604_v40, %v3603_v20 }
 0x2ae   : > { %v7055_v59 = vpop.xlane.xlu0 %1010  ;;  %v3494_v58 = vpop.f32.mrf.mxu0  ;;  %v3605_v63 = vmul.f32 %v7057_v23, %v7057_v23 }
 0x2af   : > { %9032 = vst [vmem:[#allocation46_spill] sm:$0xff] %v7059_v37  ;;  %v3391_v42 = vpop.f32.mrf.mxu1  ;;  %v7063_v35 = vpop.xlane.xlu1 %1090  ;;  %v7065_v15 = vadd.f32 %v3494_v58, %v3381_v47  ;;  %v3606_v22 = vmul.f32 %v7059_v37, %v7059_v37  ;;  %v3561_v52 = vadd.f32 %v7059_v37, %v7057_v23  ;;  %v1136_v8 = vsel %vm1134_vm0, %v7055_v59, 0.0 }
 0x2b0   : > { %v3496_v11 = vpop.f32.mrf.mxu0  ;;  %v1135_v59 = vsel %vm1134_vm0, %v7051_v48, 0.0 }
 0x2b1   : > { %3559 = vadd.xlane.f32.xlu1 %v3558_v30  ;;  %3639 = vadd.xlane.f32.xlu0 %v3638_v2  ;;  %v3393_v45 = vpop.f32.mrf.mxu1  ;;  %9033 = vst [vmem:[#allocation47_spill] sm:$0xff] %v7065_v15  ;;  %v7067_v49 = vadd.f32 %v3496_v11, %v3383_v19  ;;  %v3607_v33 = vmul.f32 %v7065_v15, %v7065_v15 }
 0x2b2   : > { %v7069_v17 = vpop.xlane.xlu0 %1013  ;;  %v3500_v40 = vpop.f32.mrf.mxu0  ;;  %v3641_v37 = vadd.f32 %v3606_v22, %v3605_v63 }
 0x2b3   : > { %9034 = vst [vmem:[#allocation48_spill] sm:$0xff] %v7067_v49  ;;  %v3397_v20 = vpop.f32.mrf.mxu1  ;;  %v3608_v30 = vmul.f32 %v7067_v49, %v7067_v49  ;;  %v7079_v47 = vadd.f32 %v3500_v40, %v3387_v6  ;;  %v3564_v19 = vadd.f32 %v7067_v49, %v7065_v15 }
 0x2b4   : > { %v7081_v11 = vpop.xlane.xlu1 %1016  ;;  %v3502_v58 = vpop.f32.mrf.mxu0 }
 0x2b5   : > { %9035 = vst [vmem:[#allocation49_spill] sm:$0xff] %v7079_v47  ;;  %3562 = vadd.xlane.f32.xlu0 %v3561_v52  ;;  %v3399_v2 = vpop.f32.mrf.mxu1  ;;  %v7087_v3 = vadd.f32 %v3502_v58, %v3389_v55  ;;  %3565 = vadd.xlane.f32.xlu1 %v3564_v19  ;;  %v3609_v6 = vmul.f32 %v7079_v47, %v7079_v47 }
 0x2b6   : > { %v7089_v23 = vpop.xlane.xlu0 %1093  ;;  %v3504_v40 = vpop.f32.mrf.mxu0  ;;  %v3644_v52 = vadd.f32 %v3608_v30, %v3607_v33 }
 0x2b7   : > { %9036 = vst [vmem:[#allocation50_spill] sm:$0xff] %v7087_v3  ;;  %v3401_v39 = vpop.f32.mrf.mxu1  ;;  %v3610_v49 = vmul.f32 %v7087_v3, %v7087_v3  ;;  %v7097_v55 = vadd.f32 %v3504_v40, %v3391_v42  ;;  %v3567_v33 = vadd.f32 %v7087_v3, %v7079_v47 }
 0x2b8   : > { %v7095_v60 = vpop.xlane.xlu1 %1096  ;;  %v3506_v27 = vpop.f32.mrf.mxu0 }
 0x2b9   : > { %3642 = vadd.xlane.f32.xlu0 %v3641_v37  ;;  %v3403_v15 = vpop.f32.mrf.mxu1  ;;  %9037 = vst [vmem:[#allocation51_spill] sm:$0xff] %v7097_v55  ;;  %v7099_v19 = vadd.f32 %v3506_v27, %v3393_v45  ;;  %3645 = vadd.xlane.f32.xlu1 %v3644_v52  ;;  %v3647_v21 = vadd.f32 %v3610_v49, %v3609_v6 }
 0x2ba   : > { %v7101_v58 = vpop.xlane.xlu0 %1019  ;;  %v3510_v26 = vpop.f32.mrf.mxu0  ;;  %v3611_v27 = vmul.f32 %v7097_v55, %v7097_v55 }
 0x2bb   : > { %9038 = vst [vmem:[#allocation52_spill] sm:$0xff] %v7099_v19  ;;  %v3612_v63 = vmul.f32 %v7099_v19, %v7099_v19  ;;  %v7105_v22 = vadd.f32 %v3510_v26, %v3397_v20  ;;  %v3407_v42 = vpop.f32.mrf.mxu1  ;;  %v3570_v49 = vadd.f32 %v7099_v19, %v7097_v55 }
 0x2bc   : > { %v1023_v9 = vpop.xlane.xlu1 %1022  ;;  %v3512_v37 = vpop.f32.mrf.mxu0 }
 0x2bd   : > { %9039 = vst [vmem:[#allocation53_spill] sm:$0xff] %v7105_v22  ;;  %3648 = vadd.xlane.f32.xlu0 %v3647_v21  ;;  %v7111_v45 = vadd.f32 %v3512_v37, %v3399_v2  ;;  %3568 = vadd.xlane.f32.xlu1 %v3567_v33  ;;  %v3613_v26 = vmul.f32 %v7105_v22, %v7105_v22  ;;  %v3409_v47 = vpop.f32.mrf.mxu1 }
 0x2be   : > { %v3514_v30 = vpop.f32.mrf.mxu0  ;;  %v7119_v6 = vpop.xlane.xlu0 %1099  ;;  %v3650_v40 = vadd.f32 %v3612_v63, %v3611_v27 }
 0x2bf   : > { %9040 = vst [vmem:[#allocation54_spill] sm:$0xff] %v7111_v45  ;;  %v3614_v20 = vmul.f32 %v7111_v45, %v7111_v45  ;;  %v7121_v52 = vadd.f32 %v3514_v30, %v3401_v39  ;;  %v3573_v3 = vadd.f32 %v7111_v45, %v7105_v22  ;;  %v3411_v63 = vpop.f32.mrf.mxu1 }
 0x2c0   : > { %v1103_v21 = vpop.xlane.xlu1 %1102  ;;  %v3516_v2 = vpop.f32.mrf.mxu0 }
 0x2c1   : > { %9041 = vst [vmem:[#allocation55_spill] sm:$0xff] %v7121_v52  ;;  %3571 = vadd.xlane.f32.xlu0 %v3570_v49  ;;  %v7123_v33 = vadd.f32 %v3516_v2, %v3403_v15  ;;  %3651 = vadd.xlane.f32.xlu1 %v3650_v40  ;;  %v3653_v46 = vadd.f32 %v3614_v20, %v3613_v26  ;;  %v3413_v26 = vpop.f32.mrf.mxu1 }
 0x2c2   : > { %v3520_v37 = vpop.f32.mrf.mxu0  ;;  %v3615_v39 = vmul.f32 %v7121_v52, %v7121_v52 }
 0x2c3   : > { %9042 = vst [vmem:[#allocation56_spill] sm:$0xff] %v7123_v33  ;;  %v3616_v55 = vmul.f32 %v7123_v33, %v7123_v33  ;;  %v7133_v15 = vadd.f32 %v3520_v37, %v3407_v42  ;;  %v3576_v45 = vadd.f32 %v7123_v33, %v7121_v52  ;;  %v1140_v33 = vsel %vm1134_vm0, %v7081_v11, 0.0 }
 0x2c4   : > { %v1026_v19 = vpop.xlane.xlu1 %1025  ;;  %v7129_v7 = vpop.xlane.xlu0 %1028 }
 0x2c5   : > { %v3522_v27 = vpop.f32.mrf.mxu0  ;;  %3574 = vadd.xlane.f32.xlu0 %v3573_v3  ;;  %3654 = vadd.xlane.f32.xlu1 %v3653_v46  ;;  %9043 = vst [vmem:[#allocation57_spill] sm:$0xff] %v7133_v15  ;;  %v3656_v40 = vadd.f32 %v3616_v55, %v3615_v39  ;;  %v3617_v55 = vmul.f32 %v7133_v15, %v7133_v15  ;;  %v1138_v39 = vsel %vm1134_vm0, %v7069_v17, 0.0 }
 0x2c6   : > { %v7135_v30 = vadd.f32 %v3522_v27, %v3409_v47  ;;  %v1154_v47 = vsel %vm1134_vm0, %v7063_v35, 0.0 }
 0x2c7   : > { %v3524_v49 = vpop.f32.mrf.mxu0 }
 0x2c8   : > { %9044 = vst [vmem:[#allocation58_spill] sm:$0xff] %v7135_v30  ;;  %v1106_v2 = vpop.xlane.xlu1 %1105  ;;  %v1109_v22 = vpop.xlane.xlu0 %1108  ;;  %v7141_v3 = vadd.f32 %v3524_v49, %v3411_v63  ;;  %v3618_v42 = vmul.f32 %v7135_v30, %v7135_v30  ;;  %v3579_v37 = vadd.f32 %v7135_v30, %v7133_v15  ;;  %v1153_v49 = vsel %vm1134_vm0, %v7045_v56, 0.0 }
 0x2c9   : > { %v3526_v20 = vpop.f32.mrf.mxu0  ;;  %3657 = vadd.xlane.f32.xlu0 %v3656_v40  ;;  %3577 = vadd.xlane.f32.xlu1 %v3576_v45  ;;  %v1137_v40 = vadd.f32 %v1136_v8, %v1135_v59  ;;  %v1155_v48 = vadd.f32 %v1154_v47, %v1153_v49  ;;  %v1242_v15 = vsel %vm1134_vm0, %v1103_v21, 0.0  ;;  %v1223_v8 = vsel %vm1134_vm0, %v7101_v58, 0.0 }
 0x2ca   : > { %9045 = vst [vmem:[#allocation59_spill] sm:$0xff] %v7141_v3  ;;  %v7143_v46 = vadd.f32 %v3526_v20, %v3413_v26  ;;  %v1156_v26 = vsel %vm1134_vm0, %v7089_v23, 0.0  ;;  %v1224_v20 = vsel %vm1134_vm0, %v1023_v9, 0.0  ;;  %v3619_v17 = vmul.f32 %v7141_v3, %v7141_v3 }
 0x2cb   : > { %v1139_v52 = vadd.f32 %v1138_v39, %v1137_v40  ;;  %v3659_v30 = vadd.f32 %v3618_v42, %v3617_v55  ;;  %v1157_v56 = vadd.f32 %v1156_v26, %v1155_v48  ;;  %v1226_v23 = vsel %vm1134_vm0, %v1026_v19, 0.0 }
 0x2cc   : > { %9046 = vst [vmem:[#allocation60_spill] sm:$0xff] %v7143_v46  ;;  %v3620_v45 = vmul.f32 %v7143_v46, %v7143_v46  ;;  %v1032_v63 = vpop.xlane.xlu0 %1031  ;;  %v1035_v35 = vpop.xlane.xlu1 %1034  ;;  %v3582_v27 = vadd.f32 %v7143_v46, %v7141_v3  ;;  %v1158_v59 = vsel %vm1134_vm0, %v7095_v60, 0.0  ;;  %v1241_v39 = vsel %vm1134_vm0, %v7119_v6, 0.0 }
 0x2cd   : > { %3580 = vadd.xlane.f32.xlu0 %v3579_v37  ;;  %v1244_v11 = vsel %vm1134_vm0, %v1106_v2, 0.0  ;;  %v1243_v21 = vadd.f32 %v1242_v15, %v1241_v39  ;;  %v1311_v55 = vsel %vm1134_vm0, %v1032_v63, 0.0  ;;  %v1312_v58 = vsel %vm1134_vm0, %v1035_v35, 0.0 }
 0x2ce   : > { %3583 = vadd.xlane.f32.xlu1 %v3582_v27  ;;  %v3662_v9 = vadd.f32 %v3620_v45, %v3619_v17  ;;  %v1225_v27 = vadd.f32 %v1224_v20, %v1223_v8  ;;  %v1141_v19 = vadd.f32 %v1140_v33, %v1139_v52  ;;  %v1159_v49 = vadd.f32 %v1158_v59, %v1157_v56 }
 0x2cf   : > { %v1245_v45 = vadd.f32 %v1244_v11, %v1243_v21  ;;  %v1313_v60 = vadd.f32 %v1312_v58, %v1311_v55  ;;  %v1228_v15 = vsel %vm1134_vm0, %v7129_v7, 0.0  ;;  %v1246_v52 = vsel %vm1134_vm0, %v1109_v22, 0.0 }
 0x2d0   : > { %v1112_v47 = vpop.xlane.xlu0 %1111  ;;  %v1115_v37 = vpop.xlane.xlu1 %1114  ;;  %v1227_v42 = vadd.f32 %v1226_v23, %v1225_v27 }
 0x2d1   : > { %3660 = vadd.xlane.f32.xlu0 %v3659_v30  ;;  %v1329_v48 = vsel %vm1134_vm0, %v1112_v47, 0.0  ;;  %v1330_v6 = vsel %vm1134_vm0, %v1115_v37, 0.0  ;;  %v1247_v63 = vadd.f32 %v1246_v52, %v1245_v45 }
 0x2d2   : > { %3663 = vadd.xlane.f32.xlu1 %v3662_v9  ;;  %v1229_v30 = vadd.f32 %v1228_v15, %v1227_v42  ;;  %v1331_v35 = vadd.f32 %v1330_v6, %v1329_v48 }
 0x2d4   : > { %v1038_v40 = vpop.xlane.xlu0 %1037  ;;  %v1041_v26 = vpop.xlane.xlu1 %1040 }
 0x2d5   : > { %v1314_v2 = vsel %vm1134_vm0, %v1038_v40, 0.0  ;;  %1142 = vadd.xlane.f32.xlu0 %v1141_v19  ;;  %v1316_v8 = vsel %vm1134_vm0, %v1041_v26, 0.0 }
 0x2d6   : > { %1160 = vadd.xlane.f32.xlu1 %v1159_v49  ;;  %v1315_v33 = vadd.f32 %v1314_v2, %v1313_v60 }
 0x2d8   : > { %v1118_v20 = vpop.xlane.xlu0 %1117  ;;  %v1121_v17 = vpop.xlane.xlu1 %1120  ;;  %v1317_v47 = vadd.f32 %v1316_v8, %v1315_v33 }
 0x2d9   : > { %v1332_v56 = vsel %vm1134_vm0, %v1118_v20, 0.0  ;;  %1230 = vadd.xlane.f32.xlu0 %v1229_v30  ;;  %v1334_v37 = vsel %vm1134_vm0, %v1121_v17, 0.0 }
 0x2da   : > { %v1333_v23 = vadd.f32 %v1332_v56, %v1331_v35  ;;  %1248 = vadd.xlane.f32.xlu1 %v1247_v63 }
 0x2dc   : > { %v1335_v7 = vadd.f32 %v1334_v37, %v1333_v23  ;;  %v1044_v9 = vpop.xlane.xlu0 %1043  ;;  %v1047_v59 = vpop.xlane.xlu1 %1046 }
 0x2dd   : > { %1318 = vadd.xlane.f32.xlu0 %v1317_v47  ;;  %v1399_v39 = vsel %vm1134_vm0, %v1044_v9, 0.0  ;;  %v1400_v11 = vsel %vm1134_vm0, %v1047_v59, 0.0 }
 0x2de   : > { %1336 = vadd.xlane.f32.xlu1 %v1335_v7  ;;  %v1401_v21 = vadd.f32 %v1400_v11, %v1399_v39 }
 0x2e0   : > { %v1124_v22 = vpop.xlane.xlu0 %1123  ;;  %v1127_v27 = vpop.xlane.xlu1 %1126 }
 0x2e1   : > { %v1417_v19 = vsel %vm1134_vm0, %v1124_v22, 0.0  ;;  %v1418_v42 = vsel %vm1134_vm0, %v1127_v27, 0.0 }
 0x2e2   : > { %v1419_v26 = vadd.f32 %v1418_v42, %v1417_v19 }
 0x2e4   : > { %v1050_v55 = vpop.xlane.xlu1 %1049  ;;  %v1053_v58 = vpop.xlane.xlu0 %1052 }
 0x2e5   : > { %v1402_v49 = vsel %vm1134_vm0, %v1050_v55, 0.0  ;;  %v1404_v40 = vsel %vm1134_vm0, %v1053_v58, 0.0 }
 0x2e6   : > { %v1403_v45 = vadd.f32 %v1402_v49, %v1401_v21 }
 0x2e8   : > { %v1405_v60 = vadd.f32 %v1404_v40, %v1403_v45  ;;  %v1130_v48 = vpop.xlane.xlu1 %1129  ;;  %v1133_v6 = vpop.xlane.xlu0 %1132 }
 0x2e9   : > { %v1420_v2 = vsel %vm1134_vm0, %v1130_v48, 0.0  ;;  %v1422_v30 = vsel %vm1134_vm0, %v1133_v6, 0.0 }
 0x2ea   : > { %v1421_v15 = vadd.f32 %v1420_v2, %v1419_v26  ;;  %1406 = vadd.xlane.f32.xlu0 %v1405_v60 }
 0x2ec   : > { %v1423_v52 = vadd.f32 %v1422_v30, %v1421_v15  ;;  %v2280_v33 = vpop.xlane.xlu0 %2279 }
 0x2ed   : > { %v2406_v56 = vsel %vm1134_vm0, %v2280_v33, 0.0 }
 0x2ee   : > { %v2283_v63 = vpop.xlane.xlu1 %2282  ;;  %1424 = vadd.xlane.f32.xlu1 %v1423_v52 }
 0x2ef   : > { %v2407_v20 = vsel %vm1134_vm0, %v2283_v63, 0.0 }
 0x2f0   : > { %v2360_v35 = vpop.xlane.xlu0 %2359  ;;  %v2408_v8 = vadd.f32 %v2407_v20, %v2406_v56 }
 0x2f1   : > { %v2424_v59 = vsel %vm1134_vm0, %v2360_v35, 0.0 }
 0x2f2   : > { %v2363_v17 = vpop.xlane.xlu1 %2362 }
 0x2f3   : > { %v2425_v47 = vsel %vm1134_vm0, %v2363_v17, 0.0 }
 0x2f4   : > { %v2286_v23 = vpop.xlane.xlu0 %2285  ;;  %v2426_v27 = vadd.f32 %v2425_v47, %v2424_v59 }
 0x2f5   : > { %v2409_v37 = vsel %vm1134_vm0, %v2286_v23, 0.0 }
 0x2f6   : > { %v2410_v7 = vadd.f32 %v2409_v37, %v2408_v8  ;;  %v2289_v9 = vpop.xlane.xlu1 %2288 }
 0x2f7   : > { %v2411_v22 = vsel %vm1134_vm0, %v2289_v9, 0.0 }
 0x2f8   : > { %v2412_v39 = vadd.f32 %v2411_v22, %v2410_v7  ;;  %v2366_v11 = vpop.xlane.xlu0 %2365 }
 0x2f9   : > { %v2427_v21 = vsel %vm1134_vm0, %v2366_v11, 0.0 }
 0x2fa   : > { %v2428_v55 = vadd.f32 %v2427_v21, %v2426_v27  ;;  %v2369_v58 = vpop.xlane.xlu1 %2368  ;;  %2413 = vadd.xlane.f32.xlu0 %v2412_v39 }
 0x2fb   : > { %v2429_v19 = vsel %vm1134_vm0, %v2369_v58, 0.0 }
 0x2fc   : > { %v2430_v42 = vadd.f32 %v2429_v19, %v2428_v55  ;;  %v2292_v49 = vpop.xlane.xlu0 %2291 }
 0x2fd   : > { %v2494_v48 = vsel %vm1134_vm0, %v2292_v49, 0.0 }
 0x2fe   : > { %v2295_v45 = vpop.xlane.xlu1 %2294  ;;  %2431 = vadd.xlane.f32.xlu1 %v2430_v42 }
 0x2ff   : > { %v2495_v60 = vsel %vm1134_vm0, %v2295_v45, 0.0 }
 0x300   : > { %v2372_v40 = vpop.xlane.xlu0 %2371  ;;  %v2496_v6 = vadd.f32 %v2495_v60, %v2494_v48 }
 0x301   : > { %v2512_v63 = vsel %vm1134_vm0, %v2372_v40, 0.0 }
 0x302   : > { %v2375_v26 = vpop.xlane.xlu1 %2374 }
 0x303   : > { %v2513_v30 = vsel %vm1134_vm0, %v2375_v26, 0.0 }
 0x304   : > { %v2514_v20 = vadd.f32 %v2513_v30, %v2512_v63 }
 0x306   : > { %v2298_v2 = vpop.xlane.xlu1 %2297  ;;  %v2301_v15 = vpop.xlane.xlu0 %2300 }
 0x307   : > { %v2497_v52 = vsel %vm1134_vm0, %v2298_v2, 0.0  ;;  %v2499_v35 = vsel %vm1134_vm0, %v2301_v15, 0.0 }
 0x308   : > { %v2498_v33 = vadd.f32 %v2497_v52, %v2496_v6 }
 0x30a   : > { %v2500_v17 = vadd.f32 %v2499_v35, %v2498_v33  ;;  %v2378_v56 = vpop.xlane.xlu1 %2377  ;;  %v2381_v8 = vpop.xlane.xlu0 %2380 }
 0x30b   : > { %v2515_v23 = vsel %vm1134_vm0, %v2378_v56, 0.0  ;;  %v2517_v37 = vsel %vm1134_vm0, %v2381_v8, 0.0 }
 0x30c   : > { %v2516_v47 = vadd.f32 %v2515_v23, %v2514_v20  ;;  %2501 = vadd.xlane.f32.xlu0 %v2500_v17 }
 0x30e   : > { %v2518_v7 = vadd.f32 %v2517_v37, %v2516_v47  ;;  %v2307_v9 = vpop.xlane.xlu1 %2306  ;;  %v2304_v59 = vpop.xlane.xlu0 %2303 }
 0x30f   : > { %v2583_v39 = vsel %vm1134_vm0, %v2307_v9, 0.0  ;;  %v2582_v11 = vsel %vm1134_vm0, %v2304_v59, 0.0 }
 0x310   : > { %2519 = vadd.xlane.f32.xlu1 %v2518_v7  ;;  %v2584_v21 = vadd.f32 %v2583_v39, %v2582_v11 }
 0x312   : > { %v2387_v22 = vpop.xlane.xlu1 %2386  ;;  %v2384_v27 = vpop.xlane.xlu0 %2383 }
 0x313   : > { %v2601_v19 = vsel %vm1134_vm0, %v2387_v22, 0.0  ;;  %v2600_v42 = vsel %vm1134_vm0, %v2384_v27, 0.0 }
 0x314   : > { %v2602_v26 = vadd.f32 %v2601_v19, %v2600_v42 }
 0x316   : > { %v2313_v55 = vpop.xlane.xlu1 %2312  ;;  %v2310_v58 = vpop.xlane.xlu0 %2309 }
 0x317   : > { %v2585_v49 = vsel %vm1134_vm0, %v2310_v58, 0.0  ;;  %v2587_v40 = vsel %vm1134_vm0, %v2313_v55, 0.0 }
 0x318   : > { %v2586_v45 = vadd.f32 %v2585_v49, %v2584_v21 }
 0x31a   : > { %v2588_v60 = vadd.f32 %v2587_v40, %v2586_v45  ;;  %v2393_v48 = vpop.xlane.xlu1 %2392  ;;  %v2390_v6 = vpop.xlane.xlu0 %2389 }
 0x31b   : > { %v2603_v2 = vsel %vm1134_vm0, %v2390_v6, 0.0  ;;  %v2605_v30 = vsel %vm1134_vm0, %v2393_v48, 0.0 }
 0x31c   : > { %v2604_v15 = vadd.f32 %v2603_v2, %v2602_v26  ;;  %2589 = vadd.xlane.f32.xlu0 %v2588_v60 }
 0x31e   : > { %v2606_v52 = vadd.f32 %v2605_v30, %v2604_v15  ;;  %v2319_v33 = vpop.xlane.xlu1 %2318  ;;  %v2316_v63 = vpop.xlane.xlu0 %2315 }
 0x31f   : > { %v2671_v17 = vsel %vm1134_vm0, %v2319_v33, 0.0  ;;  %v2670_v56 = vsel %vm1134_vm0, %v2316_v63, 0.0 }
 0x320   : > { %2607 = vadd.xlane.f32.xlu1 %v2606_v52  ;;  %v2672_v8 = vadd.f32 %v2671_v17, %v2670_v56 }
 0x322   : > { %v2399_v35 = vpop.xlane.xlu1 %2398  ;;  %v2396_v20 = vpop.xlane.xlu0 %2395 }
 0x323   : > { %v2689_v37 = vsel %vm1134_vm0, %v2399_v35, 0.0  ;;  %v2688_v7 = vsel %vm1134_vm0, %v2396_v20, 0.0 }
 0x324   : > { %v2690_v27 = vadd.f32 %v2689_v37, %v2688_v7 }
 0x326   : > { %v2322_v23 = vpop.xlane.xlu1 %2321  ;;  %v2325_v47 = vpop.xlane.xlu0 %2324 }
 0x327   : > { %v2673_v9 = vsel %vm1134_vm0, %v2322_v23, 0.0  ;;  %v2675_v22 = vsel %vm1134_vm0, %v2325_v47, 0.0 }
 0x328   : > { %v2674_v59 = vadd.f32 %v2673_v9, %v2672_v8 }
 0x32a   : > { %v2676_v39 = vadd.f32 %v2675_v22, %v2674_v59  ;;  %v2402_v11 = vpop.xlane.xlu1 %2401  ;;  %v2405_v21 = vpop.xlane.xlu0 %2404 }
 0x32b   : > { %v2691_v55 = vsel %vm1134_vm0, %v2402_v11, 0.0  ;;  %v2693_v19 = vsel %vm1134_vm0, %v2405_v21, 0.0  ;;  %v3417_v21 = vpop.f32.mrf.mxu1 }
 0x32c   : > { %v2692_v58 = vadd.f32 %v2691_v55, %v2690_v27  ;;  %2677 = vadd.xlane.f32.xlu0 %v2676_v39  ;;  %v3530_v55 = vpop.f32.mrf.mxu0 }
 0x32e   : > { %v2694_v42 = vadd.f32 %v2693_v19, %v2692_v58  ;;  %v3554_v49 = vpop.xlane.xlu1 %3553  ;;  %v3551_v45 = vpop.xlane.xlu0 %3550 }
 0x32f   : > { %v3678_v60 = vsel %vm1134_vm0, %v3554_v49, 0.0  ;;  %v3677_v48 = vsel %vm1134_vm0, %v3551_v45, 0.0 }
 0x330   : > { %2695 = vadd.xlane.f32.xlu1 %v2694_v42  ;;  %v3679_v63 = vadd.f32 %v3678_v60, %v3677_v48  ;;  %v3419_v48 = vpop.f32.mrf.mxu1 }
 0x332   : > { %v3634_v40 = vpop.xlane.xlu1 %3633  ;;  %v3631_v26 = vpop.xlane.xlu0 %3630 }
 0x333   : > { %v3696_v6 = vsel %vm1134_vm0, %v3634_v40, 0.0  ;;  %v3695_v2 = vsel %vm1134_vm0, %v3631_v26, 0.0 }
 0x334   : > { %v3697_v35 = vadd.f32 %v3696_v6, %v3695_v2  ;;  %v3532_v6 = vpop.f32.mrf.mxu0 }
 0x336   : > { %v3637_v15 = vpop.xlane.xlu1 %3636  ;;  %v3557_v30 = vpop.xlane.xlu0 %3556 }
 0x337   : > { %v3698_v52 = vsel %vm1134_vm0, %v3637_v15, 0.0  ;;  %v3680_v33 = vsel %vm1134_vm0, %v3557_v30, 0.0 }
 0x338   : > { %v3699_v20 = vadd.f32 %v3698_v52, %v3697_v35  ;;  %v3681_v17 = vadd.f32 %v3680_v33, %v3679_v63 }
 0x33a   : > { %v3560_v56 = vpop.xlane.xlu1 %3559  ;;  %v3640_v8 = vpop.xlane.xlu0 %3639 }
 0x33b   : > { %v3682_v23 = vsel %vm1134_vm0, %v3560_v56, 0.0  ;;  %v3700_v47 = vsel %vm1134_vm0, %v3640_v8, 0.0  ;;  %v3534_v56 = vpop.f32.mrf.mxu0 }
 0x33c   : > { %v3683_v37 = vadd.f32 %v3682_v23, %v3681_v17  ;;  %v3701_v7 = vadd.f32 %v3700_v47, %v3699_v20  ;;  %v3421_v17 = vpop.f32.mrf.mxu1 }
 0x33e   : > { %3684 = vadd.xlane.f32.xlu0 %v3683_v37  ;;  %3702 = vadd.xlane.f32.xlu1 %v3701_v7  ;;  %v3563_v9 = vpop.xlane.xlu0 %3562  ;;  %v3566_v59 = vpop.xlane.xlu1 %3565 }
 0x33f   : > { %v3766_v39 = vsel %vm1134_vm0, %v3566_v59, 0.0  ;;  %v3765_v11 = vsel %vm1134_vm0, %v3563_v9, 0.0  ;;  %v3423_v47 = vpop.f32.mrf.mxu1  ;;  %v3536_v37 = vpop.f32.mrf.mxu0 }
 0x340   : > { %v3767_v45 = vadd.f32 %v3766_v39, %v3765_v11 }
 0x341   : > { %v3540_v39 = vpop.f32.mrf.mxu0 }
 0x342   : > { %v3643_v22 = vpop.xlane.xlu0 %3642  ;;  %v3646_v27 = vpop.xlane.xlu1 %3645 }
 0x343   : > { %v3784_v58 = vsel %vm1134_vm0, %v3646_v27, 0.0  ;;  %v3783_v19 = vsel %vm1134_vm0, %v3643_v22, 0.0  ;;  %v3427_v27 = vpop.f32.mrf.mxu1 }
 0x344   : > { %v3785_v60 = vadd.f32 %v3784_v58, %v3783_v19 }
 0x346   : > { %v3649_v42 = vpop.xlane.xlu0 %3648  ;;  %v3569_v49 = vpop.xlane.xlu1 %3568 }
 0x347   : > { %v3768_v40 = vsel %vm1134_vm0, %v3569_v49, 0.0  ;;  %v3786_v26 = vsel %vm1134_vm0, %v3649_v42, 0.0 }
 0x348   : > { %v3769_v2 = vadd.f32 %v3768_v40, %v3767_v45  ;;  %v3787_v30 = vadd.f32 %v3786_v26, %v3785_v60  ;;  %v7250_v40 = vadd.f32 %v3530_v55, %v3417_v21  ;;  %v7252_v26 = vadd.f32 %v3532_v6, %v3419_v48 }
 0x349   : > { %v7261_v55 = vadd.f32 %v3540_v39, %v3427_v27 }
 0x34a   : > { %v3572_v15 = vpop.xlane.xlu0 %3571  ;;  %v3652_v52 = vpop.xlane.xlu1 %3651  ;;  %9047 = vst [vmem:[#allocation61_spill] sm:$0xff] %v7250_v40  ;;  %9048 = vst [vmem:[#allocation62_spill] sm:$0xff] %v7252_v26  ;;  %v3585_v6 = vadd.f32 %v7252_v26, %v7250_v40 }
 0x34b   : > { %v3770_v33 = vsel %vm1134_vm0, %v3572_v15, 0.0  ;;  %v3788_v63 = vsel %vm1134_vm0, %v3652_v52, 0.0  ;;  %v3429_v15 = vpop.f32.mrf.mxu1  ;;  %9051 = vst [vmem:[#allocation65_spill] sm:$0xff] %v7261_v55 }
 0x34c   : > { %v3771_v35 = vadd.f32 %v3770_v33, %v3769_v2  ;;  %v3789_v20 = vadd.f32 %v3788_v63, %v3787_v30  ;;  %v3542_v30 = vpop.f32.mrf.mxu0 }
 0x34d   : > { %v7263_v48 = vadd.f32 %v3542_v30, %v3429_v15  ;;  %v3625_v15 = vmul.f32 %v7261_v55, %v7261_v55 }
 0x34e   : > { %3772 = vadd.xlane.f32.xlu0 %v3771_v35  ;;  %v3575_v8 = vpop.xlane.xlu0 %3574  ;;  %v3655_v23 = vpop.xlane.xlu1 %3654  ;;  %3790 = vadd.xlane.f32.xlu1 %v3789_v20 }
 0x34f   : > { %v3853_v22 = vsel %vm1134_vm0, %v3575_v8, 0.0  ;;  %v3871_v60 = vsel %vm1134_vm0, %v3655_v23, 0.0  ;;  %v7257_v8 = vadd.f32 %v3534_v56, %v3421_v17  ;;  %9052 = vst [vmem:[#allocation66_spill] sm:$0xff] %v7263_v48  ;;  %v3431_v23 = vpop.f32.mrf.mxu1  ;;  %v3621_v17 = vmul.f32 %v7250_v40, %v7250_v40 }
 0x350   : > { %v3622_v56 = vmul.f32 %v7252_v26, %v7252_v26  ;;  %v3626_v30 = vmul.f32 %v7263_v48, %v7263_v48 }
 0x351   : > { %9049 = vst [vmem:[#allocation63_spill] sm:$0xff] %v7257_v8 }
 0x352   : > { %v3658_v7 = vpop.xlane.xlu0 %3657  ;;  %v3578_v9 = vpop.xlane.xlu1 %3577 }
 0x353   : > { %v3854_v59 = vsel %vm1134_vm0, %v3578_v9, 0.0  ;;  %v3872_v19 = vsel %vm1134_vm0, %v3658_v7, 0.0  ;;  %v7259_v7 = vadd.f32 %v3536_v37, %v3423_v47  ;;  %v3544_v9 = vpop.f32.mrf.mxu0  ;;  %v3623_v47 = vmul.f32 %v7257_v8, %v7257_v8 }
 0x354   : > { %v3855_v11 = vadd.f32 %v3854_v59, %v3853_v22  ;;  %v3873_v52 = vadd.f32 %v3872_v19, %v3871_v60 }
 0x355   : > { %9050 = vst [vmem:[#allocation64_spill] sm:$0xff] %v7259_v7  ;;  %v3624_v39 = vmul.f32 %v7259_v7, %v7259_v7  ;;  %v3588_v19 = vadd.f32 %v7259_v7, %v7257_v8  ;;  %v3671_v8 = vadd.f32 %v3626_v30, %v3625_v15 }
 0x356   : > { %v3581_v58 = vpop.xlane.xlu0 %3580 }
 0x357   : > { %v3584_v42 = vpop.xlane.xlu1 %3583  ;;  %v3856_v49 = vsel %vm1134_vm0, %v3581_v58, 0.0 }
 0x358   : > { %v3857_v45 = vadd.f32 %v3856_v49, %v3855_v11  ;;  %v3858_v2 = vsel %vm1134_vm0, %v3584_v42, 0.0  ;;  %v3591_v42 = vadd.f32 %v7263_v48, %v7261_v55  ;;  %v3433_v49 = vpop.f32.mrf.mxu1 }
 0x35a   : > { %v3859_v33 = vadd.f32 %v3858_v2, %v3857_v45  ;;  %v3661_v63 = vpop.xlane.xlu0 %3660  ;;  %v3546_v45 = vpop.f32.mrf.mxu0 }
 0x35b   : > { %v3664_v35 = vpop.xlane.xlu1 %3663  ;;  %v3874_v20 = vsel %vm1134_vm0, %v3661_v63, 0.0 }
 0x35c   : > { %v3875_v21 = vadd.f32 %v3874_v20, %v3873_v52  ;;  %3860 = vadd.xlane.f32.xlu0 %v3859_v33  ;;  %v3876_v59 = vsel %vm1134_vm0, %v3664_v35, 0.0  ;;  %v7284_v20 = vadd.f32 %v3544_v9, %v3431_v23 }
 0x35e   : > { %v3877_v22 = vadd.f32 %v3876_v59, %v3875_v21  ;;  %v1143_v11 = vpop.xlane.xlu0 %1142  ;;  %9053 = vst [vmem:[#allocation67_spill] sm:$0xff] %v7284_v20  ;;  %v7286_v21 = vadd.f32 %v3546_v45, %v3433_v49  ;;  %v3627_v48 = vmul.f32 %v7284_v20, %v7284_v20 }
 0x35f   : > { %v1161_v37 = vpop.xlane.xlu1 %1160  ;;  %v1144_v27 = vrot.slane %v1143_v11, 4 }
 0x360   : > { %v1162_v58 = vrot.slane %v1161_v37, 4  ;;  %3878 = vadd.xlane.f32.xlu1 %v3877_v22  ;;  %3586 = vadd.xlane.f32.xlu0 %v3585_v6  ;;  %9054 = vst [vmem:[#allocation68_spill] sm:$0xff] %v7286_v21  ;;  %v3665_v22 = vadd.f32 %v3622_v56, %v3621_v17  ;;  %v3628_v9 = vmul.f32 %v7286_v21, %v7286_v21 }
 0x361   : > { %v1145_v60 = vadd.f32 %v1144_v27, %v1143_v11  ;;  %v3668_v11 = vadd.f32 %v3624_v39, %v3623_v47  ;;  %v3594_v56 = vadd.f32 %v7286_v21, %v7284_v20 }
 0x362   : > { %v1163_v2 = vadd.f32 %v1162_v58, %v1161_v37  ;;  %v1231_v52 = vpop.xlane.xlu0 %1230 }
 0x363   : > { %v1146_v33 = vrot.slane %v1145_v60, 2  ;;  %v1249_v63 = vpop.xlane.xlu1 %1248  ;;  %v1232_v35 = vrot.slane %v1231_v52, 4 }
 0x364   : > { %v1164_v6 = vrot.slane %v1163_v2, 2  ;;  %v1250_v59 = vrot.slane %v1249_v63, 4  ;;  %3589 = vadd.xlane.f32.xlu1 %v3588_v19  ;;  %3592 = vadd.xlane.f32.xlu0 %v3591_v42 }
 0x365   : > { %v1233_v37 = vadd.f32 %v1232_v35, %v1231_v52  ;;  %v1147_v27 = vadd.f32 %v1146_v33, %v1145_v60 }
 0x366   : > { %v1251_v58 = vadd.f32 %v1250_v59, %v1249_v63  ;;  %v1319_v55 = vpop.xlane.xlu0 %1318  ;;  %v1165_v7 = vadd.f32 %v1164_v6, %v1163_v2  ;;  %v3674_v6 = vadd.f32 %v3628_v9, %v3627_v48 }
 0x367   : > { %v1234_v26 = vrot.slane %v1233_v37, 2  ;;  %v1320_v23 = vrot.slane %v1319_v55, 4  ;;  %v1337_v49 = vpop.xlane.xlu1 %1336  ;;  %v1148_v45 = vrot.slane %v1147_v27, 1 }
 0x368   : > { %v1252_v19 = vrot.slane %v1251_v58, 2  ;;  %v1338_v42 = vrot.slane %v1337_v49, 4  ;;  %3666 = vadd.xlane.f32.xlu1 %v3665_v22  ;;  %3669 = vadd.xlane.f32.xlu0 %v3668_v11  ;;  %v1166_v17 = vrot.slane %v1165_v7, 1 }
 0x369   : > { %v1321_v47 = vadd.f32 %v1320_v23, %v1319_v55  ;;  %v1149_v39 = vadd.f32 %v1148_v45, %v1147_v27  ;;  %v1235_v60 = vadd.f32 %v1234_v26, %v1233_v37 }
 0x36a   : > { %v1339_v2 = vadd.f32 %v1338_v42, %v1337_v49  ;;  %v1167_v15 = vadd.f32 %v1166_v17, %v1165_v7  ;;  %v1253_v30 = vadd.f32 %v1252_v19, %v1251_v58 }
 0x36b   : > { %v1322_v52 = vrot.slane %v1321_v47, 2  ;;  %5124 = vpush %v1149_v39  ;;  %v1236_v33 = vrot.slane %v1235_v60, 1 }
 0x36c   : > { %v1340_v63 = vrot.slane %v1339_v2, 2  ;;  %5126 = vpush %v1167_v15  ;;  %3595 = vadd.xlane.f32.xlu1 %v3594_v56  ;;  %3672 = vadd.xlane.f32.xlu0 %v3671_v8  ;;  %v1254_v35 = vrot.slane %v1253_v30, 1 }
 0x36d   : > { %v1237_v59 = vadd.f32 %v1236_v33, %v1235_v60  ;;  %v1323_v22 = vadd.f32 %v1322_v52, %v1321_v47 }
 0x36e   : > { %v1255_v11 = vadd.f32 %v1254_v35, %v1253_v30  ;;  %v1341_v40 = vadd.f32 %v1340_v63, %v1339_v2 }
 0x36f   : > { %5128 = vpush %v1237_v59  ;;  %v1324_v55 = vrot.slane %v1323_v22, 1 }
 0x370   : > { %5130 = vpush %v1255_v11  ;;  %3675 = vadd.xlane.f32.xlu1 %v3674_v6  ;;  %v1342_v26 = vrot.slane %v1341_v40, 1 }
 0x371   : > { %v1325_v7 = vadd.f32 %v1324_v55, %v1323_v22 }
 0x372   : > { %v1343_v37 = vadd.f32 %v1342_v26, %v1341_v40 }
 0x373   : > { %5132 = vpush %v1325_v7  ;;  %v1407_v27 = vpop.xlane.xlu0 %1406 }
 0x374   : > { %v1408_v58 = vrot.slane %v1407_v27, 4  ;;  %5134 = vpush %v1343_v37 }
 0x376   : > { %v1409_v23 = vadd.f32 %v1408_v58, %v1407_v27 }
 0x377   : > { %v1425_v49 = vpop.xlane.xlu1 %1424 }
 0x378   : > { %v1410_v8 = vrot.slane %v1409_v23, 2  ;;  %v1426_v45 = vrot.slane %v1425_v49, 4 }
 0x37a   : > { %v1427_v48 = vadd.f32 %v1426_v45, %v1425_v49  ;;  %v1411_v9 = vadd.f32 %v1410_v8, %v1409_v23 }
 0x37c   : > { %v1428_v19 = vrot.slane %v1427_v48, 2  ;;  %v1412_v42 = vrot.slane %v1411_v9, 1 }
 0x37e   : > { %v1413_v17 = vadd.f32 %v1412_v42, %v1411_v9  ;;  %v1429_v56 = vadd.f32 %v1428_v19, %v1427_v48 }
 0x380   : > { %5136 = vpush %v1413_v17  ;;  %v1430_v47 = vrot.slane %v1429_v56, 1 }
 0x382   : > { %v1431_v39 = vadd.f32 %v1430_v47, %v1429_v56 }
 0x383   : > { %v2414_v60 = vpop.xlane.xlu0 %2413 }
 0x384   : > { %v2415_v2 = vrot.slane %v2414_v60, 4  ;;  %5138 = vpush %v1431_v39 }
 0x386   : > { %v2416_v40 = vadd.f32 %v2415_v2, %v2414_v60 }
 0x387   : > { %v2432_v15 = vpop.xlane.xlu1 %2431 }
 0x388   : > { %v2417_v30 = vrot.slane %v2416_v40, 2  ;;  %v2433_v52 = vrot.slane %v2432_v15, 4 }
 0x38a   : > { %v2434_v33 = vadd.f32 %v2433_v52, %v2432_v15  ;;  %v2418_v63 = vadd.f32 %v2417_v30, %v2416_v40 }
 0x38c   : > { %v2435_v35 = vrot.slane %v2434_v33, 2  ;;  %v2419_v6 = vrot.slane %v2418_v63, 1 }
 0x38e   : > { %v2420_v59 = vadd.f32 %v2419_v6, %v2418_v63  ;;  %v2436_v22 = vadd.f32 %v2435_v35, %v2434_v33 }
 0x390   : > { %5140 = vpush %v2420_v59  ;;  %v2437_v11 = vrot.slane %v2436_v22, 1 }
 0x392   : > { %v2438_v55 = vadd.f32 %v2437_v11, %v2436_v22 }
 0x394   : > { %5142 = vpush %v2438_v55 }
 0x395   : > { %v2502_v26 = vpop.xlane.xlu0 %2501 }
 0x396   : > { %v2503_v7 = vrot.slane %v2502_v26, 4 }
 0x398   : > { %v2504_v37 = vadd.f32 %v2503_v7, %v2502_v26 }
 0x399   : > { %v2520_v27 = vpop.xlane.xlu1 %2519 }
 0x39a   : > { %v2505_v58 = vrot.slane %v2504_v37, 2  ;;  %v2521_v23 = vrot.slane %v2520_v27, 4 }
 0x39c   : > { %v2522_v49 = vadd.f32 %v2521_v23, %v2520_v27  ;;  %s5125_s21 = spop %5124  ;;  %v2506_v8 = vadd.f32 %v2505_v58, %v2504_v37 }
 0x39d   : > { %v1151_v45 = vstv %s5125_s21  ;;  %s5127_s26 = spop %5126 }
 0x39e   : > { %v2523_v48 = vrot.slane %v2522_v49, 2  ;;  %v7294_v9 = vmul.f32 0.00012207031, %v1151_v45  ;;  %v1169_v19 = vstv %s5127_s26  ;;  %v2507_v42 = vrot.slane %v2506_v8, 1 }
 0x39f   : > { %v1170_v39 = vmul.f32 0.00012207031, %v1169_v19 }
 0x3a0   : > { %v1171_v17 = vmul.f32 %v7294_v9, %v7294_v9  ;;  %s5129_s22 = spop %5128  ;;  %v2508_v56 = vadd.f32 %v2507_v42, %v2506_v8  ;;  %v2524_v47 = vadd.f32 %v2523_v48, %v2522_v49 }
 0x3a1   : > { %v1239_v60 = vstv %s5129_s22  ;;  %s5131_s23 = spop %5130 }
 0x3a2   : > { %v7298_v2 = vmul.f32 0.00012207031, %v1239_v60  ;;  %v1257_v40 = vstv %s5131_s23  ;;  %5144 = vpush %v2508_v56  ;;  %v2525_v15 = vrot.slane %v2524_v47, 1  ;;  %v1172_v30 = vsub.f32 %v1170_v39, %v1171_v17 }
 0x3a3   : > { %v1258_v52 = vmul.f32 0.00012207031, %v1257_v40  ;;  %v5563_v39 = vmov 1.0  }
 0x3a4   : > { %9055 = vst [vmem:[#allocation69_spill] sm:$0xff] %v7298_v2  ;;  %v1259_v33 = vmul.f32 %v7298_v2, %v7298_v2  ;;  %s5133_s27 = spop %5132  ;;  %v2526_v63 = vadd.f32 %v2525_v15, %v2524_v47  ;;  %v1173_v55 = vadd.f32 1e-05, %v1172_v30  ;;  %5110 = vmatprep.subr.msk.mxu1 %vm887_vm13, %v5563_v39  ;;  %v1198_v30 = vsub.f32 %v6723_v18, %v7294_v9 }
 0x3a5   : > { %v1327_v35 = vstv %s5133_s27  ;;  %s5135_s28 = spop %5134  ;;  %v2590_v6 = vpop.xlane.xlu0 %2589  ;;  %5111 = vmatpush1.msk.msra.mxu1 %vm887_vm13, %v5563_v39 }
 0x3a6   : > { %v1260_v59 = vsub.f32 %v1258_v52, %v1259_v33  ;;  %v7302_v22 = vmul.f32 0.00012207031, %v1327_v35  ;;  %v1345_v11 = vstv %s5135_s28  ;;  %5146 = vpush %v2526_v63  ;;  %v2591_v7 = vrot.slane %v2590_v6, 4 }
 0x3a7   : > { %v1346_v26 = vmul.f32 0.00012207031, %v1345_v11  ;;  %5304 = vrsqrt.f32 %v1173_v55  ;;  %v1197_v63 = vsub.f32 %v6717_v36, %v7294_v9  ;;  %v1196_v35 = vsub.f32 %v6715_v4, %v7294_v9  ;;  %v1278_v11 = vld [vmem:[%s8866_s8 + $0x178] sm:$0xff] }
 0x3a8   : > { %v1347_v37 = vmul.f32 %v7302_v22, %v7302_v22  ;;  %v2592_v27 = vadd.f32 %v2591_v7, %v2590_v6  ;;  %v1261_v23 = vadd.f32 1e-05, %v1260_v59  ;;  %v1195_v59 = vsub.f32 %v6710_v29, %v7294_v9 }
 0x3a9   : > { %v2608_v58 = vpop.xlane.xlu1 %2607  ;;  %v1286_v36 = vsub.f32 %v6759_v34, %v7298_v2  ;;  %v1285_v4 = vsub.f32 %v6757_v61, %v7298_v2  ;;  %v1283_v7 = vsub.f32 %v6751_v41, %v7298_v2  ;;  %v1267_v41 = vld [vmem:[%s8866_s8 + $0x60] sm:$0xff] }
 0x3aa   : > { %v2609_v49 = vrot.slane %v2608_v58, 4  ;;  %v1348_v8 = vsub.f32 %v1346_v26, %v1347_v37  ;;  %v2593_v45 = vrot.slane %v2592_v27, 2  ;;  %5306 = vrsqrt.f32 %v1261_v23 }
 0x3ab   : > { %v1284_v26 = vsub.f32 %v6755_v16, %v7298_v2  ;;  %v1374_v16 = vsub.f32 %v6799_v5, %v7302_v22 }
 0x3ac   : > { %v2610_v48 = vadd.f32 %v2609_v49, %v2608_v58  ;;  %v2594_v19 = vadd.f32 %v2593_v45, %v2592_v27  ;;  %v1349_v17 = vadd.f32 1e-05, %v1348_v8  ;;  %v1373_v8 = vsub.f32 %v6797_v25, %v7302_v22  ;;  %v1356_v25 = vld [vmem:[%s8866_s8 + $0xa8] sm:$0xff] }
 0x3ae   : > { %v2611_v42 = vrot.slane %v2610_v48, 2  ;;  %v2595_v56 = vrot.slane %v2594_v19, 1  ;;  %5308 = vrsqrt.f32 %v1349_v17 }
 0x3b0   : > { %v2612_v47 = vadd.f32 %v2611_v42, %v2610_v48  ;;  %v2596_v60 = vadd.f32 %v2595_v56, %v2594_v19  ;;  %v1372_v19 = vsub.f32 %v6795_v14, %v7302_v22 }
 0x3b1   : > { %s5137_s29 = spop %5136 }
 0x3b2   : > { %v1415_v40 = vstv %s5137_s29  ;;  %v2613_v15 = vrot.slane %v2612_v47, 1  ;;  %5148 = vpush %v2596_v60  ;;  %s8486_s29 = sshll.u32 %s9254_s18, 6 }
 0x3b3   : > { %v7310_v52 = vmul.f32 0.00012207031, %v1415_v40  ;;  %s8517_s23 = scalar_lea.vmem %s8868_s10, %s8486_s29  ;;  %s8634_s24 = scalar_lea.vmem %s8869_s11, %s8486_s29 }
 0x3b4   : > { %v2614_v33 = vadd.f32 %v2613_v15, %v2612_v47  ;;  %v7336_v49 = vpop.eup %5304 }
 0x3b5   : > { %s5139_s30 = spop %5138  ;;  %v2678_v6 = vpop.xlane.xlu0 %2677  ;;  %v1435_v61 = vmul.f32 %v7310_v52, %v7310_v52  ;;  %v1206_v15 = vmul.f32 %v7336_v49, %v1198_v30  ;;  %v1205_v14 = vmul.f32 %v7336_v49, %v1197_v63  ;;  %v1180_v30 = vld [vmem:[%s8866_s8 + $0x28] sm:$0xff] }
 0x3b6   : > { %5150 = vpush %v2614_v33  ;;  %v1433_v37 = vstv %s5139_s30  ;;  %v2679_v27 = vrot.slane %v2678_v6, 4 }
 0x3b7   : > { %v1434_v34 = vmul.f32 0.00012207031, %v1433_v37  ;;  %v7354_v60 = vpop.eup %5306 }
 0x3b8   : > { %v2680_v45 = vadd.f32 %v2679_v27, %v2678_v6  ;;  %9056 = vst [vmem:[#allocation70_spill] sm:$0xff] %v7354_v60  ;;  %v1182_v27 = vld [vmem:[%s8866_s8 + $0x38] sm:$0xff]  ;;  %v1294_v55 = vmul.f32 %v7354_v60, %v1286_v36  ;;  %v9058_v36 = vld [vmem:[#allocation4_spill] sm:$0xff]  ;;  %v1292_v17 = vmul.f32 %v7354_v60, %v1284_v26 }
 0x3b9   : > { %v2696_v48 = vpop.xlane.xlu1 %2695  ;;  %v1436_v56 = vsub.f32 %v1434_v34, %v1435_v61  ;;  %v1181_v34 = vld [vmem:[%s8866_s8 + $0x30] sm:$0xff]  ;;  %v1214_v39 = vmul.f32 %v1206_v15, %v1182_v27  ;;  %v1190_v15 = vld [vmem:[%s8866_s8 + $0x138] sm:$0xff]  ;;  %v9057_v27 = vld [vmem:[#allocation3_spill] sm:$0xff] }
 0x3ba   : > { %v2697_v47 = vrot.slane %v2696_v48, 4  ;;  %v2681_v40 = vrot.slane %v2680_v45, 2 }
 0x3bb   : > { %v1437_v6 = vadd.f32 1e-05, %v1436_v56  ;;  %v7407_v58 = vadd.f32 %v1214_v39, %v1190_v15 }
 0x3bc   : > { %v2698_v37 = vadd.f32 %v2697_v47, %v2696_v48  ;;  %v2682_v56 = vadd.f32 %v2681_v40, %v2680_v45  ;;  %v1204_v47 = vmul.f32 %v7336_v49, %v1196_v35  ;;  %v1270_v48 = vld [vmem:[%s8866_s8 + $0x78] sm:$0xff]  ;;  %v1213_v45 = vmul.f32 %v1205_v14, %v1181_v34  ;;  %v7385_v40 = vpop.eup %5308  ;;  %v1269_v14 = vld [vmem:[%s8866_s8 + $0x70] sm:$0xff] }
 0x3bd   : > { %5310 = vrsqrt.f32 %v1437_v6  ;;  %v1293_v35 = vmul.f32 %v7354_v60, %v1285_v4  ;;  %v1189_v4 = vld [vmem:[%s8866_s8 + $0x130] sm:$0xff]  ;;  %v1302_v18 = vmul.f32 %v1294_v55, %v1270_v48  ;;  %9059 = vst [vmem:[#allocation3_spill] sm:$0xff] %v7407_v58  ;;  %v1382_v34 = vmul.f32 %v7385_v40, %v1374_v16  ;;  %v1268_v55 = vld [vmem:[%s8866_s8 + $0x68] sm:$0xff] }
 0x3be   : > { %v2699_v5 = vrot.slane %v2698_v37, 2  ;;  %v2683_v61 = vrot.slane %v2682_v56, 1  ;;  %v7413_v42 = vadd.f32 %v1213_v45, %v1189_v4  ;;  %v1381_v16 = vmul.f32 %v7385_v40, %v1373_v8 }
 0x3bf   : > { %v1301_v6 = vmul.f32 %v1293_v35, %v1269_v14  ;;  %v1380_v48 = vmul.f32 %v7385_v40, %v1372_v19  ;;  %v1203_v8 = vmul.f32 %v7336_v49, %v1195_v59  ;;  %v1291_v19 = vmul.f32 %v7354_v60, %v1283_v7 }
 0x3c0   : > { %v2700_v63 = vadd.f32 %v2699_v5, %v2698_v37  ;;  %v2684_v5 = vadd.f32 %v2683_v61, %v2682_v56  ;;  %v1212_v37 = vmul.f32 %v1204_v47, %v1180_v30  ;;  %9060 = vst [vmem:[#allocation4_spill] sm:$0xff] %v7413_v42  ;;  %v1188_v61 = vld [vmem:[%s8866_s8 + $0x128] sm:$0xff]  ;;  %v1277_v30 = vld [vmem:[%s8866_s8 + $0x170] sm:$0xff]  ;;  %v1179_v56 = vld [vmem:[%s8866_s8 + $0x20] sm:$0xff]  ;;  %v9062_v45 = vsub.f32 %v6698_v31, %v7294_v9 }
 0x3c1   : > { %s5141_s28 = spop %5140  ;;  %v7459_v29 = vadd.f32 %v1302_v18, %v1278_v11  ;;  %v1300_v4 = vmul.f32 %v1292_v17, %v1268_v55  ;;  %v1178_v31 = vld [vmem:[%s8866_s8 + $0x18] sm:$0xff]  ;;  %v7472_v11 = vadd.f32 %v1301_v6, %v1277_v30  ;;  %v9066_v18 = vsub.f32 %v6743_v1, %v7298_v2 }
 0x3c2   : > { %v2422_v33 = vstv %s5141_s28  ;;  %v2701_v23 = vrot.slane %v2700_v63, 1  ;;  %5152 = vpush %v2684_v5  ;;  %v1202_v35 = vmul.f32 %v7336_v49, %v9062_v45  ;;  %v7461_v59 = vadd.f32 %v1212_v37, %v1188_v61  ;;  %v1266_v6 = vld [vmem:[%s8866_s8 + $0x58] sm:$0xff] }
 0x3c3   : > { %v7421_v26 = vmul.f32 0.00012207031, %v2422_v33  ;;  %v1357_v33 = vld [vmem:[%s8866_s8 + $0xb0] sm:$0xff]  ;;  %9063 = vst [vmem:[#allocation71_spill] sm:$0xff] %v7459_v29  ;;  %9065 = vst [vmem:[#allocation73_spill] sm:$0xff] %v7472_v11  ;;  %v1290_v17 = vmul.f32 %v7354_v60, %v9066_v18  ;;  %v9067_v37 = vsub.f32 %v6779_v44, %v7302_v22  ;;  %v1388_v45 = vmul.f32 %v1380_v48, %v1356_v25  ;;  %v1354_v1 = vld [vmem:[%s8866_s8 + $0x98] sm:$0xff] }
 0x3c4   : > { %v2702_v39 = vadd.f32 %v2701_v23, %v2700_v63  ;;  %v1358_v23 = vld [vmem:[%s8866_s8 + $0xb8] sm:$0xff]  ;;  %v9061_v63 = vsub.f32 %v6789_v24, %v7302_v22  ;;  %9064 = vst [vmem:[#allocation72_spill] sm:$0xff] %v7461_v59  ;;  %v1355_v24 = vld [vmem:[%s8866_s8 + $0xa0] sm:$0xff]  ;;  %v1211_v30 = vmul.f32 %v1203_v8, %v1179_v56  ;;  %v1210_v44 = vmul.f32 %v1202_v35, %v1178_v31  ;;  %v1177_v56 = vld [vmem:[%s8866_s8 + $0x10] sm:$0xff] }
 0x3c5   : > { %s5143_s20 = spop %5142  ;;  %v1378_v61 = vmul.f32 %v7385_v40, %v9067_v37  ;;  %v2442_v55 = vmul.f32 %v7421_v26, %v7421_v26  ;;  %v1265_v8 = vld [vmem:[%s8866_s8 + $0x50] sm:$0xff]  ;;  %v9072_v31 = vsub.f32 %v6815_v51, %v7310_v52  ;;  %v1186_v51 = vld [vmem:[%s8866_s8 + $0x118] sm:$0xff] }
 0x3c6   : > { %v1379_v47 = vmul.f32 %v7385_v40, %v9061_v63  ;;  %v2440_v15 = vstv %s5143_s20  ;;  %5154 = vpush %v2702_v39  ;;  %v1390_v39 = vmul.f32 %v1382_v34, %v1358_v23  ;;  %v1389_v63 = vmul.f32 %v1381_v16, %v1357_v33  ;;  %v1187_v23 = vld [vmem:[%s8866_s8 + $0x120] sm:$0xff] }
 0x3c7   : > { %v2441_v7 = vmul.f32 0.00012207031, %v2440_v15  ;;  %v3703_v14 = vpop.xlane.xlu1 %3702  ;;  %v3685_v5 = vpop.xlane.xlu0 %3684  ;;  %v1299_v15 = vmul.f32 %v1291_v19, %v1267_v41  ;;  %v9068_v34 = vsub.f32 %v6693_v10, %v7294_v9  ;;  %v1298_v33 = vmul.f32 %v1290_v17, %v1266_v6 }
 0x3c8   : > { %v1387_v18 = vmul.f32 %v1379_v47, %v1355_v24  ;;  %v3704_v37 = vrot.slane %v3703_v14, 4  ;;  %v3686_v20 = vrot.slane %v3685_v5, 4  ;;  %v1386_v25 = vmul.f32 %v1378_v61, %v1354_v1 }
 0x3c9   : > { %v2443_v21 = vsub.f32 %v2441_v7, %v2442_v55  ;;  %v1201_v16 = vmul.f32 %v7336_v49, %v9068_v34  ;;  %v9069_v10 = vsub.f32 %v6737_v38, %v7298_v2  ;;  %v9070_v47 = vsub.f32 %v6777_v43, %v7302_v22  ;;  %v1366_v43 = vld [vmem:[%s8866_s8 + $0x1b8] sm:$0xff] }
 0x3ca   : > { %v5311_v48 = vpop.eup %5310  ;;  %v9071_v41 = vsub.f32 %v6809_v57, %v7310_v52  ;;  %v9073_v17 = vsub.f32 %v6817_v28, %v7310_v52  ;;  %v9074_v38 = vsub.f32 %v6819_v62, %v7310_v52  ;;  %v1276_v57 = vld [vmem:[%s8866_s8 + $0x168] sm:$0xff]  ;;  %v1353_v28 = vld [vmem:[%s8866_s8 + $0x90] sm:$0xff]  ;;  %v9075_v62 = vsub.f32 %v6829_v50, %v7310_v52 }
 0x3cb   : > { %v1289_v19 = vmul.f32 %v7354_v60, %v9069_v10  ;;  %v1377_v35 = vmul.f32 %v7385_v40, %v9070_v47  ;;  %v1464_v7 = vmul.f32 %v5311_v48, %v9072_v31  ;;  %v9076_v1 = vsub.f32 %v6835_v13, %v7310_v52  ;;  %v1364_v50 = vld [vmem:[%s8866_s8 + $0x1a8] sm:$0xff]  ;;  %v1275_v13 = vld [vmem:[%s8866_s8 + $0x160] sm:$0xff] }
 0x3cc   : > { %v1463_v24 = vmul.f32 %v5311_v48, %v9071_v41  ;;  %v1465_v61 = vmul.f32 %v5311_v48, %v9073_v17  ;;  %v1466_v55 = vmul.f32 %v5311_v48, %v9074_v38  ;;  %v1467_v6 = vmul.f32 %v5311_v48, %v9075_v62  ;;  %v1365_v17 = vld [vmem:[%s8866_s8 + $0x1b0] sm:$0xff] }
 0x3cd   : > { %v1468_v34 = vmul.f32 %v5311_v48, %v9076_v1  ;;  %v9077_v10 = vsub.f32 %v9057_v27, %v7310_v52  ;;  %v9078_v41 = vsub.f32 %v9058_v36, %v7310_v52  ;;  %v2444_v38 = vadd.f32 1e-05, %v2443_v21  ;;  %v1363_v52 = vld [vmem:[%s8866_s8 + $0x1a0] sm:$0xff]  ;;  %v1274_v36 = vld [vmem:[%s8866_s8 + $0x158] sm:$0xff] }
 0x3ce   : > { %v3705_v62 = vadd.f32 %v3704_v37, %v3703_v14  ;;  %v3687_v27 = vadd.f32 %v3686_v20, %v3685_v5  ;;  %v1209_v1 = vmul.f32 %v1201_v16, %v1177_v56  ;;  %v1185_v20 = vld [vmem:[%s8866_s8 + $0x110] sm:$0xff]  ;;  %v1297_v21 = vmul.f32 %v1289_v19, %v1265_v8 }
 0x3cf   : > { %v1469_v47 = vmul.f32 %v5311_v48, %v9077_v10  ;;  %v1470_v31 = vmul.f32 %v5311_v48, %v9078_v41  ;;  %v1362_v48 = vld [vmem:[%s8866_s8 + $0x198] sm:$0xff]  ;;  %v7565_v10 = vadd.f32 %v1390_v39, %v1366_v43  ;;  %v7567_v41 = vadd.f32 %v1300_v4, %v1276_v57  ;;  %v1273_v39 = vld [vmem:[%s8866_s8 + $0x150] sm:$0xff] }
 0x3d0   : > { %v1385_v14 = vmul.f32 %v1377_v35, %v1353_v28  ;;  %v7572_v5 = vadd.f32 %v1389_v63, %v1365_v17  ;;  %v7574_v37 = vadd.f32 %v1388_v45, %v1364_v50  ;;  %v7576_v3 = vadd.f32 %v1211_v30, %v1187_v23  ;;  %v1361_v4 = vld [vmem:[%s8866_s8 + $0x190] sm:$0xff]  ;;  %v1439_v30 = vld [vmem:[%s8866_s8 + $0xc0] sm:$0xff]  ;;  %v1444_v17 = vld [vmem:[%s8866_s8 + $0xe8] sm:$0xff] }
 0x3d1   : > { %9079 = vst [vmem:[#allocation74_spill] sm:$0xff] %v7565_v10  ;;  %9080 = vst [vmem:[#allocation75_spill] sm:$0xff] %v7567_v41  ;;  %v7578_v46 = vadd.f32 %v1299_v15, %v1275_v13  ;;  %v7586_v16 = vadd.f32 %v1387_v18, %v1363_v52  ;;  %v7588_v56 = vadd.f32 %v1210_v44, %v1186_v51  ;;  %v1440_v15 = vld [vmem:[%s8866_s8 + $0xc8] sm:$0xff]  ;;  %5312 = vrsqrt.f32 %v2444_v38  ;;  %v1441_v18 = vld [vmem:[%s8866_s8 + $0xd0] sm:$0xff] }
 0x3d2   : > { %9081 = vst [vmem:[#allocation76_spill] sm:$0xff] %v7572_v5  ;;  %9082 = vst [vmem:[#allocation77_spill] sm:$0xff] %v7574_v37  ;;  %v7590_v63 = vadd.f32 %v1298_v33, %v1274_v36  ;;  %v7592_v45 = vadd.f32 %v1386_v25, %v1362_v48  ;;  %v3706_v23 = vrot.slane %v3705_v62, 2  ;;  %v3688_v8 = vrot.slane %v3687_v27, 2  ;;  %v1442_v44 = vld [vmem:[%s8866_s8 + $0xd8] sm:$0xff]  ;;  %v1443_v33 = vld [vmem:[%s8866_s8 + $0xe0] sm:$0xff] }
 0x3d3   : > { %9083 = vst [vmem:[#allocation78_spill] sm:$0xff] %v7576_v3  ;;  %9084 = vst [vmem:[#allocation79_spill] sm:$0xff] %v7578_v46  ;;  %v7600_v19 = vadd.f32 %v1209_v1, %v1185_v20  ;;  %s5145_s30 = spop %5144  ;;  %v7611_v25 = vadd.f32 %v1297_v21, %v1273_v39  ;;  %v7613_v35 = vadd.f32 %v1385_v14, %v1361_v4  ;;  %v1445_v50 = vld [vmem:[%s8866_s8 + $0xf0] sm:$0xff]  ;;  %v1446_v13 = vld [vmem:[%s8866_s8 + $0xf8] sm:$0xff] }
 0x3d4   : > { %9085 = vst [vmem:[#allocation80_spill] sm:$0xff] %v7586_v16  ;;  %9086 = vst [vmem:[#allocation81_spill] sm:$0xff] %v7588_v56  ;;  %v9091_v43 = vsub.f32 %v6684_v32, %v7294_v9  ;;  %v9092_v51 = vsub.f32 %v6735_v53, %v7298_v2  ;;  %v2510_v32 = vstv %s5145_s30  ;;  %v3689_v38 = vadd.f32 %v3688_v8, %v3687_v27  ;;  %v1447_v39 = vld [vmem:[%s8866_s8 + $0x1c0] sm:$0xff]  ;;  %s461_s30 = scalar_lea.vmem %s8867_s9, %s8486_s29 }
 0x3d5   : > { %9087 = vst [vmem:[#allocation82_spill] sm:$0xff] %v7590_v63  ;;  %9088 = vst [vmem:[#allocation83_spill] sm:$0xff] %v7592_v45  ;;  %v3707_v52 = vadd.f32 %v3706_v23, %v3705_v62  ;;  %v9093_v53 = vsub.f32 %v6775_v54, %v7302_v22  ;;  %v1471_v48 = vmul.f32 %v1463_v24, %v1439_v30  ;;  %v7636_v20 = vmul.f32 0.00012207031, %v2510_v32  ;;  %v1448_v54 = vld [vmem:[%s8866_s8 + $0x1c8] sm:$0xff]  ;;  %v1449_v24 = vld [vmem:[%s8866_s8 + $0x1d0] sm:$0xff] }
 0x3d6   : > { %9089 = vst [vmem:[#allocation84_spill] sm:$0xff] %v7600_v19  ;;  %9090 = vst [vmem:[#allocation85_spill] sm:$0xff] %v7613_v35  ;;  %v1200_v57 = vmul.f32 %v7336_v49, %v9091_v43  ;;  %v1288_v28 = vmul.f32 %v7354_v60, %v9092_v51  ;;  %v1472_v1 = vmul.f32 %v1464_v7, %v1440_v15  ;;  %v3690_v4 = vrot.slane %v3689_v38, 1  ;;  %v1452_v15 = vld [vmem:[%s8866_s8 + $0x1e8] sm:$0xff] }
 0x3d7   : > { %v1376_v36 = vmul.f32 %v7385_v40, %v9093_v53  ;;  %9094 = vst [vmem:[#allocation86_spill] sm:$0xff] %v7636_v20  ;;  %v9095_v21 = vsub.f32 %v6681_v0, %v7294_v9  ;;  %v1473_v27 = vmul.f32 %v1465_v61, %v1441_v18  ;;  %v1474_v62 = vmul.f32 %v1466_v55, %v1442_v44  ;;  %v1450_v0 = vld [vmem:[%s8866_s8 + $0x1d8] sm:$0xff]  ;;  %s5147_s28 = spop %5146  ;;  %v3773_v61 = vpop.xlane.xlu0 %3772  ;;  %v1451_v55 = vld [vmem:[%s8866_s8 + $0x1e0] sm:$0xff]  ;;  %v3791_v44 = vpop.xlane.xlu1 %3790  ;;  %v1264_v53 = vld [vmem:[%s8866_s8 + $0x48] sm:$0xff] }
 0x3d8   : > { %v3708_v23 = vrot.slane %v3707_v52, 1  ;;  %v1475_v9 = vmul.f32 %v1467_v6, %v1443_v33  ;;  %v1477_v7 = vmul.f32 %v1469_v47, %v1445_v50  ;;  %v1478_v30 = vmul.f32 %v1470_v31, %v1446_v13  ;;  %v1453_v6 = vld [vmem:[%s8866_s8 + $0x1f0] sm:$0xff]  ;;  %v1176_v50 = vld [vmem:[%s8866_s8 + $0x8] sm:$0xff] }
 0x3d9   : > { %v1199_v14 = vmul.f32 %v7336_v49, %v9095_v21  ;;  %v1476_v49 = vmul.f32 %v1468_v34, %v1444_v17  ;;  %v3691_v8 = vadd.f32 %v3690_v4, %v3689_v38  ;;  %v2528_v43 = vstv %s5147_s28  ;;  %v1454_v34 = vld [vmem:[%s8866_s8 + $0x1f8] sm:$0xff] }
 0x3da   : > { %v3709_v18 = vadd.f32 %v3708_v23, %v3707_v52  ;;  %v3774_v51 = vrot.slane %v3773_v61, 4  ;;  %v7666_v47 = vadd.f32 %v1471_v48, %v1447_v39  ;;  %v3792_v31 = vrot.slane %v3791_v44, 4  ;;  %v1352_v48 = vld [vmem:[%s8866_s8 + $0x88] sm:$0xff] }
 0x3db   : > { %v2529_v33 = vmul.f32 0.00012207031, %v2528_v43  ;;  %v2530_v17 = vmul.f32 %v7636_v20, %v7636_v20  ;;  %v7673_v13 = vadd.f32 %v1472_v1, %v1448_v54  ;;  %v7675_v32 = vadd.f32 %v1473_v27, %v1449_v24  ;;  %5156 = vpush %v3691_v8  ;;  %v1175_v24 = vld [vmem:[%s8866_s8] sm:$0xff] }
 0x3dc   : > { %v7677_v38 = vadd.f32 %v1474_v62, %v1450_v0  ;;  %v3775_v52 = vadd.f32 %v3774_v51, %v3773_v61  ;;  %v7685_v21 = vadd.f32 %v1475_v9, %v1451_v55  ;;  %v7687_v39 = vadd.f32 %v1476_v49, %v1452_v15  ;;  %5158 = vpush %v3709_v18  ;;  %v9096_v15 = vld [vmem:[#allocation12_spill] sm:$0xff] }
 0x3dd   : > { %v3793_v1 = vadd.f32 %v3792_v31, %v3791_v44  ;;  %v2531_v27 = vsub.f32 %v2529_v33, %v2530_v17  ;;  %v7689_v4 = vadd.f32 %v1477_v7, %v1453_v6  ;;  %v7691_v62 = vadd.f32 %v1478_v30, %v1454_v34  ;;  %v9097_v30 = vld [vmem:[#allocation11_spill] sm:$0xff]  ;;  %v9100_v34 = vld [vmem:[#allocation10_spill] sm:$0xff] }
 0x3de   : > { %v3776_v23 = vrot.slane %v3775_v52, 2  ;;  %v7693_v54 = vmul.f32 %v1200_v57, %v1176_v50  ;;  %v7698_v9 = vmul.f32 %v1288_v28, %v1264_v53  ;;  %v7700_v49 = vmul.f32 %v1376_v36, %v1352_v48  ;;  %v9098_v57 = vld [vmem:[#allocation9_spill] sm:$0xff]  ;;  %v7708_v44 = vpop.eup %5312  ;;  %v2452_v36 = vld [vmem:[%s8866_s8 + $0x230] sm:$0xff]  ;;  %v2451_v6 = vld [vmem:[%s8866_s8 + $0x228] sm:$0xff] }
 0x3df   : > { %v3794_v0 = vrot.slane %v3793_v1, 2  ;;  %v2532_v61 = vadd.f32 1e-05, %v2531_v27  ;;  %v2469_v7 = vsub.f32 %v9096_v15, %v7421_v26  ;;  %v2468_v8 = vsub.f32 %v9097_v30, %v7421_v26  ;;  %9099 = vst [vmem:[#allocation12_spill] sm:$0xff] %v7708_v44  ;;  %v2453_v28 = vld [vmem:[%s8866_s8 + $0x238] sm:$0xff]  ;;  %v2458_v30 = vld [vmem:[%s8866_s8 + $0x320] sm:$0xff] }
 0x3e0   : > { %v3777_v55 = vadd.f32 %v3776_v23, %v3775_v52  ;;  %v2467_v18 = vsub.f32 %v9098_v57, %v7421_v26  ;;  %v7710_v51 = vmul.f32 %v1199_v14, %v1175_v24  ;;  %v2466_v31 = vsub.f32 %v9100_v34, %v7421_v26  ;;  %v2450_v52 = vld [vmem:[%s8866_s8 + $0x220] sm:$0xff]  ;;  %v2461_v27 = vld [vmem:[%s8866_s8 + $0x338] sm:$0xff]  ;;  %v2460_v23 = vld [vmem:[%s8866_s8 + $0x330] sm:$0xff] }
 0x3e1   : > { %5314 = vrsqrt.f32 %v2532_v61  ;;  %v3795_v43 = vadd.f32 %v3794_v0, %v3793_v1  ;;  %v2477_v17 = vmul.f32 %v7708_v44, %v2469_v7  ;;  %v2476_v14 = vmul.f32 %v7708_v44, %v2468_v8  ;;  %v2459_v24 = vld [vmem:[%s8866_s8 + $0x328] sm:$0xff]  ;;  %v9102_v61 = vld [vmem:[#allocation5_spill] sm:$0xff] }
 0x3e2   : > { %v3778_v33 = vrot.slane %v3777_v55, 1  ;;  %v2475_v50 = vmul.f32 %v7708_v44, %v2467_v18  ;;  %v9101_v48 = vsub.f32 %v6769_v12, %v7302_v22  ;;  %v2474_v0 = vmul.f32 %v7708_v44, %v2466_v31  ;;  %v9103_v18 = vld [vmem:[#allocation8_spill] sm:$0xff] }
 0x3e3   : > { %v3796_v53 = vrot.slane %v3795_v43, 1  ;;  %v2463_v12 = vsub.f32 %v9102_v61, %v7421_v26  ;;  %v2484_v15 = vmul.f32 %v2476_v14, %v2452_v36  ;;  %v2465_v34 = vsub.f32 %v9103_v18, %v7421_v26  ;;  %s5149_s27 = spop %5148 }
 0x3e4   : > { %v7733_v1 = vmul.f32 %v7385_v40, %v9101_v48  ;;  %v3779_v22 = vadd.f32 %v3778_v33, %v3777_v55  ;;  %v2485_v40 = vmul.f32 %v2477_v17, %v2453_v28  ;;  %v2483_v7 = vmul.f32 %v2475_v50, %v2451_v6  ;;  %v9104_v48 = vld [vmem:[#allocation7_spill] sm:$0xff] }
 0x3e5   : > { %v3797_v8 = vadd.f32 %v3796_v53, %v3795_v43  ;;  %v2482_v57 = vmul.f32 %v2474_v0, %v2450_v52  ;;  %v2464_v60 = vsub.f32 %v9104_v48, %v7421_v26  ;;  %v2492_v61 = vadd.f32 %v2484_v15, %v2460_v23  ;;  %v3861_v6 = vpop.xlane.xlu0 %3860  ;;  %v2448_v15 = vld [vmem:[%s8866_s8 + $0x210] sm:$0xff] }
 0x3e6   : > { %5160 = vpush %v3779_v22  ;;  %v2493_v31 = vadd.f32 %v2485_v40, %v2461_v27  ;;  %v2491_v55 = vadd.f32 %v2483_v7, %v2459_v24  ;;  %v7755_v28 = vmul.f32 %v7708_v44, %v2463_v12  ;;  %v2598_v36 = vstv %s5149_s27  ;;  %v9106_v27 = vld [vmem:[#allocation20_spill] sm:$0xff]  ;;  %v9107_v24 = vld [vmem:[#allocation19_spill] sm:$0xff]  ;;  %v9108_v12 = vld [vmem:[#allocation17_spill] sm:$0xff] }
 0x3e7   : > { %5162 = vpush %v3797_v8  ;;  %v2490_v33 = vadd.f32 %v2482_v57, %v2458_v30  ;;  %v2473_v43 = vmul.f32 %v7708_v44, %v2465_v34  ;;  %v2472_v17 = vmul.f32 %v7708_v44, %v2464_v60  ;;  %v7759_v14 = vmul.f32 0.00012207031, %v2598_v36  ;;  %s5151_s28 = spop %5150  ;;  %v2449_v60 = vld [vmem:[%s8866_s8 + $0x218] sm:$0xff]  ;;  %v9109_v8 = vld [vmem:[#allocation18_spill] sm:$0xff] }
 0x3e8   : > { %v3862_v50 = vrot.slane %v3861_v6, 4  ;;  %v4052_v52 = vadd.f32 %v2493_v31, %v7407_v58  ;;  %v4051_v53 = vadd.f32 %v2492_v61, %v7413_v42  ;;  %v2557_v23 = vsub.f32 %v9106_v27, %v7636_v20  ;;  %v2538_v58 = vld [vmem:[%s8866_s8 + $0x260] sm:$0xff] }
 0x3e9   : > { %9105 = vst [vmem:[#allocation11_spill] sm:$0xff] %v7759_v14  ;;  %v2556_v0 = vsub.f32 %v9107_v24, %v7636_v20  ;;  %v2555_v22 = vsub.f32 %v9108_v12, %v7636_v20  ;;  %v4050_v40 = vadd.f32 %v2491_v55, %v7461_v59  ;;  %v2616_v30 = vstv %s5151_s28  ;;  %v3879_v31 = vpop.xlane.xlu1 %3878  ;;  %v3587_v61 = vpop.xlane.xlu0 %3586 }
 0x3ea   : > { %v3863_v7 = vadd.f32 %v3862_v50, %v3861_v6  ;;  %v2554_v57 = vsub.f32 %v9109_v8, %v7636_v20  ;;  %v4049_v18 = vadd.f32 %v2490_v33, %v7576_v3  ;;  %v2617_v34 = vmul.f32 0.00012207031, %v2616_v30  ;;  %v2541_v3 = vld [vmem:[%s8866_s8 + $0x278] sm:$0xff] }
 0x3eb   : > { %v2618_v48 = vmul.f32 %v7759_v14, %v7759_v14  ;;  %v5077_v55 = vmul.f32 -1.442695, %v4052_v52  ;;  %v5076_v36 = vmul.f32 -1.442695, %v4051_v53  ;;  %v3880_v24 = vrot.slane %v3879_v31, 4  ;;  %v2540_v52 = vld [vmem:[%s8866_s8 + $0x270] sm:$0xff] }
 0x3ec   : > { %v3864_v27 = vrot.slane %v3863_v7, 2  ;;  %v2481_v12 = vmul.f32 %v2473_v43, %v2449_v60  ;;  %v2480_v2 = vmul.f32 %v2472_v17, %v2448_v15  ;;  %v3941_v6 = vsel %vm1134_vm0, %v3587_v61, 0.0 }
 0x3ed   : > { %v2619_v59 = vsub.f32 %v2617_v34, %v2618_v48  ;;  %5316 = vpow2.f32 %v5077_v55  ;;  %v5075_v50 = vmul.f32 -1.442695, %v4050_v40  ;;  %v3881_v33 = vadd.f32 %v3880_v24, %v3879_v31  ;;  %v3590_v53 = vpop.xlane.xlu1 %3589  ;;  %v3593_v60 = vpop.xlane.xlu0 %3592  ;;  %v1184_v40 = vld [vmem:[%s8866_s8 + $0x108] sm:$0xff]  ;;  %v1351_v55 = vld [vmem:[%s8866_s8 + $0x80] sm:$0xff] }
 0x3ee   : > { %v7782_v8 = vpop.eup %5314  ;;  %v3865_v30 = vadd.f32 %v3864_v27, %v3863_v7  ;;  %5318 = vpow2.f32 %v5076_v36  ;;  %v5074_v43 = vmul.f32 -1.442695, %v4049_v18  ;;  %v2539_v34 = vld [vmem:[%s8866_s8 + $0x268] sm:$0xff]  ;;  %v3942_v18 = vsel %vm1134_vm0, %v3590_v53, 0.0 }
 0x3ef   : > { %9110 = vst [vmem:[#allocation9_spill] sm:$0xff] %v7782_v8  ;;  %v2620_v17 = vadd.f32 1e-05, %v2619_v59  ;;  %v2565_v15 = vmul.f32 %v7782_v8, %v2557_v23  ;;  %v2564_v7 = vmul.f32 %v7782_v8, %v2556_v0  ;;  %v2563_v48 = vmul.f32 %v7782_v8, %v2555_v22  ;;  %v2457_v23 = vld [vmem:[%s8866_s8 + $0x318] sm:$0xff] }
 0x3f0   : > { %v3882_v31 = vrot.slane %v3881_v33, 2  ;;  %v3944_v59 = vsel %vm1134_vm0, %v3593_v60, 0.0  ;;  %v3866_v61 = vrot.slane %v3865_v30, 1  ;;  %v3943_v0 = vadd.f32 %v3942_v18, %v3941_v6  ;;  %v2549_v22 = vld [vmem:[%s8866_s8 + $0x378] sm:$0xff]  ;;  %v2548_v60 = vld [vmem:[%s8866_s8 + $0x370] sm:$0xff] }
 0x3f1   : > { %5320 = vrsqrt.f32 %v2620_v17  ;;  %v2573_v36 = vmul.f32 %v2565_v15, %v2541_v3  ;;  %v2572_v27 = vmul.f32 %v2564_v7, %v2540_v52  ;;  %v2571_v42 = vmul.f32 %v2563_v48, %v2539_v34  ;;  %v3667_v17 = vpop.xlane.xlu1 %3666  ;;  %v3670_v6 = vpop.xlane.xlu0 %3669 }
 0x3f2   : > { %v3867_v24 = vadd.f32 %v3866_v61, %v3865_v30  ;;  %v3883_v53 = vadd.f32 %v3882_v31, %v3881_v33  ;;  %5322 = vpow2.f32 %v5075_v50  ;;  %v7817_v18 = vadd.f32 %v7693_v54, %v1184_v40  ;;  %v2547_v33 = vld [vmem:[%s8866_s8 + $0x368] sm:$0xff]  ;;  %v2456_v50 = vld [vmem:[%s8866_s8 + $0x310] sm:$0xff]  ;;  %v2546_v31 = vld [vmem:[%s8866_s8 + $0x360] sm:$0xff] }
 0x3f3   : > { %v7820_v3 = vmul.f32 %v7733_v1, %v1351_v55  ;;  %v2562_v30 = vmul.f32 %v7782_v8, %v2554_v57  ;;  %v2489_v52 = vadd.f32 %v2481_v12, %v2457_v23  ;;  %v3959_v15 = vsel %vm1134_vm0, %v3667_v17, 0.0  ;;  %s5153_s21 = spop %5152 }
 0x3f4   : > { %9111 = vst [vmem:[#allocation10_spill] sm:$0xff] %v7817_v18  ;;  %5164 = vpush %v3867_v24  ;;  %v3960_v54 = vsel %vm1134_vm0, %v3670_v6, 0.0  ;;  %v3884_v40 = vrot.slane %v3883_v53, 1  ;;  %v2581_v7 = vadd.f32 %v2573_v36, %v2549_v22  ;;  %v3945_v1 = vadd.f32 %v3944_v59, %v3943_v0  ;;  %v9112_v6 = vld [vmem:[#allocation16_spill] sm:$0xff]  ;;  %v9113_v59 = vld [vmem:[#allocation15_spill] sm:$0xff] }
 0x3f5   : > { %v3961_v34 = vadd.f32 %v3960_v54, %v3959_v15  ;;  %v2580_v48 = vadd.f32 %v2572_v27, %v2548_v60  ;;  %v2570_v57 = vmul.f32 %v2562_v30, %v2538_v58  ;;  %v2579_v61 = vadd.f32 %v2571_v42, %v2547_v33  ;;  %v3596_v17 = vpop.xlane.xlu1 %3595  ;;  %v3673_v24 = vpop.xlane.xlu0 %3672  ;;  %v9114_v22 = vld [vmem:[#allocation13_spill] sm:$0xff] }
 0x3f6   : > { %v3885_v12 = vadd.f32 %v3884_v40, %v3883_v53  ;;  %5324 = vpow2.f32 %v5074_v43  ;;  %v2488_v55 = vadd.f32 %v2480_v2, %v2456_v50  ;;  %v2686_v23 = vstv %s5153_s21  ;;  %v9115_v50 = vld [vmem:[#allocation28_spill] sm:$0xff] }
 0x3f7   : > { %v2553_v18 = vsub.f32 %v9112_v6, %v7636_v20  ;;  %v3946_v27 = vsel %vm1134_vm0, %v3596_v17, 0.0  ;;  %v3962_v58 = vsel %vm1134_vm0, %v3673_v24, 0.0  ;;  %v4164_v42 = vadd.f32 %v2581_v7, %v7459_v29  ;;  %s5155_s26 = spop %5154 }
 0x3f8   : > { %5166 = vpush %v3885_v12  ;;  %v2578_v2 = vadd.f32 %v2570_v57, %v2546_v31  ;;  %v7843_v43 = vmul.f32 0.00012207031, %v2686_v23  ;;  %v3947_v53 = vadd.f32 %v3946_v27, %v3945_v1  ;;  %v3963_v60 = vadd.f32 %v3962_v58, %v3961_v34  ;;  %v9116_v1 = vld [vmem:[#allocation27_spill] sm:$0xff]  ;;  %v9117_v34 = vld [vmem:[#allocation25_spill] sm:$0xff]  ;;  %v9118_v23 = vld [vmem:[#allocation26_spill] sm:$0xff] }
 0x3f9   : > { %v4163_v33 = vadd.f32 %v2580_v48, %v7472_v11  ;;  %v2645_v15 = vsub.f32 %v9115_v50, %v7759_v14  ;;  %v4162_v54 = vadd.f32 %v2579_v61, %v7567_v41  ;;  %v4048_v40 = vadd.f32 %v2489_v52, %v7588_v56  ;;  %v3676_v31 = vpop.xlane.xlu1 %3675  ;;  %v9120_v50 = vld [vmem:[#allocation30_spill] sm:$0xff] }
 0x3fa   : > { %v5317_v30 = vpop.eup %5316  ;;  %v7851_v12 = vadd.f32 %v2488_v55, %v7600_v19  ;;  %3948 = vadd.xlane.f32.xlu0 %v3947_v53  ;;  %v2644_v57 = vsub.f32 %v9116_v1, %v7759_v14  ;;  %v2643_v48 = vsub.f32 %v9117_v34, %v7759_v14  ;;  %v2642_v17 = vsub.f32 %v9118_v23, %v7759_v14 }
 0x3fb   : > { %v5319_v7 = vpop.eup %5318  ;;  %v2561_v24 = vmul.f32 %v7782_v8, %v2553_v18  ;;  %v2704_v61 = vstv %s5155_s26  ;;  %v3964_v52 = vsel %vm1134_vm0, %v3676_v31, 0.0  ;;  %5326 = vtanh.f32 %v4164_v42  ;;  %v2629_v18 = vld [vmem:[%s8866_s8 + $0x2b8] sm:$0xff]  ;;  %v2628_v42 = vld [vmem:[%s8866_s8 + $0x2b0] sm:$0xff] }
 0x3fc   : > { %v4161_v55 = vadd.f32 %v2578_v2, %v7578_v46  ;;  %v2705_v6 = vmul.f32 0.00012207031, %v2704_v61  ;;  %v2706_v27 = vmul.f32 %v7843_v43, %v7843_v43  ;;  %v3965_v58 = vadd.f32 %v3964_v52, %v3963_v60  ;;  %v9121_v2 = vld [vmem:[#allocation24_spill] sm:$0xff]  ;;  %v2635_v46 = vld [vmem:[%s8866_s8 + $0x3a8] sm:$0xff] }
 0x3fd   : > { %5328 = vtanh.f32 %v4163_v33  ;;  %v4084_v34 = vadd.f32 1.0, %v5317_v30  ;;  %v2641_v31 = vsub.f32 %v9121_v2, %v7759_v14  ;;  %v9122_v33 = vld [vmem:[#allocation29_spill] sm:$0xff]  ;;  %v2627_v30 = vld [vmem:[%s8866_s8 + $0x2a8] sm:$0xff]  ;;  %v5073_v44 = vmul.f32 -1.442695, %v4048_v40 }
 0x3fe   : > { %v7864_v53 = vpop.eup %5320  ;;  %5330 = vtanh.f32 %v4162_v54  ;;  %v2707_v61 = vsub.f32 %v2705_v6, %v2706_v27  ;;  %3966 = vadd.xlane.f32.xlu1 %v3965_v58  ;;  %v2626_v54 = vld [vmem:[%s8866_s8 + $0x2a0] sm:$0xff]  ;;  %v2637_v2 = vld [vmem:[%s8866_s8 + $0x3b8] sm:$0xff]  ;;  %v2636_v6 = vld [vmem:[%s8866_s8 + $0x3b0] sm:$0xff]  ;;  %v4083_v27 = vadd.f32 1.0, %v5319_v7 }
 0x3ff   : > { %9119 = vst [vmem:[#allocation5_spill] sm:$0xff] %v7864_v53  ;;  %v5323_v60 = vpop.eup %5322  ;;  %v2653_v52 = vmul.f32 %v7864_v53, %v2645_v15  ;;  %v2652_v1 = vmul.f32 %v7864_v53, %v2644_v57  ;;  %v2651_v15 = vmul.f32 %v7864_v53, %v2643_v48  ;;  %v2650_v57 = vmul.f32 %v7864_v53, %v2642_v17  ;;  %v2625_v58 = vld [vmem:[%s8866_s8 + $0x298] sm:$0xff]  ;;  %v2634_v7 = vld [vmem:[%s8866_s8 + $0x3a0] sm:$0xff] }
 0x400   : > { %5332 = vtanh.f32 %v4161_v55  ;;  %v2708_v23 = vadd.f32 1e-05, %v2707_v61  ;;  %v2537_v48 = vld [vmem:[%s8866_s8 + $0x258] sm:$0xff]  ;;  %v2649_v17 = vmul.f32 %v7864_v53, %v2641_v31  ;;  %v4082_v19 = vadd.f32 1.0, %v5323_v60 }
 0x401   : > { %v2661_v36 = vmul.f32 %v2653_v52, %v2629_v18  ;;  %v2660_v0 = vmul.f32 %v2652_v1, %v2628_v42  ;;  %5334 = vrcp.f32 %v4084_v34  ;;  %v2659_v55 = vmul.f32 %v2651_v15, %v2627_v30  ;;  %v2633_v1 = vld [vmem:[%s8866_s8 + $0x398] sm:$0xff] }
 0x402   : > { %v2658_v61 = vmul.f32 %v2650_v57, %v2626_v54  ;;  %5336 = vrsqrt.f32 %v2708_v23  ;;  %v2657_v56 = vmul.f32 %v2649_v17, %v2625_v58  ;;  %v2569_v29 = vmul.f32 %v2561_v24, %v2537_v48  ;;  %v2545_v40 = vld [vmem:[%s8866_s8 + $0x358] sm:$0xff]  ;;  %v9126_v58 = vld [vmem:[#allocation31_spill] sm:$0xff] }
 0x403   : > { %v5325_v18 = vpop.eup %5324  ;;  %v2669_v42 = vadd.f32 %v2661_v36, %v2637_v2  ;;  %v2668_v52 = vadd.f32 %v2660_v0, %v2636_v6  ;;  %v2667_v41 = vadd.f32 %v2659_v55, %v2635_v46  ;;  %v9123_v60 = vsub.f32 %v9113_v59, %v7636_v20  ;;  %v2536_v59 = vld [vmem:[%s8866_s8 + $0x250] sm:$0xff] }
 0x404   : > { %v2666_v11 = vadd.f32 %v2658_v61, %v2634_v7  ;;  %v2665_v31 = vadd.f32 %v2657_v56, %v2633_v1  ;;  %5338 = vrcp.f32 %v4083_v27  ;;  %v4081_v36 = vadd.f32 1.0, %v5325_v18  ;;  %v9124_v27 = vld [vmem:[#allocation23_spill] sm:$0xff]  ;;  %v2544_v18 = vld [vmem:[%s8866_s8 + $0x350] sm:$0xff] }
 0x405   : > { %v4196_v35 = vadd.f32 %v2669_v42, %v7565_v10  ;;  %v4195_v34 = vadd.f32 %v2668_v52, %v7572_v5  ;;  %v2560_v30 = vmul.f32 %v7782_v8, %v9123_v60  ;;  %v4194_v23 = vadd.f32 %v2667_v41, %v7574_v37  ;;  %v9132_v60 = vld [vmem:[#allocation32_spill] sm:$0xff] }
 0x406   : > { %v4193_v0 = vadd.f32 %v2666_v11, %v7586_v16  ;;  %5340 = vrcp.f32 %v4082_v19  ;;  %v4192_v56 = vadd.f32 %v2665_v31, %v7592_v45  ;;  %v5072_v41 = vmul.f32 -1.442695, %v7851_v12  ;;  %v2721_v45 = vld [vmem:[%s8866_s8 + $0x3d8] sm:$0xff]  ;;  %v2722_v16 = vld [vmem:[%s8866_s8 + $0x3e0] sm:$0xff] }
 0x407   : > { %v4204_v46 = vadd.f32 1.0, %v4196_v35  ;;  %v4203_v54 = vadd.f32 1.0, %v4195_v34  ;;  %v4202_v24 = vadd.f32 1.0, %v4194_v23  ;;  %5342 = vpow2.f32 %v5073_v44  ;;  %v9133_v23 = vld [vmem:[#allocation34_spill] sm:$0xff] }
 0x408   : > { %v4201_v2 = vadd.f32 1.0, %v4193_v0  ;;  %v7926_v6 = vpop.eup %5326  ;;  %v4200_v19 = vadd.f32 1.0, %v4192_v56  ;;  %v2640_v15 = vsub.f32 %v9124_v27, %v7759_v14  ;;  %v2728_v7 = vsub.f32 %v9126_v58, %v7843_v43  ;;  %v9134_v0 = vld [vmem:[#allocation33_spill] sm:$0xff]  ;;  %v2710_v56 = vld [vmem:[%s8866_s8 + $0x2c0] sm:$0xff] }
 0x409   : > { %v5093_v11 = vmul.f32 -1.442695, %v4204_v46  ;;  %v5092_v35 = vmul.f32 -1.442695, %v4203_v54  ;;  %v5091_v44 = vmul.f32 -1.442695, %v4202_v24  ;;  %5344 = vrcp.f32 %v4081_v36 }
 0x40a   : > { %v7930_v57 = vpop.eup %5328  ;;  %v2577_v48 = vadd.f32 %v2569_v29, %v2545_v40  ;;  %v5090_v55 = vmul.f32 -1.442695, %v4201_v2  ;;  %v2568_v12 = vmul.f32 %v2560_v30, %v2536_v59  ;;  %v2648_v61 = vmul.f32 %v7864_v53, %v2640_v15  ;;  %v9130_v29 = vld [vmem:[#allocation21_spill] sm:$0xff]  ;;  %v9135_v54 = vld [vmem:[#allocation35_spill] sm:$0xff] }
 0x40b   : > { %9125 = vst [vmem:[#allocation8_spill] sm:$0xff] %v7930_v57  ;;  %v7934_v17 = vpop.eup %5330  ;;  %5346 = vpow2.f32 %v5072_v41  ;;  %v5089_v1 = vmul.f32 -1.442695, %v4200_v19  ;;  %v9128_v42 = vsub.f32 %v9114_v22, %v7636_v20  ;;  %v2639_v34 = vsub.f32 %v9130_v29, %v7759_v14  ;;  %v2624_v22 = vld [vmem:[%s8866_s8 + $0x290] sm:$0xff]  ;;  %v2713_v27 = vld [vmem:[%s8866_s8 + $0x2d8] sm:$0xff]  ;;  %v2715_v29 = vld [vmem:[%s8866_s8 + $0x2e8] sm:$0xff] }
 0x40c   : > { %9127 = vst [vmem:[#allocation7_spill] sm:$0xff] %v7934_v17  ;;  %5348 = vpow2.f32 %v5093_v11  ;;  %v2729_v30 = vsub.f32 %v9132_v60, %v7843_v43  ;;  %v2730_v36 = vsub.f32 %v9133_v23, %v7843_v43  ;;  %v2731_v46 = vsub.f32 %v9134_v0, %v7843_v43  ;;  %s5157_s25 = spop %5156  ;;  %v9137_v41 = vld [vmem:[#allocation36_spill] sm:$0xff]  ;;  %v2719_v23 = vld [vmem:[%s8866_s8 + $0x3c8] sm:$0xff] }
 0x40d   : > { %v7944_v52 = vmul.f32 %v7782_v8, %v9128_v42  ;;  %v7948_v31 = vpop.eup %5332  ;;  %5350 = vpow2.f32 %v5092_v35  ;;  %v2732_v40 = vsub.f32 %v9135_v54, %v7843_v43  ;;  %v3693_v24 = vstv %s5157_s25  ;;  %s7964_s26 = spop %5158  ;;  %v2711_v35 = vld [vmem:[%s8866_s8 + $0x2c8] sm:$0xff]  ;;  %v2712_v19 = vld [vmem:[%s8866_s8 + $0x2d0] sm:$0xff]  ;;  %v2714_v42 = vld [vmem:[%s8866_s8 + $0x2e0] sm:$0xff] }
 0x40e   : > { %9131 = vst [vmem:[#allocation19_spill] sm:$0xff] %v7948_v31  ;;  %5352 = vpow2.f32 %v5091_v44  ;;  %v7967_v2 = vmul.f32 %v7864_v53, %v2639_v34  ;;  %v7969_v59 = vpop.eup %5334  ;;  %v2733_v11 = vsub.f32 %v9137_v41, %v7843_v43  ;;  %v7983_v15 = vadd.f32 %v2577_v48, %v7590_v63  ;;  %v2716_v34 = vld [vmem:[%s8866_s8 + $0x2f0] sm:$0xff] }
 0x40f   : > { %9129 = vst [vmem:[#allocation20_spill] sm:$0xff] %v7944_v52  ;;  %5354 = vpow2.f32 %v5090_v55  ;;  %v7985_v58 = vadd.f32 %v2568_v12, %v2544_v18  ;;  %v5337_v44 = vpop.eup %5336  ;;  %v7996_v60 = vmul.f32 0.00012207031, %v3693_v24  ;;  %v3711_v55 = vstv %s7964_s26  ;;  %v2717_v12 = vld [vmem:[%s8866_s8 + $0x2f8] sm:$0xff]  ;;  %v2718_v18 = vld [vmem:[%s8866_s8 + $0x3c0] sm:$0xff]  ;;  %v2720_v41 = vld [vmem:[%s8866_s8 + $0x3d0] sm:$0xff] }
 0x410   : > { %9136 = vst [vmem:[#allocation17_spill] sm:$0xff] %v7967_v2  ;;  %5356 = vpow2.f32 %v5089_v1  ;;  %v7999_v48 = vmul.f32 %v2648_v61, %v2624_v22  ;;  %v9138_v0 = vsub.f32 %v9120_v50, %v7843_v43  ;;  %v9139_v61 = vsub.f32 %v9122_v33, %v7843_v43  ;;  %v2723_v33 = vld [vmem:[%s8866_s8 + $0x3e8] sm:$0xff] }
 0x411   : > { %v2736_v22 = vmul.f32 %v5337_v44, %v2728_v7  ;;  %v2737_v24 = vmul.f32 %v5337_v44, %v2729_v30  ;;  %v2738_v50 = vmul.f32 %v5337_v44, %v2730_v36  ;;  %v2740_v37 = vmul.f32 %v5337_v44, %v2732_v40  ;;  %v8025_v43 = vpop.eup %5338  ;;  %v2724_v7 = vld [vmem:[%s8866_s8 + $0x3f0] sm:$0xff]  ;;  %v2725_v30 = vld [vmem:[%s8866_s8 + $0x3f8] sm:$0xff] }
 0x412   : > { %v2734_v54 = vmul.f32 %v5337_v44, %v9138_v0  ;;  %v2735_v1 = vmul.f32 %v5337_v44, %v9139_v61  ;;  %v2739_v0 = vmul.f32 %v5337_v44, %v2731_v46  ;;  %v2741_v5 = vmul.f32 %v5337_v44, %v2733_v11  ;;  %9140 = vst [vmem:[#allocation18_spill] sm:$0xff] %v8025_v43 }
 0x413   : > { %v2744_v36 = vmul.f32 %v2736_v22, %v2712_v19  ;;  %v2745_v46 = vmul.f32 %v2737_v24, %v2713_v27  ;;  %v8036_v40 = vpop.eup %5340  ;;  %v2746_v11 = vmul.f32 %v2738_v50, %v2714_v42  ;;  %v2748_v63 = vmul.f32 %v2740_v37, %v2716_v34  ;;  %v9150_v24 = vld [vmem:[#allocation86_spill] sm:$0xff] }
 0x414   : > { %v2742_v61 = vmul.f32 %v2734_v54, %v2710_v56  ;;  %v2743_v10 = vmul.f32 %v2735_v1, %v2711_v35  ;;  %v2747_v44 = vmul.f32 %v2739_v0, %v2715_v29  ;;  %v2749_v31 = vmul.f32 %v2741_v5, %v2717_v12  ;;  %v8038_v53 = vpop.eup %5342  ;;  %v9152_v0 = vld [vmem:[#allocation8_spill] sm:$0xff] }
 0x415   : > { %v2752_v8 = vadd.f32 %v2744_v36, %v2720_v41  ;;  %v2753_v52 = vadd.f32 %v2745_v46, %v2721_v45  ;;  %v2754_v17 = vadd.f32 %v2746_v11, %v2722_v16  ;;  %v2756_v57 = vadd.f32 %v2748_v63, %v2724_v7  ;;  %v2447_v16 = vld [vmem:[%s8866_s8 + $0x208] sm:$0xff]  ;;  %v9151_v41 = vld [vmem:[#allocation14_spill] sm:$0xff]  ;;  %v9158_v46 = vld [vmem:[#allocation44_spill] sm:$0xff] }
 0x416   : > { %v2750_v14 = vadd.f32 %v2742_v61, %v2718_v18  ;;  %v2751_v2 = vadd.f32 %v2743_v10, %v2719_v23  ;;  %v2755_v43 = vadd.f32 %v2747_v44, %v2723_v33  ;;  %v2757_v20 = vadd.f32 %v2749_v31, %v2725_v30  ;;  %v8040_v56 = vpop.eup %5344  ;;  %v1272_v10 = vld [vmem:[%s8866_s8 + $0x148] sm:$0xff]  ;;  %v9155_v61 = vld [vmem:[#allocation85_spill] sm:$0xff] }
 0x417   : > { %v8049_v5 = vadd.f32 %v2752_v8, %v7675_v32  ;;  %v8052_v37 = vadd.f32 %v2753_v52, %v7677_v38  ;;  %s5161_s19 = spop %5160  ;;  %v8063_v45 = vadd.f32 %v2754_v17, %v7685_v21  ;;  %v1360_v38 = vld [vmem:[%s8866_s8 + $0x188] sm:$0xff]  ;;  %v2632_v21 = vld [vmem:[%s8866_s8 + $0x390] sm:$0xff]  ;;  %v3712_v8 = vmul.f32 0.00012207031, %v3711_v55 }
 0x418   : > { %v8043_v35 = vadd.f32 %v2750_v14, %v7666_v47  ;;  %v8046_v19 = vadd.f32 %v2751_v2, %v7673_v13  ;;  %v8060_v63 = vpop.eup %5346  ;;  %v8066_v47 = vadd.f32 %v2755_v43, %v7687_v39  ;;  %v8069_v13 = vadd.f32 %v2756_v57, %v7689_v4  ;;  %s5163_s26 = spop %5162  ;;  %v1183_v14 = vld [vmem:[%s8866_s8 + $0x100] sm:$0xff]  ;;  %v9159_v44 = vld [vmem:[#allocation43_spill] sm:$0xff] }
 0x419   : > { %9143 = vst [vmem:[#allocation13_spill] sm:$0xff] %v8049_v5  ;;  %9144 = vst [vmem:[#allocation28_spill] sm:$0xff] %v8052_v37  ;;  %v8072_v32 = vadd.f32 %v2757_v20, %v7691_v62  ;;  %v5349_v39 = vpop.eup %5348  ;;  %v3713_v4 = vmul.f32 %v7996_v60, %v7996_v60  ;;  %v3781_v20 = vstv %s5161_s19  ;;  %v3799_v62 = vstv %s5163_s26  ;;  %v1359_v57 = vld [vmem:[%s8866_s8 + $0x180] sm:$0xff]  ;;  %s5118_s19 = sshll.u32 %s9254_s18, 7 }
 0x41a   : > { %9141 = vst [vmem:[#allocation16_spill] sm:$0xff] %v8043_v35  ;;  %9142 = vst [vmem:[#allocation15_spill] sm:$0xff] %v8046_v19  ;;  %v5351_v17 = vpop.eup %5350  ;;  %v8088_v52 = vmul.f32 0.00012207031, %v3781_v20  ;;  %v8091_v31 = vadd.f32 %v7698_v9, %v1272_v10  ;;  %v4159_v2 = vadd.f32 %v7985_v58, %v7611_v25  ;;  %v2479_v27 = vmul.f32 %v7755_v28, %v2447_v16  ;;  %v2455_v9 = vld [vmem:[%s8866_s8 + $0x308] sm:$0xff]  ;;  %v9153_v43 = vld [vmem:[#allocation18_spill] sm:$0xff] }
 0x41b   : > { %9145 = vst [vmem:[#allocation27_spill] sm:$0xff] %v8063_v45  ;;  %9146 = vst [vmem:[#allocation25_spill] sm:$0xff] %v8066_v47  ;;  %v5353_v42 = vpop.eup %5352  ;;  %v3714_v29 = vsub.f32 %v3712_v8, %v3713_v4  ;;  %v8097_v34 = vadd.f32 %v7700_v49, %v1360_v38  ;;  %v8100_v55 = vadd.f32 %v7710_v51, %v1183_v14  ;;  %v3800_v23 = vmul.f32 0.00012207031, %v3799_v62  ;;  %v2535_v49 = vld [vmem:[%s8866_s8 + $0x248] sm:$0xff]  ;;  %v9149_v51 = vld [vmem:[#allocation6_spill] sm:$0xff] }
 0x41c   : > { %9147 = vst [vmem:[#allocation26_spill] sm:$0xff] %v8069_v13  ;;  %9148 = vst [vmem:[#allocation30_spill] sm:$0xff] %v8072_v32  ;;  %v2664_v12 = vadd.f32 %v7999_v48, %v2632_v21  ;;  %v5355_v18 = vpop.eup %5354  ;;  %v3801_v58 = vmul.f32 %v8088_v52, %v8088_v52  ;;  %v8109_v28 = vadd.f32 %v7820_v3, %v1359_v57  ;;  %5358 = vtanh.f32 %v7983_v15  ;;  %v9160_v38 = vld [vmem:[#allocation42_spill] sm:$0xff]  ;;  %v9161_v21 = vld [vmem:[#allocation41_spill] sm:$0xff] }
 0x41d   : > { %v2462_v54 = vsub.f32 %v9149_v51, %v7421_v26  ;;  %v5357_v48 = vpop.eup %5356  ;;  %v3715_v1 = vadd.f32 1e-05, %v3714_v29  ;;  %v8118_v22 = vmul.f32 %v7969_v59, %v7926_v6  ;;  %v2550_v50 = vsub.f32 %v9151_v41, %v9150_v24  ;;  %v9154_v26 = vld [vmem:[#allocation7_spill] sm:$0xff]  ;;  %v9156_v59 = vld [vmem:[#allocation20_spill] sm:$0xff]  ;;  %v9170_v41 = vld [vmem:[#allocation49_spill] sm:$0xff] }
 0x41e   : > { %v3802_v3 = vsub.f32 %v3800_v23, %v3801_v58  ;;  %v8125_v33 = vmul.f32 %v9153_v43, %v9152_v0  ;;  %5360 = vtanh.f32 %v4159_v2  ;;  %v2487_v7 = vadd.f32 %v2479_v27, %v2455_v9  ;;  %v9162_v8 = vld [vmem:[#allocation40_spill] sm:$0xff]  ;;  %v9163_v20 = vld [vmem:[#allocation39_spill] sm:$0xff]  ;;  %v9166_v9 = vld [vmem:[#allocation50_spill] sm:$0xff] }
 0x41f   : > { %5362 = vrsqrt.f32 %v3715_v1  ;;  %v8129_v30 = vmul.f32 %v8036_v40, %v9154_v26  ;;  %v4191_v6 = vadd.f32 %v2664_v12, %v9155_v61  ;;  %v8133_v36 = vmul.f32 %v9156_v59, %v2535_v49  ;;  %v9164_v57 = vld [vmem:[#allocation52_spill] sm:$0xff]  ;;  %v9165_v27 = vld [vmem:[#allocation51_spill] sm:$0xff]  ;;  %v9168_v1 = vld [vmem:[#allocation9_spill] sm:$0xff] }
 0x420   : > { %v3803_v15 = vadd.f32 1e-05, %v3802_v3  ;;  %v3740_v11 = vsub.f32 %v9158_v46, %v7996_v60  ;;  %v3739_v10 = vsub.f32 %v9159_v44, %v7996_v60  ;;  %v4236_v16 = vadd.f32 1.0, %v5349_v39  ;;  %v2623_v12 = vld [vmem:[%s8866_s8 + $0x288] sm:$0xff]  ;;  %v9167_v49 = vld [vmem:[#allocation12_spill] sm:$0xff]  ;;  %v9188_v62 = vld [vmem:[#allocation57_spill] sm:$0xff] }
 0x421   : > { %9157 = vst [vmem:[#allocation24_spill] sm:$0xff] %v8133_v36  ;;  %v4235_v39 = vadd.f32 1.0, %v5351_v17  ;;  %v4234_v58 = vadd.f32 1.0, %v5353_v42  ;;  %v8157_v51 = vmul.f32 %v9167_v49, %v2462_v54  ;;  %v8160_v24 = vmul.f32 %v9168_v1, %v2550_v50  ;;  %v9171_v0 = vld [vmem:[#allocation48_spill] sm:$0xff]  ;;  %v9172_v42 = vld [vmem:[#allocation17_spill] sm:$0xff]  ;;  %v9173_v49 = vld [vmem:[#allocation11_spill] sm:$0xff] }
 0x422   : > { %5364 = vrsqrt.f32 %v3803_v15  ;;  %v4233_v43 = vadd.f32 1.0, %v5355_v18  ;;  %v4080_v26 = vadd.f32 1.0, %v8038_v53  ;;  %v4232_v59 = vadd.f32 1.0, %v5357_v48  ;;  %v9174_v50 = vld [vmem:[#allocation22_spill] sm:$0xff]  ;;  %v2631_v18 = vld [vmem:[%s8866_s8 + $0x388] sm:$0xff]  ;;  %v3812_v46 = vld [vmem:[%s8866_s8 + $0x478] sm:$0xff] }
 0x423   : > { %9169 = vst [vmem:[#allocation29_spill] sm:$0xff] %v8160_v24  ;;  %5366 = vrcp.f32 %v4236_v16  ;;  %v4199_v15 = vadd.f32 1.0, %v4191_v6  ;;  %v2655_v23 = vmul.f32 %v9172_v42, %v2623_v12  ;;  %v2638_v1 = vsub.f32 %v9174_v50, %v9173_v49  ;;  %v9175_v16 = vld [vmem:[#allocation10_spill] sm:$0xff]  ;;  %v9176_v6 = vld [vmem:[#allocation47_spill] sm:$0xff]  ;;  %v9181_v50 = vld [vmem:[#allocation37_spill] sm:$0xff] }
 0x424   : > { %5368 = vrcp.f32 %v4235_v39  ;;  %v4079_v3 = vadd.f32 1.0, %v8060_v63  ;;  %v4046_v53 = vadd.f32 %v2487_v7, %v9175_v16  ;;  %v8986_v48 = vmov 0.0   ;;  %v9177_v12 = vld [vmem:[#allocation38_spill] sm:$0xff]  ;;  %v9182_v17 = vld [vmem:[#allocation19_spill] sm:$0xff]  ;;  %v9207_v36 = vld [vmem:[#allocation56_spill] sm:$0xff] }
 0x425   : > { %s5165_s22 = spop %5164  ;;  %5370 = vrcp.f32 %v4234_v58  ;;  %4513 = vmatprep.mubr.f32.mxu1 %v8986_v48  ;;  %v3734_v42 = vsub.f32 %v9177_v12, %v7996_v60  ;;  %v9180_v63 = vld [vmem:[#allocation46_spill] sm:$0xff]  ;;  %v8191_v48 = vmul.f32 %v8040_v56, %v9182_v17  ;;  %v3724_v17 = vld [vmem:[%s8866_s8 + $0x438] sm:$0xff]  ;;  %v3730_v44 = vld [vmem:[%s8866_s8 + $0x528] sm:$0xff]  ;;  %v9192_v32 = vsub.f32 %v9163_v20, %v7996_v60 }
 0x426   : > { %v3869_v54 = vstv %s5165_s22  ;;  %5372 = vrcp.f32 %v4233_v43  ;;  %v8195_v43 = vmul.f32 -1.442695, %v4199_v15  ;;  %v8203_v7 = vmul.f32 -1.442695, %v4046_v53  ;;  %v3810_v20 = vld [vmem:[%s8866_s8 + $0x468] sm:$0xff]  ;;  %s8469_s22 = scalar_lea.vmem %s8861_s3, %s5118_s19 }
 0x427   : > { %v8170_v29 = vmul.f32 0.00012207031, %v3869_v54  ;;  %v9178_v54 = vld [vmem:[#allocation5_spill] sm:$0xff]  ;;  %5374 = vrcp.f32 %v4080_v26  ;;  %v9185_v26 = vld [vmem:[#allocation60_spill] sm:$0xff]  ;;  %v9189_v53 = vsub.f32 %v9160_v38, %v7996_v60 }
 0x428   : > { %v8183_v58 = vmul.f32 %v9178_v54, %v2638_v1  ;;  %5376 = vrcp.f32 %v4232_v59  ;;  %v8197_v1 = vadd.f32 %v2655_v23, %v2631_v18  ;;  %v3723_v23 = vld [vmem:[%s8866_s8 + $0x430] sm:$0xff]  ;;  %v9187_v18 = vld [vmem:[#allocation58_spill] sm:$0xff]  ;;  %v3732_v59 = vld [vmem:[%s8866_s8 + $0x538] sm:$0xff] }
 0x429   : > { %s5167_s27 = spop %5166  ;;  %v8193_v39 = vpop.eup %5358  ;;  %v3889_v49 = vmul.f32 %v8170_v29, %v8170_v29  ;;  %5378 = vrcp.f32 %v4079_v3  ;;  %v3722_v3 = vld [vmem:[%s8866_s8 + $0x428] sm:$0xff] }
 0x42a   : > { %9179 = vst [vmem:[#allocation23_spill] sm:$0xff] %v8183_v58  ;;  %v3887_v2 = vstv %s5167_s27  ;;  %9183 = vst [vmem:[#allocation31_spill] sm:$0xff] %v8197_v1 }
 0x42b   : > { %v8199_v12 = vpop.eup %5360  ;;  %v3888_v54 = vmul.f32 0.00012207031, %v3887_v2  ;;  %v9186_v2 = vld [vmem:[#allocation59_spill] sm:$0xff] }
 0x42c   : > { %9184 = vst [vmem:[#allocation21_spill] sm:$0xff] %v8199_v12  ;;  %v8205_v56 = vpop.eup %5362  ;;  %v9198_v12 = vld [vmem:[#allocation72_spill] sm:$0xff] }
 0x42d   : > { %v3890_v40 = vsub.f32 %v3888_v54, %v3889_v49  ;;  %v3748_v15 = vmul.f32 %v8205_v56, %v3740_v11  ;;  %v3747_v14 = vmul.f32 %v8205_v56, %v3739_v10  ;;  %v3746_v4 = vmul.f32 %v8205_v56, %v9189_v53  ;;  %v3721_v49 = vld [vmem:[%s8866_s8 + $0x420] sm:$0xff]  ;;  %v3731_v11 = vld [vmem:[%s8866_s8 + $0x530] sm:$0xff] }
 0x42e   : > { %v9190_v10 = vsub.f32 %v9161_v21, %v7996_v60  ;;  %v9191_v54 = vsub.f32 %v9162_v8, %v7996_v60  ;;  %v8263_v13 = vmul.f32 %v8205_v56, %v9192_v32  ;;  %v8266_v47 = vmul.f32 %v8205_v56, %v3734_v42  ;;  %v3811_v8 = vld [vmem:[%s8866_s8 + $0x470] sm:$0xff]  ;;  %v3729_v32 = vld [vmem:[%s8866_s8 + $0x520] sm:$0xff] }
 0x42f   : > { %v8268_v45 = vpop.eup %5364  ;;  %v3891_v37 = vadd.f32 1e-05, %v3890_v40  ;;  %v3756_v21 = vmul.f32 %v3748_v15, %v3724_v17  ;;  %v3755_v5 = vmul.f32 %v3747_v14, %v3723_v23  ;;  %v9193_v42 = vsub.f32 %v9164_v57, %v8088_v52  ;;  %v3820_v57 = vld [vmem:[%s8866_s8 + $0x578] sm:$0xff] }
 0x430   : > { %v3745_v38 = vmul.f32 %v8205_v56, %v9190_v10  ;;  %v3744_v53 = vmul.f32 %v8205_v56, %v9191_v54  ;;  %v3754_v10 = vmul.f32 %v3746_v4, %v3722_v3  ;;  %v9194_v14 = vsub.f32 %v9165_v27, %v8088_v52  ;;  %v8291_v3 = vpop.eup %5366  ;;  %v3819_v27 = vld [vmem:[%s8866_s8 + $0x570] sm:$0xff] }
 0x431   : > { %v3836_v40 = vmul.f32 %v8268_v45, %v9193_v42  ;;  %v9195_v4 = vsub.f32 %v9166_v9, %v8088_v52  ;;  %5380 = vrsqrt.f32 %v3891_v37  ;;  %v3764_v54 = vadd.f32 %v3756_v21, %v3732_v59  ;;  %v3818_v9 = vld [vmem:[%s8866_s8 + $0x568] sm:$0xff]  ;;  %v3809_v37 = vld [vmem:[%s8866_s8 + $0x460] sm:$0xff]  ;;  %v8305_v59 = vpop.eup %5368  ;;  %v9197_v21 = vld [vmem:[#allocation4_spill] sm:$0xff] }
 0x432   : > { %v3835_v17 = vmul.f32 %v8268_v45, %v9194_v14  ;;  %v3753_v15 = vmul.f32 %v3745_v38, %v3721_v49  ;;  %v3763_v42 = vadd.f32 %v3755_v5, %v3731_v11  ;;  %v3762_v14 = vadd.f32 %v3754_v10, %v3730_v44  ;;  %v9196_v5 = vld [vmem:[#allocation3_spill] sm:$0xff] }
 0x433   : > { %v3834_v23 = vmul.f32 %v8268_v45, %v9195_v4  ;;  %v3844_v4 = vmul.f32 %v3836_v40, %v3812_v46  ;;  %v4108_v11 = vadd.f32 %v3764_v54, %v9196_v5  ;;  %v9199_v10 = vsub.f32 %v9170_v41, %v8088_v52  ;;  %v3719_v41 = vld [vmem:[%s8866_s8 + $0x410] sm:$0xff]  ;;  %v3808_v5 = vld [vmem:[%s8866_s8 + $0x458] sm:$0xff] }
 0x434   : > { %v3843_v49 = vmul.f32 %v3835_v17, %v3811_v8  ;;  %v3761_v19 = vadd.f32 %v3753_v15, %v3729_v32  ;;  %v4107_v35 = vadd.f32 %v3763_v42, %v9197_v21  ;;  %v4106_v44 = vadd.f32 %v3762_v14, %v9198_v12  ;;  %v8314_v8 = vpop.eup %5370  ;;  %v9200_v17 = vld [vmem:[#allocation78_spill] sm:$0xff]  ;;  %v3720_v15 = vld [vmem:[%s8866_s8 + $0x418] sm:$0xff] }
 0x435   : > { %v3842_v38 = vmul.f32 %v3834_v23, %v3810_v20  ;;  %v3833_v46 = vmul.f32 %v8268_v45, %v9199_v10  ;;  %v3852_v20 = vadd.f32 %v3844_v4, %v3820_v57  ;;  %v8320_v54 = vpop.eup %5372  ;;  %v5085_v42 = vmul.f32 -1.442695, %v4108_v11  ;;  %v3718_v57 = vld [vmem:[%s8866_s8 + $0x408] sm:$0xff]  ;;  %v9202_v4 = vld [vmem:[#allocation73_spill] sm:$0xff] }
 0x436   : > { %v3851_v32 = vadd.f32 %v3843_v49, %v3819_v27  ;;  %v4105_v23 = vadd.f32 %v3761_v19, %v9200_v17  ;;  %v5084_v12 = vmul.f32 -1.442695, %v4107_v35  ;;  %5382 = vpow2.f32 %v8195_v43  ;;  %v8329_v19 = vpop.eup %5374  ;;  %v9201_v27 = vld [vmem:[#allocation71_spill] sm:$0xff]  ;;  %v3817_v35 = vld [vmem:[%s8866_s8 + $0x560] sm:$0xff] }
 0x437   : > { %v3850_v40 = vadd.f32 %v3842_v38, %v3818_v9  ;;  %v3841_v14 = vmul.f32 %v3833_v46, %v3809_v37  ;;  %v4180_v9 = vadd.f32 %v3852_v20, %v9201_v27  ;;  %v5083_v38 = vmul.f32 -1.442695, %v4106_v44  ;;  %v3728_v37 = vld [vmem:[%s8866_s8 + $0x518] sm:$0xff]  ;;  %v8343_v43 = vpop.eup %5376  ;;  %v9203_v11 = vld [vmem:[#allocation75_spill] sm:$0xff]  ;;  %v3727_v20 = vld [vmem:[%s8866_s8 + $0x510] sm:$0xff] }
 0x438   : > { %v4179_v49 = vadd.f32 %v3851_v32, %v9202_v4  ;;  %5384 = vpow2.f32 %v8203_v7  ;;  %v3752_v44 = vmul.f32 %v3744_v53, %v3720_v15  ;;  %v9204_v10 = vsub.f32 %v9171_v0, %v8088_v52  ;;  %v3807_v32 = vld [vmem:[%s8866_s8 + $0x450] sm:$0xff]  ;;  %v3726_v7 = vld [vmem:[%s8866_s8 + $0x508] sm:$0xff]  ;;  %v8359_v17 = vpop.eup %5378  ;;  %v3816_v0 = vld [vmem:[%s8866_s8 + $0x558] sm:$0xff] }
 0x439   : > { %5386 = vpow2.f32 %v5085_v42  ;;  %v4178_v21 = vadd.f32 %v3850_v40, %v9203_v11  ;;  %9205 = vst [vmem:[#allocation32_spill] sm:$0xff] %v8359_v17  ;;  %v5082_v53 = vmul.f32 -1.442695, %v4105_v23  ;;  %v3751_v40 = vmul.f32 %v8263_v13, %v3719_v41  ;;  %v9208_v41 = vld [vmem:[#allocation81_spill] sm:$0xff] }
 0x43a   : > { %v3832_v46 = vmul.f32 %v8268_v45, %v9204_v10  ;;  %v9206_v15 = vsub.f32 %v9176_v6, %v8088_v52  ;;  %v3750_v27 = vmul.f32 %v8266_v47, %v3718_v57  ;;  %5388 = vpow2.f32 %v5084_v12  ;;  %v3815_v6 = vld [vmem:[%s8866_s8 + $0x550] sm:$0xff]  ;;  %v9209_v47 = vld [vmem:[#allocation55_spill] sm:$0xff] }
 0x43b   : > { %v3849_v4 = vadd.f32 %v3841_v14, %v3817_v35  ;;  %v3760_v11 = vadd.f32 %v3752_v44, %v3728_v37  ;;  %5390 = vtanh.f32 %v4180_v9  ;;  %v3759_v17 = vadd.f32 %v3751_v40, %v3727_v20  ;;  %v9210_v14 = vld [vmem:[#allocation84_spill] sm:$0xff]  ;;  %v9211_v9 = vld [vmem:[#allocation54_spill] sm:$0xff] }
 0x43c   : > { %v3831_v42 = vmul.f32 %v8268_v45, %v9206_v15  ;;  %v3840_v10 = vmul.f32 %v3832_v46, %v3808_v5  ;;  %v3758_v24 = vadd.f32 %v3750_v27, %v3726_v7  ;;  %5392 = vpow2.f32 %v5083_v38  ;;  %v3900_v38 = vld [vmem:[%s8866_s8 + $0x4b8] sm:$0xff]  ;;  %v3899_v20 = vld [vmem:[%s8866_s8 + $0x4b0] sm:$0xff]  ;;  %v9214_v7 = vld [vmem:[#allocation82_spill] sm:$0xff] }
 0x43d   : > { %v3912_v13 = vsub.f32 %v9207_v36, %v8170_v29  ;;  %v4104_v58 = vadd.f32 %v3760_v11, %v9208_v41  ;;  %5394 = vtanh.f32 %v4179_v49  ;;  %v3911_v12 = vsub.f32 %v9209_v47, %v8170_v29  ;;  %v9212_v36 = vld [vmem:[#allocation79_spill] sm:$0xff] }
 0x43e   : > { %v3839_v23 = vmul.f32 %v3831_v42, %v3807_v32  ;;  %v3848_v1 = vadd.f32 %v3840_v10, %v3816_v0  ;;  %v4103_v57 = vadd.f32 %v3759_v17, %v9210_v14  ;;  %v3910_v35 = vsub.f32 %v9211_v9, %v8170_v29  ;;  %v8391_v46 = vpop.eup %5380  ;;  %v3898_v32 = vld [vmem:[%s8866_s8 + $0x4a8] sm:$0xff]  ;;  %v3908_v0 = vld [vmem:[%s8866_s8 + $0x5b8] sm:$0xff] }
 0x43f   : > { %5396 = vpow2.f32 %v5082_v53  ;;  %v4177_v37 = vadd.f32 %v3849_v4, %v9212_v36  ;;  %v5081_v5 = vmul.f32 -1.442695, %v4104_v58  ;;  %v9213_v44 = vsub.f32 %v9180_v63, %v8088_v52  ;;  %v3897_v58 = vld [vmem:[%s8866_s8 + $0x4a0] sm:$0xff]  ;;  %v3907_v4 = vld [vmem:[%s8866_s8 + $0x5b0] sm:$0xff]  ;;  %v3904_v9 = vld [vmem:[%s8866_s8 + $0x598] sm:$0xff] }
 0x440   : > { %5398 = vtanh.f32 %v4178_v21  ;;  %v4176_v63 = vadd.f32 %v3848_v1, %v9214_v7  ;;  %v3847_v17 = vadd.f32 %v3839_v23, %v3815_v6  ;;  %v8404_v53 = vadd.f32 %v3758_v24, %v9175_v16  ;;  %v3903_v36 = vld [vmem:[%s8866_s8 + $0x590] sm:$0xff]  ;;  %v3894_v7 = vld [vmem:[%s8866_s8 + $0x488] sm:$0xff] }
 0x441   : > { %v8389_v49 = vmul.f32 %v8268_v45, %v9213_v44  ;;  %v9215_v40 = vsub.f32 %v9185_v26, %v8170_v29  ;;  %v9216_v21 = vsub.f32 %v9186_v2, %v8170_v29  ;;  %v9217_v1 = vsub.f32 %v9187_v18, %v8170_v29  ;;  %v3896_v26 = vld [vmem:[%s8866_s8 + $0x498] sm:$0xff]  ;;  %v3895_v2 = vld [vmem:[%s8866_s8 + $0x490] sm:$0xff]  ;;  %v3906_v18 = vld [vmem:[%s8866_s8 + $0x5a8] sm:$0xff] }
 0x442   : > { %v9218_v16 = vsub.f32 %v9188_v62, %v8170_v29  ;;  %v3905_v62 = vld [vmem:[%s8866_s8 + $0x5a0] sm:$0xff]  ;;  %v3920_v11 = vmul.f32 %v8391_v46, %v3912_v13  ;;  %5400 = vpow2.f32 %v5081_v5  ;;  %v3919_v10 = vmul.f32 %v8391_v46, %v3911_v12 }
 0x443   : > { %v3924_v15 = vmul.f32 %v8391_v46, %v9215_v40  ;;  %v3923_v42 = vmul.f32 %v8391_v46, %v9216_v21  ;;  %v3922_v24 = vmul.f32 %v8391_v46, %v9217_v1  ;;  %v5080_v23 = vmul.f32 -1.442695, %v4103_v57  ;;  %v8448_v44 = vpop.eup %5382  ;;  %v9219_v1 = vld [vmem:[#allocation74_spill] sm:$0xff] }
 0x444   : > { %v3921_v27 = vmul.f32 %v8391_v46, %v9218_v16  ;;  %5402 = vtanh.f32 %v4177_v37  ;;  %v3928_v13 = vmul.f32 %v3920_v11, %v3896_v26  ;;  %v3927_v5 = vmul.f32 %v3919_v10, %v3895_v2  ;;  %v9222_v2 = vld [vmem:[#allocation80_spill] sm:$0xff] }
 0x445   : > { %v3932_v41 = vmul.f32 %v3924_v15, %v3900_v38  ;;  %v3931_v6 = vmul.f32 %v3923_v42, %v3899_v20  ;;  %v3930_v47 = vmul.f32 %v3922_v24, %v3898_v32  ;;  %v3918_v12 = vmul.f32 %v8391_v46, %v3910_v35  ;;  %v8451_v57 = vpop.eup %5384  ;;  %v9220_v24 = vld [vmem:[#allocation76_spill] sm:$0xff] }
 0x446   : > { %v3929_v14 = vmul.f32 %v3921_v27, %v3897_v58  ;;  %v5387_v40 = vpop.eup %5386  ;;  %v3936_v15 = vadd.f32 %v3928_v13, %v3904_v9  ;;  %v3935_v21 = vadd.f32 %v3927_v5, %v3903_v36  ;;  %5404 = vpow2.f32 %v5080_v23  ;;  %v3806_v9 = vld [vmem:[%s8866_s8 + $0x448] sm:$0xff]  ;;  %v9224_v36 = vld [vmem:[#allocation53_spill] sm:$0xff] }
 0x447   : > { %v3940_v38 = vadd.f32 %v3932_v41, %v3908_v0  ;;  %v3939_v20 = vadd.f32 %v3931_v6, %v3907_v4  ;;  %v3938_v32 = vadd.f32 %v3930_v47, %v3906_v18  ;;  %v4175_v37 = vadd.f32 %v3847_v17, %v7611_v25  ;;  %v9221_v0 = vld [vmem:[#allocation77_spill] sm:$0xff]  ;;  %v5389_v26 = vpop.eup %5388  ;;  %v9223_v18 = vld [vmem:[#allocation83_spill] sm:$0xff] }
 0x448   : > { %v3937_v58 = vadd.f32 %v3929_v14, %v3905_v62  ;;  %v4140_v42 = vadd.f32 1.0, %v5387_v40  ;;  %v4256_v62 = vadd.f32 %v3936_v15, %v9223_v18  ;;  %v4255_v11 = vadd.f32 %v3935_v21, %v9155_v61  ;;  %v8464_v41 = vpop.eup %5390  ;;  %v3902_v6 = vld [vmem:[%s8866_s8 + $0x588] sm:$0xff]  ;;  %v4036_v40 = vld [vmem:[%s8469_s22 + $0x38] sm:$0xff]  ;;  %v4035_v15 = vld [vmem:[%s8469_s22 + $0x30] sm:$0xff] }
 0x449   : > { %v4260_v35 = vadd.f32 %v3940_v38, %v9219_v1  ;;  %v4259_v16 = vadd.f32 %v3939_v20, %v9220_v24  ;;  %v4258_v27 = vadd.f32 %v3938_v32, %v9221_v0  ;;  %v3926_v10 = vmul.f32 %v3918_v12, %v3894_v7  ;;  %v5393_v47 = vpop.eup %5392  ;;  %v3717_v1 = vld [vmem:[%s8866_s8 + $0x400] sm:$0xff] }
 0x44a   : > { %v4257_v4 = vadd.f32 %v3937_v58, %v9222_v2  ;;  %v4139_v17 = vadd.f32 1.0, %v5389_v26  ;;  %5406 = vtanh.f32 %v4176_v63  ;;  %v3909_v13 = vsub.f32 %v9224_v36, %v8170_v29  ;;  %v8479_v5 = vpop.eup %5394  ;;  %v3814_v26 = vld [vmem:[%s8866_s8 + $0x548] sm:$0xff]  ;;  %v3725_v2 = vld [vmem:[%s8866_s8 + $0x500] sm:$0xff] }
 0x44b   : > { %v4268_v25 = vadd.f32 1.0, %v4260_v35  ;;  %v4267_v23 = vadd.f32 1.0, %v4259_v16  ;;  %v4266_v14 = vadd.f32 1.0, %v4258_v27  ;;  %5408 = vtanh.f32 %v4175_v37 }
 0x44c   : > { %v4265_v61 = vadd.f32 1.0, %v4257_v4  ;;  %5410 = vrcp.f32 %v4140_v42  ;;  %v4264_v38 = vadd.f32 1.0, %v4256_v62  ;;  %v5397_v20 = vpop.eup %5396  ;;  %v4263_v58 = vadd.f32 1.0, %v4255_v11  ;;  %v3901_v11 = vld [vmem:[%s8866_s8 + $0x580] sm:$0xff] }
 0x44d   : > { %v5101_v63 = vmul.f32 -1.442695, %v4268_v25  ;;  %v5100_v12 = vmul.f32 -1.442695, %v4267_v23  ;;  %5412 = vrcp.f32 %v4139_v17  ;;  %v5099_v32 = vmul.f32 -1.442695, %v4266_v14  ;;  %v8483_v21 = vpop.eup %5398 }
 0x44e   : > { %v3934_v7 = vadd.f32 %v3926_v10, %v3902_v6  ;;  %v4138_v37 = vadd.f32 1.0, %v5393_v47  ;;  %v3838_v29 = vmul.f32 %v8389_v49, %v3806_v9  ;;  %v5079_v42 = vmul.f32 -1.442695, %v8404_v53  ;;  %v3893_v49 = vld [vmem:[%s8866_s8 + $0x480] sm:$0xff]  ;;  %v4034_v10 = vld [vmem:[%s8469_s22 + $0x28] sm:$0xff] }
 0x44f   : > { %5414 = vpow2.f32 %v5101_v63  ;;  %v5098_v35 = vmul.f32 -1.442695, %v4265_v61  ;;  %v9225_v16 = vsub.f32 %v9181_v50, %v7996_v60  ;;  %v5401_v53 = vpop.eup %5400  ;;  %v4137_v27 = vadd.f32 1.0, %v5397_v20  ;;  %v4033_v17 = vld [vmem:[%s8469_s22 + $0x20] sm:$0xff] }
 0x450   : > { %5416 = vpow2.f32 %v5100_v12  ;;  %v4254_v24 = vadd.f32 %v3934_v7, %v8097_v34  ;;  %v3917_v60 = vmul.f32 %v8391_v46, %v3909_v13  ;;  %v4412_v50 = vmul.f32 %v8291_v3, %v4036_v40  ;;  %v4032_v13 = vld [vmem:[%s8469_s22 + $0x18] sm:$0xff]  ;;  %v2622_v40 = vld [vmem:[%s8866_s8 + $0x280] sm:$0xff] }
 0x451   : > { %v3741_v0 = vmul.f32 %v8205_v56, %v9225_v16  ;;  %v4411_v56 = vmul.f32 %v8305_v59, %v4035_v15  ;;  %5418 = vpow2.f32 %v5099_v32  ;;  %v5097_v4 = vmul.f32 -1.442695, %v4264_v38  ;;  %v8520_v46 = vpop.eup %5402 }
 0x452   : > { %v5096_v18 = vmul.f32 -1.442695, %v4263_v58  ;;  %5420 = vrcp.f32 %v4138_v37  ;;  %v4262_v3 = vadd.f32 1.0, %v4254_v24  ;;  %v3925_v59 = vmul.f32 %v3917_v60, %v3893_v49  ;;  %v9231_v60 = vld [vmem:[#allocation31_spill] sm:$0xff] }
 0x453   : > { %v3749_v62 = vmul.f32 %v3741_v0, %v3717_v1  ;;  %v8523_v25 = vadd.f32 %v8118_v22, %v4412_v50  ;;  %5422 = vpow2.f32 %v5098_v35  ;;  %v4136_v23 = vadd.f32 1.0, %v5401_v53  ;;  %v5405_v14 = vpop.eup %5404  ;;  %v9226_v1 = vld [vmem:[#allocation45_spill] sm:$0xff]  ;;  %v9227_v0 = vld [vmem:[#allocation23_spill] sm:$0xff] }
 0x454   : > { %v8527_v47 = vadd.f32 %v8125_v33, %v4411_v56  ;;  %5424 = vrcp.f32 %v4137_v27  ;;  %v3846_v61 = vadd.f32 %v3838_v29, %v3814_v26  ;;  %v3933_v9 = vadd.f32 %v3925_v59, %v3901_v11  ;;  %v9228_v27 = vld [vmem:[#allocation69_spill] sm:$0xff]  ;;  %v2630_v56 = vld [vmem:[%s8866_s8 + $0x380] sm:$0xff] }
 0x455   : > { %v3757_v6 = vadd.f32 %v3749_v62, %v3725_v2  ;;  %4665 = vst [vmem:[%s8517_s23 + $0x38] sm:$0xff] %v8523_v25  ;;  %v4410_v36 = vmul.f32 %v8314_v8, %v4034_v10  ;;  %5426 = vpow2.f32 %v5097_v4  ;;  %v4135_v22 = vadd.f32 1.0, %v5405_v14  ;;  %v2446_v8 = vld [vmem:[%s8866_s8 + $0x200] sm:$0xff]  ;;  %v9230_v2 = vld [vmem:[#allocation24_spill] sm:$0xff] }
 0x456   : > { %4664 = vst [vmem:[%s8517_s23 + $0x30] sm:$0xff] %v8527_v47  ;;  %v4409_v12 = vmul.f32 %v8320_v54, %v4033_v17  ;;  %5428 = vpow2.f32 %v5096_v18  ;;  %v5095_v33 = vmul.f32 -1.442695, %v4262_v3  ;;  %v4253_v38 = vadd.f32 %v3933_v9, %v8109_v28  ;;  %v3805_v3 = vld [vmem:[%s8866_s8 + $0x440] sm:$0xff] }
 0x457   : > { %v4101_v63 = vadd.f32 %v3757_v6, %v8100_v55  ;;  %v8539_v20 = vadd.f32 %v8129_v30, %v4410_v36  ;;  %v8544_v32 = vpop.eup %5406  ;;  %5430 = vrcp.f32 %v4136_v23  ;;  %v4408_v54 = vmul.f32 %v8343_v43, %v4032_v13  ;;  %v9232_v17 = vld [vmem:[#allocation70_spill] sm:$0xff] }
 0x458   : > { %v8547_v7 = vadd.f32 %v8191_v48, %v4409_v12  ;;  %v8553_v30 = vpop.eup %5408  ;;  %5432 = vpow2.f32 %v5079_v42  ;;  %v4174_v15 = vadd.f32 %v3846_v61, %v8091_v31  ;;  %v4261_v37 = vadd.f32 1.0, %v4253_v38  ;;  %v2543_v48 = vld [vmem:[%s8866_s8 + $0x348] sm:$0xff] }
 0x459   : > { %v5078_v58 = vmul.f32 -1.442695, %v4101_v63  ;;  %4663 = vst [vmem:[%s8517_s23 + $0x28] sm:$0xff] %v8539_v20  ;;  %v4416_v29 = vmul.f32 %v8329_v19, %v8193_v39  ;;  %v8563_v43 = vpop.eup %5410  ;;  %5434 = vrcp.f32 %v4135_v22  ;;  %v3821_v35 = vsub.f32 %v9226_v1, %v8088_v52  ;;  %v2454_v19 = vld [vmem:[%s8866_s8 + $0x300] sm:$0xff] }
 0x45a   : > { %4662 = vst [vmem:[%s8517_s23 + $0x20] sm:$0xff] %v8547_v7  ;;  %v2478_v42 = vmul.f32 %v8157_v51, %v2446_v8  ;;  %v8570_v24 = vpop.eup %5412  ;;  %5436 = vpow2.f32 %v5095_v33  ;;  %v5094_v16 = vmul.f32 -1.442695, %v4261_v37  ;;  %v2654_v49 = vmul.f32 %v9227_v0, %v2622_v40  ;;  %v9229_v52 = vld [vmem:[#allocation2_spill] sm:$0xff] }
 0x45b   : > { %v8572_v39 = vadd.f32 %v4416_v29, %v4408_v54  ;;  %v1279_v26 = vsub.f32 %v9229_v52, %v9228_v27  ;;  %5438 = vpow2.f32 %v5078_v58  ;;  %v2575_v51 = vadd.f32 %v9230_v2, %v2543_v48 }
 0x45c   : > { %v5415_v53 = vpop.eup %5414  ;;  %v4190_v50 = vadd.f32 %v9231_v60, %v8097_v34  ;;  %5440 = vtanh.f32 %v4174_v15  ;;  %v3829_v62 = vmul.f32 %v8268_v45, %v3821_v35  ;;  %v4231_v11 = vadd.f32 1.0, %v8448_v44  ;;  %v1263_v44 = vld [vmem:[%s8866_s8 + $0x40] sm:$0xff] }
 0x45d   : > { %v5417_v4 = vpop.eup %5416  ;;  %v4300_v18 = vadd.f32 1.0, %v5415_v53  ;;  %4661 = vst [vmem:[%s8517_s23 + $0x18] sm:$0xff] %v8572_v39  ;;  %5442 = vpow2.f32 %v5094_v16  ;;  %v2486_v34 = vadd.f32 %v2478_v42, %v2454_v19  ;;  %v1287_v23 = vmul.f32 %v9232_v17, %v1279_v26  ;;  %v2534_v16 = vld [vmem:[%s8866_s8 + $0x240] sm:$0xff]  ;;  %v4044_v26 = vld [vmem:[%s8469_s22 + $0x78] sm:$0xff]  ;;  %v4042_v17 = vld [vmem:[%s8469_s22 + $0x68] sm:$0xff] }
 0x45e   : > { %v4299_v10 = vadd.f32 1.0, %v5417_v4  ;;  %v5419_v59 = vpop.eup %5418  ;;  %v4078_v6 = vadd.f32 1.0, %v8451_v57  ;;  %v2662_v14 = vadd.f32 %v2654_v49, %v2630_v56  ;;  %v4198_v9 = vadd.f32 1.0, %v4190_v50  ;;  %v3813_v57 = vld [vmem:[%s8866_s8 + $0x540] sm:$0xff]  ;;  %v4043_v56 = vld [vmem:[%s8469_s22 + $0x70] sm:$0xff] }
 0x45f   : > { %5444 = vrcp.f32 %v4300_v18  ;;  %v8595_v61 = vpop.eup %5420  ;;  %v4298_v45 = vadd.f32 1.0, %v5419_v59  ;;  %v3837_v13 = vmul.f32 %v3829_v62, %v3805_v3  ;;  %v4158_v22 = vadd.f32 %v2575_v51, %v8091_v31  ;;  %v1271_v31 = vld [vmem:[%s8866_s8 + $0x140] sm:$0xff]  ;;  %v9233_v51 = vld [vmem:[#allocation29_spill] sm:$0xff] }
 0x460   : > { %5446 = vrcp.f32 %v4299_v10  ;;  %v5423_v36 = vpop.eup %5422  ;;  %v4045_v33 = vadd.f32 %v2486_v34, %v8100_v55  ;;  %v1295_v8 = vmul.f32 %v1287_v23, %v1263_v44  ;;  %v4189_v58 = vadd.f32 %v2662_v14, %v8109_v28  ;;  %v2542_v4 = vld [vmem:[%s8866_s8 + $0x340] sm:$0xff]  ;;  %v4031_v10 = vld [vmem:[%s8469_s22 + $0x10] sm:$0xff] }
 0x461   : > { %5448 = vrcp.f32 %v4231_v11  ;;  %v8601_v63 = vpop.eup %5424  ;;  %v4297_v12 = vadd.f32 1.0, %v5423_v36  ;;  %v5087_v15 = vmul.f32 -1.442695, %v4198_v9  ;;  %v3845_v48 = vadd.f32 %v3837_v13, %v3813_v57  ;;  %v9234_v36 = vld [vmem:[#allocation21_spill] sm:$0xff]  ;;  %v9235_v13 = vld [vmem:[#allocation32_spill] sm:$0xff] }
 0x462   : > { %5450 = vrcp.f32 %v4298_v45  ;;  %v5427_v38 = vpop.eup %5426  ;;  %v5070_v55 = vmul.f32 -1.442695, %v4045_v33  ;;  %v1303_v42 = vadd.f32 %v1295_v8, %v1271_v31  ;;  %v4197_v19 = vadd.f32 1.0, %v4189_v58 }
 0x463   : > { %5452 = vrcp.f32 %v4078_v6  ;;  %v5429_v54 = vpop.eup %5428  ;;  %v4296_v40 = vadd.f32 1.0, %v5427_v38  ;;  %v2566_v60 = vmul.f32 %v9233_v51, %v2534_v16  ;;  %v4396_v59 = vmul.f32 %v8563_v43, %v8464_v41  ;;  %v4041_v41 = vld [vmem:[%s8469_s22 + $0x60] sm:$0xff]  ;;  %v4040_v38 = vld [vmem:[%s8469_s22 + $0x58] sm:$0xff] }
 0x464   : > { %5454 = vrcp.f32 %v4297_v12  ;;  %v8611_v37 = vpop.eup %5430  ;;  %v4295_v29 = vadd.f32 1.0, %v5429_v54  ;;  %v4173_v27 = vadd.f32 %v3845_v48, %v1303_v42  ;;  %v5086_v18 = vmul.f32 -1.442695, %v4197_v19 }
 0x465   : > { %5456 = vtanh.f32 %v4158_v22  ;;  %v5433_v1 = vpop.eup %5432  ;;  %v4395_v14 = vmul.f32 %v8570_v24, %v8479_v5  ;;  %v2574_v45 = vadd.f32 %v2566_v60, %v2542_v4  ;;  %v4415_v22 = vmul.f32 %v9235_v13, %v9234_v36 }
 0x466   : > { %5458 = vrcp.f32 %v4296_v40  ;;  %v8613_v35 = vpop.eup %5434  ;;  %v4134_v28 = vadd.f32 1.0, %v5433_v1  ;;  %v4394_v5 = vmul.f32 %v8595_v61, %v8483_v21  ;;  %v4393_v31 = vmul.f32 %v8601_v63, %v8520_v46 }
 0x467   : > { %5460 = vrcp.f32 %v4295_v29  ;;  %v5437_v0 = vpop.eup %5436  ;;  %v4157_v61 = vadd.f32 %v2574_v45, %v1303_v42  ;;  %v4391_v46 = vmul.f32 %v8613_v35, %v8553_v30  ;;  %v4038_v42 = vld [vmem:[%s8469_s22 + $0x48] sm:$0xff] }
 0x468   : > { %5462 = vpow2.f32 %v5087_v15  ;;  %v5439_v49 = vpop.eup %5438  ;;  %v4294_v53 = vadd.f32 1.0, %v5437_v0  ;;  %v4039_v15 = vld [vmem:[%s8469_s22 + $0x50] sm:$0xff] }
 0x469   : > { %5464 = vrcp.f32 %v4134_v28  ;;  %v8618_v52 = vpop.eup %5440  ;;  %v4133_v2 = vadd.f32 1.0, %v5439_v49  ;;  %v4392_v28 = vmul.f32 %v8611_v37, %v8544_v32 }
 0x46a   : > { %5466 = vpow2.f32 %v5070_v55  ;;  %v5443_v50 = vpop.eup %5442 }
 0x46b   : > { %5468 = vrcp.f32 %v4294_v53  ;;  %v4293_v11 = vadd.f32 1.0, %v5443_v50 }
 0x46c   : > { %v5445_v62 = vpop.eup %5444  ;;  %5470 = vrcp.f32 %v4133_v2  ;;  %v4037_v2 = vld [vmem:[%s8469_s22 + $0x40] sm:$0xff] }
 0x46d   : > { %v5447_v3 = vpop.eup %5446  ;;  %v4388_v34 = vmul.f32 %v5445_v62, %v4044_v26  ;;  %5472 = vtanh.f32 %v4173_v27 }
 0x46e   : > { %v5449_v23 = vpop.eup %5448  ;;  %v4387_v6 = vmul.f32 %v5447_v3, %v4043_v56  ;;  %5474 = vrcp.f32 %v4293_v11 }
 0x46f   : > { %v5451_v44 = vpop.eup %5450  ;;  %v4404_v9 = vadd.f32 %v4396_v59, %v4388_v34  ;;  %v4407_v43 = vmul.f32 %v5449_v23, %v4031_v10  ;;  %5476 = vpow2.f32 %v5086_v18 }
 0x470   : > { %v5453_v12 = vpop.eup %5452  ;;  %v4403_v57 = vadd.f32 %v4395_v14, %v4387_v6  ;;  %v4386_v33 = vmul.f32 %v5451_v44, %v4042_v17  ;;  %5478 = vtanh.f32 %v4157_v61 }
 0x471   : > { %v5455_v24 = vpop.eup %5454  ;;  %4465 = vmatprep.subr.mxu1 %v4404_v9  ;;  %4673 = vst [vmem:[%s8634_s24 + $0x38] sm:$0xff] %v4404_v9  ;;  %v4423_v8 = vadd.f32 %v4415_v22, %v4407_v43 }
 0x472   : > { %v5457_v58 = vpop.eup %5456  ;;  %4466 = vmatpush1.msra.mxu1 %v4403_v57  ;;  %4672 = vst [vmem:[%s8634_s24 + $0x30] sm:$0xff] %v4403_v57  ;;  %v4402_v54 = vadd.f32 %v4394_v5, %v4386_v33  ;;  %v4385_v40 = vmul.f32 %v5455_v24, %v4041_v41  ;;  %v4430_v57 = vld [vmem:[%s8865_s7 + $0x8] sm:$0xff] }
 0x473   : > { %v5459_v29 = vpop.eup %5458  ;;  %4660 = vst [vmem:[%s8517_s23 + $0x10] sm:$0xff] %v4423_v8  ;;  %v4414_v21 = vmul.f32 %v5457_v58, %v5453_v12  ;;  %v9236_v12 = vmov 0.0   ;;  %v4432_v58 = vld [vmem:[%s8865_s7 + $0x18] sm:$0xff] }
 0x474   : > { %v5461_v48 = vpop.eup %5460  ;;  %4467 = vmatprep.subr.mxu1 %v4402_v54  ;;  %4671 = vst [vmem:[%s8634_s24 + $0x28] sm:$0xff] %v4402_v54  ;;  %v4401_v1 = vadd.f32 %v4393_v31, %v4385_v40  ;;  %v4384_v55 = vmul.f32 %v5459_v29, %v4040_v38  ;;  %v4431_v38 = vld [vmem:[%s8865_s7 + $0x10] sm:$0xff] }
 0x475   : > { %v5463_v16 = vpop.eup %5462  ;;  %v4383_v19 = vmul.f32 %v5461_v48, %v4039_v15 }
 0x476   : > { %v5465_v63 = vpop.eup %5464  ;;  %4468 = vmatpush1.msra.mxu1 %v4401_v1  ;;  %4670 = vst [vmem:[%s8634_s24 + $0x20] sm:$0xff] %v4401_v1  ;;  %v4400_v0 = vadd.f32 %v4392_v28, %v4384_v55  ;;  %v4230_v49 = vadd.f32 1.0, %v5463_v16 }
 0x477   : > { %v5467_v53 = vpop.eup %5466  ;;  %v4399_v27 = vadd.f32 %v4391_v46, %v4383_v19  ;;  %v4390_v35 = vmul.f32 %v5465_v63, %v8618_v52  ;;  %v4030_v52 = vld [vmem:[%s8469_s22 + $0x8] sm:$0xff] }
 0x478   : > { %v5469_v26 = vpop.eup %5468  ;;  %4469 = vmatprep.subr.mxu1 %v4400_v0  ;;  %4669 = vst [vmem:[%s8634_s24 + $0x18] sm:$0xff] %v4400_v0  ;;  %5480 = vrcp.f32 %v4230_v49  ;;  %v4077_v32 = vadd.f32 1.0, %v5467_v53 }
 0x479   : > { %v5471_v37 = vpop.eup %5470  ;;  %4470 = vmatpush1.msra.mxu1 %v4399_v27  ;;  %4668 = vst [vmem:[%s8634_s24 + $0x10] sm:$0xff] %v4399_v27  ;;  %v4382_v30 = vmul.f32 %v5469_v26, %v4038_v42 }
 0x47a   : > { %v5473_v51 = vpop.eup %5472  ;;  %5482 = vrcp.f32 %v4077_v32 }
 0x47b   : > { %v5475_v60 = vpop.eup %5474  ;;  %v4398_v50 = vadd.f32 %v4390_v35, %v4382_v30  ;;  %v4389_v18 = vmul.f32 %v5473_v51, %v5471_v37 }
 0x47c   : > { %v5477_v56 = vpop.eup %5476  ;;  %v4381_v4 = vmul.f32 %v5475_v60, %v4037_v2 }
 0x47d   : > { %4471 = vmatprep.subr.mxu1 %v4398_v50  ;;  %4667 = vst [vmem:[%s8634_s24 + $0x8] sm:$0xff] %v4398_v50  ;;  %v4229_v62 = vadd.f32 1.0, %v5477_v56  ;;  %v5479_v10 = vpop.eup %5478 }
 0x47e   : > { %v4397_v11 = vadd.f32 %v4389_v18, %v4381_v4 }
 0x47f   : > { %5484 = vrcp.f32 %v4229_v62 }
 0x480   : > { %4472 = vmatpush1.msra.mxu1 %v4397_v11  ;;  %4666 = vst [vmem:[%s8634_s24] sm:$0xff] %v4397_v11 }
 0x481   : > { %4473 = vmatprep.subr.mxu1 %v8523_v25 }
 0x482   : > { %4474 = vmatpush1.msra.mxu1 %v8527_v47  ;;  %v4029_v47 = vld [vmem:[%s8469_s22] sm:$0xff] }
 0x483   : > { %4475 = vmatprep.subr.mxu1 %v8539_v20  ;;  %v3949_v6 = vpop.xlane.xlu0 %3948 }
 0x484   : > { %4476 = vmatpush1.msra.mxu1 %v8547_v7  ;;  %v3950_v25 = vrot.slane %v3949_v6, 4 }
 0x485   : > { %v5481_v3 = vpop.eup %5480  ;;  %4477 = vmatprep.subr.mxu1 %v8572_v39  ;;  %v4429_v39 = vld [vmem:[%s8865_s7] sm:$0xff] }
 0x486   : > { %4478 = vmatpush1.msra.mxu1 %v4423_v8  ;;  %v4406_v34 = vmul.f32 %v5481_v3, %v4030_v52  ;;  %v3951_v14 = vadd.f32 %v3950_v25, %v3949_v6 }
 0x487   : > { %v5483_v59 = vpop.eup %5482  ;;  %v3967_v45 = vpop.xlane.xlu1 %3966 }
 0x488   : > { %v4422_v17 = vadd.f32 %v4414_v21, %v4406_v34  ;;  %v4413_v23 = vmul.f32 %v5483_v59, %v5479_v10  ;;  %v3952_v9 = vrot.slane %v3951_v14, 2  ;;  %v3968_v7 = vrot.slane %v3967_v45, 4 }
 0x48a   : > { %4479 = vmatprep.subr.mxu1 %v4422_v17  ;;  %4659 = vst [vmem:[%s8517_s23 + $0x8] sm:$0xff] %v4422_v17  ;;  %v3969_v43 = vadd.f32 %v3968_v7, %v3967_v45  ;;  %v3953_v36 = vadd.f32 %v3952_v9, %v3951_v14 }
 0x48c   : > { %v5485_v20 = vpop.eup %5484  ;;  %v3970_v13 = vrot.slane %v3969_v43, 2  ;;  %v3954_v22 = vrot.slane %v3953_v36, 1 }
 0x48d   : > { %v4405_v44 = vmul.f32 %v5485_v20, %v4029_v47 }
 0x48e   : > { %v3955_v33 = vadd.f32 %v3954_v22, %v3953_v36  ;;  %v3971_v5 = vadd.f32 %v3970_v13, %v3969_v43  ;;  %v9237_v43 = vld [vmem:[#allocation61_spill] sm:$0xff]  ;;  %v9238_v13 = vld [vmem:[#allocation62_spill] sm:$0xff] }
 0x48f   : > { %v4421_v41 = vadd.f32 %v4413_v23, %v4405_v44 }
 0x490   : > { %5168 = vpush %v3955_v33  ;;  %v3972_v24 = vrot.slane %v3971_v5, 1 }
 0x491   : > { %4480 = vmatpush1.msra.mxu1 %v4421_v41  ;;  %4658 = vst [vmem:[%s8517_s23] sm:$0xff] %v4421_v41 }
 0x492   : > { %5112 = vmatmul.mubr.msk.f32.vlgmr.msra.gmra.mxu1 %vm4433_vm1, %v4429_v39  ;;  %v3973_v8 = vadd.f32 %v3972_v24, %v3971_v5  ;;  %v9240_v5 = vld [vmem:[#allocation64_spill] sm:$0xff] }
 0x493   : > { %4519 = vmatprep.mubr.f32.mxu1 %v9236_v12 }
 0x494   : > { %5170 = vpush %v3973_v8 }
 0x496   : > { %5113 = vmatmul.mubr.msk.f32.gmra.mxu1 %vm4433_vm1, %v4430_v57 }
 0x497   : > { %4525 = vmatprep.mubr.f32.mxu1 %v9236_v12 }
 0x49a   : > { %5114 = vmatmul.mubr.msk.f32.gmra.mxu1 %vm4433_vm1, %v4431_v38  ;;  %v3981_v38 = vld [vmem:[%s8866_s8 + $0x4c0] sm:$0xff] }
 0x49b   : > { %4531 = vmatprep.mubr.f32.mxu1 %v9236_v12  ;;  %v9239_v12 = vld [vmem:[#allocation63_spill] sm:$0xff] }
 0x49e   : > { %5115 = vmatmul.mubr.msk.f32.gmra.mxu1 %vm4433_vm1, %v4432_v58  ;;  %v9241_v58 = vld [vmem:[#allocation65_spill] sm:$0xff] }
 0x4c1   : > { %s5169_s27 = spop %5168 }
 0x4c2   : > { %v3957_v34 = vstv %s5169_s27 }
 0x4c3   : > { %v3958_v47 = vmul.f32 0.00012207031, %v3957_v34 }
 0x4c5   : > { %s5171_s28 = spop %5170  ;;  %v3977_v44 = vmul.f32 %v3958_v47, %v3958_v47  ;;  %v3997_v36 = vsub.f32 %v9237_v43, %v3958_v47  ;;  %v3998_v22 = vsub.f32 %v9238_v13, %v3958_v47  ;;  %v3999_v57 = vsub.f32 %v9239_v12, %v3958_v47  ;;  %v9247_v13 = vld [vmem:[#allocation13_spill] sm:$0xff]  ;;  %v9248_v12 = vld [vmem:[#allocation28_spill] sm:$0xff] }
 0x4c6   : > { %v3975_v23 = vstv %s5171_s28  ;;  %v4000_v24 = vsub.f32 %v9240_v5, %v3958_v47  ;;  %v9249_v5 = vld [vmem:[#allocation27_spill] sm:$0xff] }
 0x4c7   : > { %v3976_v45 = vmul.f32 0.00012207031, %v3975_v23  ;;  %v3988_v23 = vld [vmem:[%s8866_s8 + $0x4f8] sm:$0xff] }
 0x4c9   : > { %v3978_v7 = vsub.f32 %v3976_v45, %v3977_v44  ;;  %v9245_v45 = vld [vmem:[#allocation16_spill] sm:$0xff] }
 0x4cb   : > { %v3979_v41 = vadd.f32 1e-05, %v3978_v7 }
 0x4cd   : > { %5486 = vrsqrt.f32 %v3979_v41 }
 0x4da   : > { %v5487_v39 = vpop.eup %5486 }
 0x4db   : > { %v4005_v33 = vmul.f32 %v5487_v39, %v3997_v36  ;;  %v4006_v8 = vmul.f32 %v5487_v39, %v3998_v22  ;;  %v3996_v36 = vld [vmem:[%s8866_s8 + $0x5f8] sm:$0xff] }
 0x552   : > { %v8691_v54 = vpop.f32.mrf.mxu1 }
 0x553   : > { %v4556_v31 = vmul.f32 %v8691_v54, %v8691_v54 }
 0x554   : > { %v8693_v40 = vpop.f32.mrf.mxu1 }
 0x555   : > { %v4538_v15 = vadd.f32 %v8693_v40, %v8691_v54  ;;  %v4557_v29 = vmul.f32 %v8693_v40, %v8693_v40 }
 0x556   : > { %v8701_v21 = vpop.f32.mrf.mxu1 }
 0x557   : > { %v4564_v61 = vadd.f32 %v4557_v29, %v4556_v31  ;;  %v4539_v48 = vadd.f32 %v4538_v15, %v8701_v21  ;;  %v4558_v1 = vmul.f32 %v8701_v21, %v8701_v21  ;;  %v4001_v31 = vsub.f32 %v9241_v58, %v3958_v47  ;;  %v3982_v15 = vld [vmem:[%s8866_s8 + $0x4c8] sm:$0xff]  ;;  %v9250_v58 = vld [vmem:[#allocation25_spill] sm:$0xff] }
 0x558   : > { %v8706_v55 = vpop.f32.mrf.mxu1  ;;  %v4007_v29 = vmul.f32 %v5487_v39, %v3999_v57 }
 0x559   : > { %v4565_v28 = vadd.f32 %v4564_v61, %v4558_v1  ;;  %v4540_v16 = vadd.f32 %v4539_v48, %v8706_v55  ;;  %v4559_v19 = vmul.f32 %v8706_v55, %v8706_v55  ;;  %v9242_v61 = vld [vmem:[#allocation66_spill] sm:$0xff]  ;;  %v3983_v1 = vld [vmem:[%s8866_s8 + $0x4d0] sm:$0xff] }
 0x55a   : > { %v8711_v46 = vpop.f32.mrf.mxu1  ;;  %v4002_v48 = vsub.f32 %v9242_v61, %v3958_v47 }
 0x55b   : > { %v4566_v63 = vadd.f32 %v4565_v28, %v4559_v19  ;;  %v4541_v0 = vadd.f32 %v4540_v16, %v8711_v46  ;;  %v4560_v42 = vmul.f32 %v8711_v46, %v8711_v46  ;;  %v4008_v28 = vmul.f32 %v5487_v39, %v4000_v24  ;;  %v3984_v16 = vld [vmem:[%s8866_s8 + $0x4d8] sm:$0xff] }
 0x55c   : > { %v8716_v49 = vpop.f32.mrf.mxu1  ;;  %v4009_v19 = vmul.f32 %v5487_v39, %v4001_v31 }
 0x55d   : > { %v4567_v53 = vadd.f32 %v4566_v63, %v4560_v42  ;;  %v4542_v27 = vadd.f32 %v4541_v0, %v8716_v49  ;;  %v4561_v26 = vmul.f32 %v8716_v49, %v8716_v49  ;;  %v4013_v63 = vmul.f32 %v4005_v33, %v3981_v38  ;;  %v3985_v0 = vld [vmem:[%s8866_s8 + $0x4e0] sm:$0xff] }
 0x55e   : > { %v8721_v32 = vpop.f32.mrf.mxu1  ;;  %v3989_v42 = vld [vmem:[%s8866_s8 + $0x5c0] sm:$0xff] }
 0x55f   : > { %v4568_v37 = vadd.f32 %v4567_v53, %v4561_v26  ;;  %v4543_v30 = vadd.f32 %v4542_v27, %v8721_v32  ;;  %v4562_v35 = vmul.f32 %v8721_v32, %v8721_v32  ;;  %v4010_v53 = vmul.f32 %v5487_v39, %v4002_v48  ;;  %v9243_v26 = vld [vmem:[#allocation67_spill] sm:$0xff]  ;;  %v9251_v48 = vld [vmem:[#allocation26_spill] sm:$0xff] }
 0x560   : > { %v8726_v2 = vpop.f32.mrf.mxu1  ;;  %v4014_v27 = vmul.f32 %v4006_v8, %v3982_v15 }
 0x561   : > { %v4569_v51 = vadd.f32 %v4568_v37, %v4562_v35  ;;  %v4544_v60 = vadd.f32 %v4543_v30, %v8726_v2  ;;  %v4563_v50 = vmul.f32 %v8726_v2, %v8726_v2  ;;  %v4003_v37 = vsub.f32 %v9243_v26, %v3958_v47  ;;  %v3986_v30 = vld [vmem:[%s8866_s8 + $0x4e8] sm:$0xff] }
 0x562   : > { %v3990_v35 = vld [vmem:[%s8866_s8 + $0x5c8] sm:$0xff] }
 0x563   : > { %v4570_v56 = vadd.f32 %v4569_v51, %v4563_v50  ;;  %4545 = vadd.xlane.f32.xlu0 %v4544_v60  ;;  %v4015_v51 = vmul.f32 %v4007_v29, %v3983_v1  ;;  %v9244_v60 = vld [vmem:[#allocation68_spill] sm:$0xff] }
 0x564   : > { %v4004_v50 = vsub.f32 %v9244_v60, %v3958_v47 }
 0x565   : > { %4571 = vadd.xlane.f32.xlu1 %v4570_v56  ;;  %v3991_v56 = vld [vmem:[%s8866_s8 + $0x5d0] sm:$0xff] }
 0x566   : > { %v4012_v34 = vmul.f32 %v5487_v39, %v4004_v50 }
 0x568   : > { %v4020_v7 = vmul.f32 %v4012_v34, %v3988_v23 }
 0x56a   : > { %v4028_v8 = vadd.f32 %v4020_v7, %v3996_v36 }
 0x5ec   : > { %v4546_v4 = vpop.xlane.xlu0 %4545 }
 0x5ed   : > { %v4547_v18 = vrot.slane %v4546_v4, 4 }
 0x5ee   : > { %v4572_v62 = vpop.xlane.xlu1 %4571 }
 0x5ef   : > { %v4548_v11 = vadd.f32 %v4547_v18, %v4546_v4  ;;  %v4573_v52 = vrot.slane %v4572_v62, 4  ;;  %v4016_v4 = vmul.f32 %v4008_v28, %v3984_v16  ;;  %v3992_v18 = vld [vmem:[%s8866_s8 + $0x5d8] sm:$0xff]  ;;  %v9252_v16 = vld [vmem:[#allocation30_spill] sm:$0xff] }
 0x5f1   : > { %v4549_v10 = vrot.slane %v4548_v11, 2  ;;  %v4574_v3 = vadd.f32 %v4573_v52, %v4572_v62  ;;  %v4011_v62 = vmul.f32 %v5487_v39, %v4003_v37  ;;  %v4021_v52 = vadd.f32 %v4013_v63, %v3989_v42  ;;  %v9246_v39 = vld [vmem:[#allocation15_spill] sm:$0xff] }
 0x5f2   : > { %v4024_v47 = vadd.f32 %v4016_v4, %v3992_v18 }
 0x5f3   : > { %v4550_v59 = vadd.f32 %v4549_v10, %v4548_v11  ;;  %v4575_v17 = vrot.slane %v4574_v3, 2  ;;  %v4017_v11 = vmul.f32 %v4009_v19, %v3985_v0  ;;  %v3987_v10 = vld [vmem:[%s8866_s8 + $0x4f0] sm:$0xff]  ;;  %v4325_v44 = vadd.f32 %v9245_v45, %v4021_v52 }
 0x5f4   : > { %v4328_v57 = vadd.f32 %v9248_v12, %v4024_v47  ;;  %v4332_v19 = vadd.f32 %v9252_v16, %v4028_v8  ;;  %v4595_v12 = vld [vmem:[%s8866_s8 + $0x648] sm:$0xff]  ;;  %v4593_v8 = vld [vmem:[%s8866_s8 + $0x638] sm:$0xff] }
 0x5f5   : > { %v4576_v6 = vadd.f32 %v4575_v17, %v4574_v3  ;;  %v4551_v25 = vrot.slane %v4550_v59, 1  ;;  %v3993_v3 = vld [vmem:[%s8866_s8 + $0x5e0] sm:$0xff]  ;;  %v4022_v17 = vadd.f32 %v4014_v27, %v3990_v35  ;;  %v5102_v38 = vmul.f32 -1.442695, %v4325_v44  ;;  %v4599_v16 = vld [vmem:[%s8866_s8 + $0x668] sm:$0xff] }
 0x5f6   : > { %v5105_v61 = vmul.f32 -1.442695, %v4328_v57  ;;  %v5109_v27 = vmul.f32 -1.442695, %v4332_v19  ;;  %v4586_v44 = vld [vmem:[%s8866_s8 + $0x600] sm:$0xff]  ;;  %v4596_v57 = vld [vmem:[%s8866_s8 + $0x650] sm:$0xff] }
 0x5f7   : > { %v4552_v14 = vadd.f32 %v4551_v25, %v4550_v59  ;;  %v4577_v20 = vrot.slane %v4576_v6, 1  ;;  %v4018_v59 = vmul.f32 %v4010_v53, %v3986_v30  ;;  %v4023_v25 = vadd.f32 %v4015_v51, %v3991_v56 }
 0x5f8   : > { %v4326_v43 = vadd.f32 %v9246_v39, %v4022_v17  ;;  %5488 = vpow2.f32 %v5102_v38 }
 0x5f9   : > { %5172 = vpush %v4552_v14  ;;  %v4578_v9 = vadd.f32 %v4577_v20, %v4576_v6  ;;  %v3994_v6 = vld [vmem:[%s8866_s8 + $0x5e8] sm:$0xff]  ;;  %v4019_v14 = vmul.f32 %v4011_v62, %v3987_v10  ;;  %v4025_v20 = vadd.f32 %v4017_v11, %v3993_v3  ;;  %v4327_v22 = vadd.f32 %v9247_v13, %v4023_v25 }
 0x5fa   : > { %v4026_v41 = vadd.f32 %v4018_v59, %v3994_v6  ;;  %v5103_v15 = vmul.f32 -1.442695, %v4326_v43 }
 0x5fb   : > { %5174 = vpush %v4578_v9  ;;  %v3995_v9 = vld [vmem:[%s8866_s8 + $0x5f0] sm:$0xff]  ;;  %v4329_v24 = vadd.f32 %v9249_v5, %v4025_v20  ;;  %v5104_v29 = vmul.f32 -1.442695, %v4327_v22  ;;  %v4594_v22 = vld [vmem:[%s8866_s8 + $0x640] sm:$0xff] }
 0x5fc   : > { %v4027_v33 = vadd.f32 %v4019_v14, %v3995_v9  ;;  %v4330_v31 = vadd.f32 %v9250_v58, %v4026_v41  ;;  %5490 = vpow2.f32 %v5103_v15  ;;  %v4597_v58 = vld [vmem:[%s8866_s8 + $0x658] sm:$0xff] }
 0x5fd   : > { %v5106_v28 = vmul.f32 -1.442695, %v4329_v24  ;;  %5492 = vpow2.f32 %v5104_v29 }
 0x5fe   : > { %v4331_v1 = vadd.f32 %v9251_v48, %v4027_v33  ;;  %v5107_v63 = vmul.f32 -1.442695, %v4330_v31  ;;  %5494 = vpow2.f32 %v5105_v61  ;;  %v4598_v48 = vld [vmem:[%s8866_s8 + $0x660] sm:$0xff] }
 0x5ff   : > { %5496 = vpow2.f32 %v5106_v28 }
 0x600   : > { %v5108_v42 = vmul.f32 -1.442695, %v4331_v1  ;;  %5498 = vpow2.f32 %v5107_v63 }
 0x602   : > { %5500 = vpow2.f32 %v5108_v42 }
 0x603   : > { %5502 = vpow2.f32 %v5109_v27  ;;  %v4600_v27 = vld [vmem:[%s8866_s8 + $0x670] sm:$0xff] }
 0x605   : > { %v5489_v60 = vpop.eup %5488 }
 0x606   : > { %v4357_v18 = vadd.f32 1.0, %v5489_v60 }
 0x609   : > { %v5491_v50 = vpop.eup %5490 }
 0x60a   : > { %v5493_v56 = vpop.eup %5492  ;;  %v4358_v11 = vadd.f32 1.0, %v5491_v50 }
 0x60b   : > { %v5495_v4 = vpop.eup %5494  ;;  %v4359_v10 = vadd.f32 1.0, %v5493_v56 }
 0x60c   : > { %v5497_v62 = vpop.eup %5496  ;;  %v4360_v3 = vadd.f32 1.0, %v5495_v4 }
 0x60d   : > { %v5499_v52 = vpop.eup %5498  ;;  %v4361_v34 = vadd.f32 1.0, %v5497_v62 }
 0x60e   : > { %v4362_v17 = vadd.f32 1.0, %v5499_v52 }
 0x60f   : > { %v5501_v59 = vpop.eup %5500 }
 0x610   : > { %v5503_v23 = vpop.eup %5502  ;;  %v4363_v6 = vadd.f32 1.0, %v5501_v59 }
 0x611   : > { %v4364_v25 = vadd.f32 1.0, %v5503_v23 }
 0x62a   : > { %s5173_s27 = spop %5172 }
 0x62b   : > { %v4554_v0 = vstv %s5173_s27 }
 0x62c   : > { %v4555_v53 = vmul.f32 0.00012207031, %v4554_v0  ;;  %s5175_s28 = spop %5174 }
 0x62d   : > { %v4580_v26 = vstv %s5175_s28 }
 0x62e   : > { %v4581_v37 = vmul.f32 0.00012207031, %v4580_v26  ;;  %v4582_v30 = vmul.f32 %v4555_v53, %v4555_v53  ;;  %v4602_v47 = vsub.f32 %v8691_v54, %v4555_v53  ;;  %v4603_v14 = vsub.f32 %v8693_v40, %v4555_v53  ;;  %v4587_v54 = vld [vmem:[%s8866_s8 + $0x608] sm:$0xff]  ;;  %v4588_v40 = vld [vmem:[%s8866_s8 + $0x610] sm:$0xff] }
 0x62f   : > { %v4604_v20 = vsub.f32 %v8701_v21, %v4555_v53  ;;  %v4605_v45 = vsub.f32 %v8706_v55, %v4555_v53  ;;  %v4606_v7 = vsub.f32 %v8711_v46, %v4555_v53  ;;  %v4607_v41 = vsub.f32 %v8716_v49, %v4555_v53  ;;  %v4589_v21 = vld [vmem:[%s8866_s8 + $0x618] sm:$0xff]  ;;  %v4590_v55 = vld [vmem:[%s8866_s8 + $0x620] sm:$0xff]  ;;  %v4591_v46 = vld [vmem:[%s8866_s8 + $0x628] sm:$0xff] }
 0x630   : > { %v4583_v35 = vsub.f32 %v4581_v37, %v4582_v30  ;;  %v4608_v39 = vsub.f32 %v8721_v32, %v4555_v53  ;;  %v4609_v43 = vsub.f32 %v8726_v2, %v4555_v53  ;;  %v4592_v49 = vld [vmem:[%s8866_s8 + $0x630] sm:$0xff] }
 0x632   : > { %v4584_v51 = vadd.f32 1e-05, %v4583_v35  ;;  %v4601_v35 = vld [vmem:[%s8866_s8 + $0x678] sm:$0xff] }
 0x634   : > { %5504 = vrsqrt.f32 %v4584_v51 }
 0x635   : > { %5506 = vrcp.f32 %v4357_v18 }
 0x636   : > { %5508 = vrcp.f32 %v4358_v11 }
 0x637   : > { %5510 = vrcp.f32 %v4359_v10 }
 0x638   : > { %5512 = vrcp.f32 %v4360_v3 }
 0x639   : > { %5514 = vrcp.f32 %v4361_v34 }
 0x63a   : > { %5516 = vrcp.f32 %v4362_v17 }
 0x63b   : > { %5518 = vrcp.f32 %v4363_v6 }
 0x63c   : > { %5520 = vrcp.f32 %v4364_v25 }
 0x641   : > { %v5505_v9 = vpop.eup %5504 }
 0x642   : > { %v4610_v32 = vmul.f32 %v5505_v9, %v4602_v47  ;;  %v4611_v2 = vmul.f32 %v5505_v9, %v4603_v14  ;;  %v4612_v36 = vmul.f32 %v5505_v9, %v4604_v20  ;;  %v4613_v13 = vmul.f32 %v5505_v9, %v4605_v45  ;;  %v5507_v53 = vpop.eup %5506 }
 0x643   : > { %v4614_v33 = vmul.f32 %v5505_v9, %v4606_v7  ;;  %v4615_v5 = vmul.f32 %v5505_v9, %v4607_v41  ;;  %v4616_v24 = vmul.f32 %v5505_v9, %v4608_v39  ;;  %v4617_v38 = vmul.f32 %v5505_v9, %v4609_v43  ;;  %v5509_v30 = vpop.eup %5508 }
 0x644   : > { %v4618_v31 = vmul.f32 %v4610_v32, %v4586_v44  ;;  %v4619_v15 = vmul.f32 %v4611_v2, %v4587_v54  ;;  %v4620_v29 = vmul.f32 %v4612_v36, %v4588_v40  ;;  %v4621_v61 = vmul.f32 %v4613_v13, %v4589_v21  ;;  %v5511_v60 = vpop.eup %5510 }
 0x645   : > { %v4622_v1 = vmul.f32 %v4614_v33, %v4590_v55  ;;  %v4623_v28 = vmul.f32 %v4615_v5, %v4591_v46  ;;  %v4624_v19 = vmul.f32 %v4616_v24, %v4592_v49  ;;  %v4625_v26 = vmul.f32 %v4617_v38, %v4593_v8  ;;  %v5513_v56 = vpop.eup %5512 }
 0x646   : > { %v4626_v63 = vadd.f32 %v4618_v31, %v4594_v22  ;;  %v4627_v0 = vadd.f32 %v4619_v15, %v4595_v12  ;;  %v4628_v42 = vadd.f32 %v4620_v29, %v4596_v57  ;;  %v4629_v37 = vadd.f32 %v4621_v61, %v4597_v58  ;;  %v5515_v18 = vpop.eup %5514 }
 0x647   : > { %v4630_v51 = vadd.f32 %v4622_v1, %v4598_v48  ;;  %v4631_v50 = vadd.f32 %v4623_v28, %v4599_v16  ;;  %v4632_v4 = vadd.f32 %v4624_v19, %v4600_v27  ;;  %v4633_v62 = vadd.f32 %v4625_v26, %v4601_v35  ;;  %v5517_v11 = vpop.eup %5516 }
 0x648   : > { %5522 = vtanh.f32 %v4626_v63  ;;  %v5519_v52 = vpop.eup %5518 }
 0x649   : > { %5524 = vtanh.f32 %v4627_v0  ;;  %v5521_v10 = vpop.eup %5520 }
 0x64a   : > { %5526 = vtanh.f32 %v4628_v42 }
 0x64b   : > { %5528 = vtanh.f32 %v4629_v37 }
 0x64c   : > { %5530 = vtanh.f32 %v4630_v51 }
 0x64d   : > { %5532 = vtanh.f32 %v4631_v50 }
 0x64e   : > { %5534 = vtanh.f32 %v4632_v4 }
 0x64f   : > { %5536 = vtanh.f32 %v4633_v62 }
 0x655   : > { %v5523_v3 = vpop.eup %5522 }
 0x656   : > { %v5525_v34 = vpop.eup %5524  ;;  %v4642_v59 = vmul.f32 %v5523_v3, %v5507_v53 }
 0x657   : > { %v5527_v17 = vpop.eup %5526  ;;  %v4643_v23 = vmul.f32 %v5525_v34, %v5509_v30 }
 0x658   : > { %v5529_v6 = vpop.eup %5528  ;;  %v4644_v25 = vmul.f32 %v5527_v17, %v5511_v60  ;;  %4650 = vst [vmem:[%s461_s30] sm:$0xff] %v4642_v59 }
 0x659   : > { %v5531_v47 = vpop.eup %5530  ;;  %v4645_v14 = vmul.f32 %v5529_v6, %v5513_v56  ;;  %4651 = vst [vmem:[%s461_s30 + $0x8] sm:$0xff] %v4643_v23 }
 0x65a   : > { %v5533_v20 = vpop.eup %5532  ;;  %v4646_v45 = vmul.f32 %v5531_v47, %v5515_v18  ;;  %4652 = vst [vmem:[%s461_s30 + $0x10] sm:$0xff] %v4644_v25 }
 0x65b   : > { %v5535_v44 = vpop.eup %5534  ;;  %v4647_v9 = vmul.f32 %v5533_v20, %v5517_v11  ;;  %4653 = vst [vmem:[%s461_s30 + $0x18] sm:$0xff] %v4645_v14 }
 0x65c   : > { %v5537_v7 = vpop.eup %5536  ;;  %v4648_v41 = vmul.f32 %v5535_v44, %v5519_v52  ;;  %4654 = vst [vmem:[%s461_s30 + $0x20] sm:$0xff] %v4646_v45 }
 0x65d   : > { %v4649_v39 = vmul.f32 %v5537_v7, %v5521_v10  ;;  %4655 = vst [vmem:[%s461_s30 + $0x28] sm:$0xff] %v4647_v9 }
 0x65e   : > { %4656 = vst [vmem:[%s461_s30 + $0x30] sm:$0xff] %v4648_v41 }
 0x65f   : > { %4657 = vst [vmem:[%s461_s30 + $0x38] sm:$0xff] %v4649_v39 }
 0x660 PF: > { %s22_s17 = sadd.s32 1, %s5546_s17  }
 0x661   : > { %p19_p4 = scmp.ge.s32.totalorder %s22_s17, 4  }
 0x663   :  { %21 = sbr.rel (!%p19_p4) target bundleno = 1 (0x1), region = 120 }

</bundles_post_ra>
